<compile_context>
chip_gen: v7x
topology: tpu7x:2x2x1
jax: 0.10.0
libtpu: 0.0.40
codegen_flags: <defaults>
</compile_context>

<pallas_src>
import functools

import numpy as np
import jax
import jax.numpy as jnp
from jax.experimental import pallas as pl
from jax.experimental.pallas import tpu as pltpu


# Encoder geometry (matches the PyTorch module).
IN_CH = (2, 16, 32)
OUT_CH = (16, 32, 64)
KH, KW = 3, 5
PH, PW = 1, 2
STRIDE_W = (1, 2, 2)          # stride_h is 1 in every block
BN_EPS = 1e-5


def _ru128(v):
    return -(-v // 128) * 128


# ---------------------------------------------------------------------------
# Host-side constant builders (numpy, trace/prep time only).
# ---------------------------------------------------------------------------
def _repack_selection_np(B, H, pitch_in, wv_in, nc_in, half_out, buf_out):
    """0/1 matrix mapping a flat conv output (B images concatenated, per-image span
    (H+2)*pitch_in, valid value (h,w) at column h*pitch_in+w) onto the merged
    [even | odd] zero-padded, de-interleaved flat buffers consumed by the following
    stride-2 conv layer (per-image span (H+2)*half_out in each half)."""
    rows = H + 2 * PH
    l_in = rows * pitch_in
    l_out = rows * half_out
    sel = np.zeros((nc_in, 2 * buf_out), np.float32)
    for par in (0, 1):
        for b in range(B):
            for r in range(rows):
                for t in range(half_out):
                    h = r - PH
                    w = 2 * t + par - PW
                    if 0 <= h < H and 0 <= w < wv_in:
                        src = b * l_in + h * pitch_in + w
                        dst = par * buf_out + b * l_out + r * half_out + t
                        sel[src, dst] = 1.0
    return sel


def _out_selection_np(B, H, pitch_in, wv, nc_in):
    """0/1 matrix dropping per-row junk columns of the final conv output, yielding a
    dense (C, B*H*wv) batch-major flat NCHW result."""
    rows = H + 2 * PH
    l_in = rows * pitch_in
    sel = np.zeros((nc_in, B * H * wv), np.float32)
    for b in range(B):
        for h in range(H):
            for w in range(wv):
                sel[b * l_in + h * pitch_in + w, (b * H + h) * wv + w] = 1.0
    return sel


# ---------------------------------------------------------------------------
# The fused kernel.
# ---------------------------------------------------------------------------
def _encoder_kernel(x_ref, w1_ref, b1_ref, a1_ref,
                    s2_ref, w2_ref, b2_ref, a2_ref,
                    s3_ref, w3_ref, b3_ref, a3_ref,
                    sout_ref, o_ref, *,
                    pitch1, half2, half3, nc1, nc2, nc3, buf2, buf3):
    f32, bf16 = jnp.float32, jnp.bfloat16

    def bias_prelu(y, b_ref, a_ref):
        y = y + b_ref[...]                               # folded-BN bias, (C,1) bcast
        return jnp.where(y >= 0.0, y, a_ref[...] * y)    # PReLU (per-channel slope)

    def taps_s1(src, pitch, n):
        # stride-1 conv: tap (kh, kw) is the contiguous slice starting at kh*pitch+kw
        return jnp.concatenate(
            [src[:, kh * pitch + kw: kh * pitch + kw + n]
             for kh in range(KH) for kw in range(KW)], axis=0)

    def taps_s2(even, odd, half, n):
        # stride-2 (W) conv on the even/odd de-interleaved, zero-padded flats
        cols = []
        for kh in range(KH):
            for kw in range(KW):
                src = even if kw % 2 == 0 else odd
                off = kh * half + kw // 2
                cols.append(src[:, off:off + n])
        return jnp.concatenate(cols, axis=0)

    # ---- block 1: conv(3x5, s=1) + BN + PReLU (im2col built in-kernel) -----
    pat1 = taps_s1(x_ref[...], pitch1, nc1).astype(bf16)         # (KH*KW*C0, nc1)
    y1 = jnp.dot(w1_ref[...], pat1, preferred_element_type=f32)
    y1 = bias_prelu(y1, b1_ref, a1_ref)                          # (16, nc1) f32

    # ---- repack: pad + even/odd split for block 2 (one merged selection matmul)
    r2 = jnp.dot(y1.astype(bf16), s2_ref[...], preferred_element_type=f32)
    pat2 = taps_s2(r2[:, :buf2], r2[:, buf2:], half2, nc2).astype(bf16)

    # ---- block 2: conv(3x5, s_w=2) + BN + PReLU -----------------------------
    y2 = jnp.dot(w2_ref[...], pat2, preferred_element_type=f32)
    y2 = bias_prelu(y2, b2_ref, a2_ref)                          # (32, nc2) f32

    r3 = jnp.dot(y2.astype(bf16), s3_ref[...], preferred_element_type=f32)
    pat3 = taps_s2(r3[:, :buf3], r3[:, buf3:], half3, nc3).astype(bf16)

    # ---- block 3: conv(3x5, s_w=2) + BN + PReLU -----------------------------
    y3 = jnp.dot(w3_ref[...], pat3, preferred_element_type=f32)
    y3 = bias_prelu(y3, b3_ref, a3_ref)                          # (64, nc3) f32

    # ---- drop junk columns -> dense (C_out, B*H*W_out), lane-aligned --------
    o_ref[...] = jnp.dot(y3.astype(bf16), sout_ref[...],
                         preferred_element_type=f32).astype(o_ref.dtype)


# ---------------------------------------------------------------------------
# Wrapper.
# ---------------------------------------------------------------------------
def encoder_forward(x_nchw, params, *, images_per_step=None):
    """Matches Encoder.forward: NCHW in -> NCHW out (single fused pallas_call)."""
    N, C0, H, W0 = x_nchw.shape
    assert C0 == IN_CH[0], C0

    # Output widths per block (H is preserved: KH=3, ph=1, stride_h=1).
    w1 = W0                                   # stride 1
    w2 = (w1 + 2 * PW - KW) // 2 + 1          # stride 2
    w3 = (w2 + 2 * PW - KW) // 2 + 1          # stride 2
    assert (w1 + 2 * PW) % 2 == 0 and (w2 + 2 * PW) % 2 == 0, (w1, w2)

    # Batch-group size: fold enough images into the lane dim to reach >=128 output
    # lanes per grid step, keeping N % B == 0 so the grid is exact.
    if images_per_step is None:
        B = max(1, min(N, -(-128 // (H * w3))))
        while N % B:
            B -= 1
    else:
        B = images_per_step
    assert N % B == 0, (N, B)
    G = N // B

    rows = H + 2 * PH
    pitch1 = w1 + 2 * PW                      # padded-row pitch of the layer-1 input
    half2 = (w1 + 2 * PW) // 2                # even/odd half pitch for layer 2
    half3 = (w2 + 2 * PW) // 2                # even/odd half pitch for layer 3
    l1, l2, l3 = rows * pitch1, rows * half2, rows * half3

    # Conv output column counts (128-padded) and source buffer widths (incl. margin).
    nc1, nc2, nc3 = _ru128(B * l1), _ru128(B * l2), _ru128(B * l3)
    max1 = (KH - 1) * pitch1 + (KW - 1)
    max2 = (KH - 1) * half2 + (KW - 1) // 2
    max3 = (KH - 1) * half3 + (KW - 1) // 2
    x_cols = _ru128(nc1 + max1)
    buf2 = _ru128(nc2 + max2)
    buf3 = _ru128(nc3 + max3)
    out_cols = B * H * w3
    assert x_cols >= nc1 + max1 and buf2 >= nc2 + max2 and buf3 >= nc3 + max3

    # ---- fold BN (inference) into conv weights + per-channel bias (bf16 weights) --
    w_mats, biases, alphas = [], [], []
    for (w_oihw, scale, bias, alpha) in params:
        c_out = w_oihw.shape[0]
        wm = jnp.transpose(w_oihw, (0, 2, 3, 1)).reshape(c_out, -1)   # (co, kh*kw*ci)
        w_mats.append((wm * scale[:, None]).astype(jnp.bfloat16))
        biases.append(bias.reshape(c_out, 1).astype(jnp.float32))
        alphas.append(alpha.reshape(c_out, 1).astype(jnp.float32))

    # ---- constant 0/1 repacking matrices (exact in bf16) --------------------------
    s2 = jnp.asarray(_repack_selection_np(B, H, pitch1, w1, nc1, half2, buf2),
                     dtype=jnp.bfloat16)
    s3 = jnp.asarray(_repack_selection_np(B, H, half2, w2, nc2, half3, buf3),
                     dtype=jnp.bfloat16)
    s_out = jnp.asarray(_out_selection_np(B, H, half3, w3, nc3), dtype=jnp.bfloat16)

    # ---- flat zero-padded input slab: (G, C0, x_cols), B images per group ---------
    x_pad = jnp.pad(x_nchw, ((0, 0), (0, 0), (PH, PH), (PW, PW)))
    x_grp = jnp.transpose(x_pad.reshape(G, B, C0, l1), (0, 2, 1, 3)).reshape(
        G, C0, B * l1)
    x_flat = jnp.pad(x_grp, ((0, 0), (0, 0), (0, x_cols - B * l1))).astype(jnp.float32)

    consts = (w_mats[0], biases[0], alphas[0],
              s2, w_mats[1], biases[1], alphas[1],
              s3, w_mats[2], biases[2], alphas[2],
              s_out)

    def _const_spec(arr):
        return pl.BlockSpec(arr.shape, lambda g: (0,) * arr.ndim)

    kernel = functools.partial(_encoder_kernel, pitch1=pitch1, half2=half2,
                               half3=half3, nc1=nc1, nc2=nc2, nc3=nc3,
                               buf2=buf2, buf3=buf3)

    flops = 2 * G * (OUT_CH[0] * (KH * KW * C0) * nc1 + OUT_CH[0] * nc1 * 2 * buf2
                     + OUT_CH[1] * (KH * KW * OUT_CH[0]) * nc2
                     + OUT_CH[1] * nc2 * 2 * buf3
                     + OUT_CH[2] * (KH * KW * OUT_CH[1]) * nc3
                     + OUT_CH[2] * nc3 * out_cols)
    bytes_accessed = (int(np.prod(x_flat.shape)) * 4
                      + sum(int(np.prod(c.shape)) * c.dtype.itemsize for c in consts)
                      + G * OUT_CH[2] * out_cols * 4)

    out_flat = pl.pallas_call(
        kernel,
        out_shape=jax.ShapeDtypeStruct((G, OUT_CH[2], out_cols), jnp.float32),
        grid=(G,),
        in_specs=[pl.BlockSpec((None, C0, x_cols), lambda g: (g, 0, 0))]
                 + [_const_spec(c) for c in consts],
        out_specs=pl.BlockSpec((None, OUT_CH[2], out_cols), lambda g: (g, 0, 0)),
        compiler_params=pltpu.CompilerParams(
            dimension_semantics=("parallel",)),
        cost_estimate=pl.CostEstimate(flops=flops, transcendentals=0,
                                      bytes_accessed=bytes_accessed),
    )(x_flat, *consts)

    # (G, C, B*H*w3) -> (N, C, H, w3)   (small layout-only un-fold in the wrapper)
    out = out_flat.reshape(G, OUT_CH[2], B, H, w3)
    return jnp.transpose(out, (0, 2, 1, 3, 4)).reshape(N, OUT_CH[2], H, w3)


# ---------------------------------------------------------------------------
# Parameters + pure-JAX reference.
# ---------------------------------------------------------------------------
def init_encoder_params(key):
    """Deterministic synthetic parameters matching the PyTorch module's shapes.
    Conv weights in PyTorch OIHW layout; BN folded for inference mode."""
    params = []
    for i in range(3):
        key, k_w, k_g, k_b, k_m, k_v = jax.random.split(key, 6)
        w = 0.1 * jax.random.normal(k_w, (OUT_CH[i], IN_CH[i], KH, KW), jnp.float32)
        gamma = 1.0 + 0.1 * jax.random.normal(k_g, (OUT_CH[i],), jnp.float32)
        beta = 0.1 * jax.random.normal(k_b, (OUT_CH[i],), jnp.float32)
        r_mean = 0.1 * jax.random.normal(k_m, (OUT_CH[i],), jnp.float32)
        r_var = jax.random.uniform(k_v, (OUT_CH[i],), jnp.float32, 0.5, 1.5)
        alpha = jnp.full((OUT_CH[i],), 0.25, jnp.float32)    # PReLU default
        scale = gamma / jnp.sqrt(r_var + BN_EPS)
        bias = beta - r_mean * scale
        params.append((w, scale, bias, alpha))
    return params


def encoder_reference(x_nchw, params):
    """Pure-JAX (XLA conv, f32) reference for correctness checking."""
    x = jnp.transpose(x_nchw, (0, 2, 3, 1))                  # NCHW -> NHWC
    for (w_oihw, scale, bias, alpha), sw in zip(params, STRIDE_W):
        w_hwio = jnp.transpose(w_oihw, (2, 3, 1, 0))
        y = jax.lax.conv_general_dilated(
            x, w_hwio, window_strides=(1, sw),
            padding=((PH, PH), (PW, PW)),
            dimension_numbers=("NHWC", "HWIO", "NHWC"))
        y = y * scale[None, None, None, :] + bias[None, None, None, :]
        x = jnp.where(y >= 0.0, y, alpha[None, None, None, :] * y)
    return jnp.transpose(x, (0, 3, 1, 2))                    # NHWC -> NCHW


if __name__ == "__main__":
    key = jax.random.PRNGKey(0)
    key_p, key_x = jax.random.split(key)
    params = init_encoder_params(key_p)

    # PyTorch-style NCHW input: batch=2, in_channels=2, H=16, W=16.
    x = jax.random.normal(key_x, (2, IN_CH[0], 16, 16), jnp.float32)

    fwd = jax.jit(encoder_forward)
    out = jax.block_until_ready(fwd(x, params))
    assert out.shape == (2, 64, 16, 4), out.shape

    ref = encoder_reference(x, params)
    max_err = float(jnp.max(jnp.abs(out - ref)))
    # bf16 MXU operands (f32 accumulation); tolerance sized for 3 bf16 conv layers.
    assert jnp.allclose(out, ref, atol=3e-2, rtol=3e-2), max_err

    print("KERNEL_OK")
</pallas_src>

<mosaic_0001>
module attributes {stable_mosaic.version = 11 : i64} {
  func.func @_encoder_kernel(%arg0: i32, %arg1: memref<1x2x896xf32, #tpu.memory_space<vmem>>, %arg2: memref<16x30xbf16, #tpu.memory_space<vmem>>, %arg3: memref<16x1xf32, #tpu.memory_space<vmem>>, %arg4: memref<16x1xf32, #tpu.memory_space<vmem>>, %arg5: memref<768x1024xbf16, #tpu.memory_space<vmem>>, %arg6: memref<32x240xbf16, #tpu.memory_space<vmem>>, %arg7: memref<32x1xf32, #tpu.memory_space<vmem>>, %arg8: memref<32x1xf32, #tpu.memory_space<vmem>>, %arg9: memref<384x768xbf16, #tpu.memory_space<vmem>>, %arg10: memref<64x480xbf16, #tpu.memory_space<vmem>>, %arg11: memref<64x1xf32, #tpu.memory_space<vmem>>, %arg12: memref<64x1xf32, #tpu.memory_space<vmem>>, %arg13: memref<256x128xbf16, #tpu.memory_space<vmem>>, %arg14: memref<1x64x128xf32, #tpu.memory_space<vmem>>) attributes {dimension_semantics = [#tpu.dimension_semantics<parallel>], iteration_bounds = array<i64: 1>, scalar_prefetch = 0 : i64, scratch_operands = 0 : i64, tpu.core_type = #tpu.core_type<tc>, window_params = [{transform_indices = @transform_0, window_bounds = array<i64: 1, 2, 896>}, {pipeline_mode = #tpu.pipeline_mode<synchronous>, transform_indices = @transform_1, window_bounds = array<i64: 16, 30>}, {pipeline_mode = #tpu.pipeline_mode<synchronous>, transform_indices = @transform_2, window_bounds = array<i64: 16, 1>}, {pipeline_mode = #tpu.pipeline_mode<synchronous>, transform_indices = @transform_3, window_bounds = array<i64: 16, 1>}, {pipeline_mode = #tpu.pipeline_mode<synchronous>, transform_indices = @transform_4, window_bounds = array<i64: 768, 1024>}, {pipeline_mode = #tpu.pipeline_mode<synchronous>, transform_indices = @transform_5, window_bounds = array<i64: 32, 240>}, {pipeline_mode = #tpu.pipeline_mode<synchronous>, transform_indices = @transform_6, window_bounds = array<i64: 32, 1>}, {pipeline_mode = #tpu.pipeline_mode<synchronous>, transform_indices = @transform_7, window_bounds = array<i64: 32, 1>}, {pipeline_mode = #tpu.pipeline_mode<synchronous>, transform_indices = @transform_8, window_bounds = array<i64: 384, 768>}, {pipeline_mode = #tpu.pipeline_mode<synchronous>, transform_indices = @transform_9, window_bounds = array<i64: 64, 480>}, {pipeline_mode = #tpu.pipeline_mode<synchronous>, transform_indices = @transform_10, window_bounds = array<i64: 64, 1>}, {pipeline_mode = #tpu.pipeline_mode<synchronous>, transform_indices = @transform_11, window_bounds = array<i64: 64, 1>}, {pipeline_mode = #tpu.pipeline_mode<synchronous>, transform_indices = @transform_12, window_bounds = array<i64: 256, 128>}, {transform_indices = @transform_13, window_bounds = array<i64: 1, 64, 128>}]} {
    %c0 = arith.constant 0 : index
    %c0_0 = arith.constant 0 : index
    %c0_1 = arith.constant 0 : index
    %0 = vector.load %arg1[%c0, %c0_0, %c0_1] : memref<1x2x896xf32, #tpu.memory_space<vmem>>, vector<1x2x896xf32>
    %1 = vector.shape_cast %0 : vector<1x2x896xf32> to vector<2x896xf32>
    %2 = vector.extract_strided_slice %1 {offsets = [0, 0], sizes = [2, 768], strides = [1, 1]} : vector<2x896xf32> to vector<2x768xf32>
    %3 = vector.extract_strided_slice %1 {offsets = [0, 1], sizes = [2, 768], strides = [1, 1]} : vector<2x896xf32> to vector<2x768xf32>
    %4 = vector.extract_strided_slice %1 {offsets = [0, 2], sizes = [2, 768], strides = [1, 1]} : vector<2x896xf32> to vector<2x768xf32>
    %5 = vector.extract_strided_slice %1 {offsets = [0, 3], sizes = [2, 768], strides = [1, 1]} : vector<2x896xf32> to vector<2x768xf32>
    %6 = vector.extract_strided_slice %1 {offsets = [0, 4], sizes = [2, 768], strides = [1, 1]} : vector<2x896xf32> to vector<2x768xf32>
    %7 = vector.extract_strided_slice %1 {offsets = [0, 20], sizes = [2, 768], strides = [1, 1]} : vector<2x896xf32> to vector<2x768xf32>
    %8 = vector.extract_strided_slice %1 {offsets = [0, 21], sizes = [2, 768], strides = [1, 1]} : vector<2x896xf32> to vector<2x768xf32>
    %9 = vector.extract_strided_slice %1 {offsets = [0, 22], sizes = [2, 768], strides = [1, 1]} : vector<2x896xf32> to vector<2x768xf32>
    %10 = vector.extract_strided_slice %1 {offsets = [0, 23], sizes = [2, 768], strides = [1, 1]} : vector<2x896xf32> to vector<2x768xf32>
    %11 = vector.extract_strided_slice %1 {offsets = [0, 24], sizes = [2, 768], strides = [1, 1]} : vector<2x896xf32> to vector<2x768xf32>
    %12 = vector.extract_strided_slice %1 {offsets = [0, 40], sizes = [2, 768], strides = [1, 1]} : vector<2x896xf32> to vector<2x768xf32>
    %13 = vector.extract_strided_slice %1 {offsets = [0, 41], sizes = [2, 768], strides = [1, 1]} : vector<2x896xf32> to vector<2x768xf32>
    %14 = vector.extract_strided_slice %1 {offsets = [0, 42], sizes = [2, 768], strides = [1, 1]} : vector<2x896xf32> to vector<2x768xf32>
    %15 = vector.extract_strided_slice %1 {offsets = [0, 43], sizes = [2, 768], strides = [1, 1]} : vector<2x896xf32> to vector<2x768xf32>
    %16 = vector.extract_strided_slice %1 {offsets = [0, 44], sizes = [2, 768], strides = [1, 1]} : vector<2x896xf32> to vector<2x768xf32>
    %17 = tpu.concatenate %2, %3, %4, %5, %6, %7, %8, %9, %10, %11, %12, %13, %14, %15, %16 in 0 : vector<2x768xf32>, vector<2x768xf32>, vector<2x768xf32>, vector<2x768xf32>, vector<2x768xf32>, vector<2x768xf32>, vector<2x768xf32>, vector<2x768xf32>, vector<2x768xf32>, vector<2x768xf32>, vector<2x768xf32>, vector<2x768xf32>, vector<2x768xf32>, vector<2x768xf32>, vector<2x768xf32> -> vector<30x768xf32>
    %18 = arith.truncf %17 : vector<30x768xf32> to vector<30x768xbf16>
    %c0_2 = arith.constant 0 : index
    %c0_3 = arith.constant 0 : index
    %19 = vector.load %arg2[%c0_2, %c0_3] : memref<16x30xbf16, #tpu.memory_space<vmem>>, vector<16x30xbf16>
    %cst = arith.constant dense<0.000000e+00> : vector<16x768xf32>
    %20 = tpu.matmul %19, %18, %cst {dimension_numbers = #tpu.dot_dimension_numbers<[1], [0], [0], [1], [0, 0, 1, 1], [], []>} : vector<16x30xbf16>, vector<30x768xbf16>, vector<16x768xf32> -> vector<16x768xf32>
    %c0_4 = arith.constant 0 : index
    %c0_5 = arith.constant 0 : index
    %21 = vector.load %arg3[%c0_4, %c0_5] : memref<16x1xf32, #tpu.memory_space<vmem>>, vector<16x1xf32>
    %22 = vector.broadcast %21 : vector<16x1xf32> to vector<16x768xf32>
    %23 = arith.addf %20, %22 : vector<16x768xf32>
    %cst_6 = arith.constant 0.000000e+00 : f32
    %24 = vector.broadcast %cst_6 : f32 to vector<16x768xf32>
    %25 = arith.cmpf oge, %23, %24 : vector<16x768xf32>
    %c0_7 = arith.constant 0 : index
    %c0_8 = arith.constant 0 : index
    %26 = vector.load %arg4[%c0_7, %c0_8] : memref<16x1xf32, #tpu.memory_space<vmem>>, vector<16x1xf32>
    %27 = vector.broadcast %26 : vector<16x1xf32> to vector<16x768xf32>
    %28 = arith.mulf %27, %23 : vector<16x768xf32>
    %29 = arith.select %25, %23, %28 : vector<16x768xi1>, vector<16x768xf32>
    %30 = arith.truncf %29 : vector<16x768xf32> to vector<16x768xbf16>
    %c0_9 = arith.constant 0 : index
    %c0_10 = arith.constant 0 : index
    %31 = vector.load %arg5[%c0_9, %c0_10] : memref<768x1024xbf16, #tpu.memory_space<vmem>>, vector<768x1024xbf16>
    %cst_11 = arith.constant dense<0.000000e+00> : vector<16x1024xf32>
    %32 = tpu.matmul %30, %31, %cst_11 {dimension_numbers = #tpu.dot_dimension_numbers<[1], [0], [0], [1], [0, 0, 1, 1], [], []>} : vector<16x768xbf16>, vector<768x1024xbf16>, vector<16x1024xf32> -> vector<16x1024xf32>
    %33 = vector.extract_strided_slice %32 {offsets = [0, 0], sizes = [16, 512], strides = [1, 1]} : vector<16x1024xf32> to vector<16x512xf32>
    %34 = vector.extract_strided_slice %32 {offsets = [0, 512], sizes = [16, 512], strides = [1, 1]} : vector<16x1024xf32> to vector<16x512xf32>
    %35 = vector.extract_strided_slice %33 {offsets = [0, 0], sizes = [16, 384], strides = [1, 1]} : vector<16x512xf32> to vector<16x384xf32>
    %36 = vector.extract_strided_slice %34 {offsets = [0, 0], sizes = [16, 384], strides = [1, 1]} : vector<16x512xf32> to vector<16x384xf32>
    %37 = vector.extract_strided_slice %33 {offsets = [0, 1], sizes = [16, 384], strides = [1, 1]} : vector<16x512xf32> to vector<16x384xf32>
    %38 = vector.extract_strided_slice %34 {offsets = [0, 1], sizes = [16, 384], strides = [1, 1]} : vector<16x512xf32> to vector<16x384xf32>
    %39 = vector.extract_strided_slice %33 {offsets = [0, 2], sizes = [16, 384], strides = [1, 1]} : vector<16x512xf32> to vector<16x384xf32>
    %40 = vector.extract_strided_slice %33 {offsets = [0, 10], sizes = [16, 384], strides = [1, 1]} : vector<16x512xf32> to vector<16x384xf32>
    %41 = vector.extract_strided_slice %34 {offsets = [0, 10], sizes = [16, 384], strides = [1, 1]} : vector<16x512xf32> to vector<16x384xf32>
    %42 = vector.extract_strided_slice %33 {offsets = [0, 11], sizes = [16, 384], strides = [1, 1]} : vector<16x512xf32> to vector<16x384xf32>
    %43 = vector.extract_strided_slice %34 {offsets = [0, 11], sizes = [16, 384], strides = [1, 1]} : vector<16x512xf32> to vector<16x384xf32>
    %44 = vector.extract_strided_slice %33 {offsets = [0, 12], sizes = [16, 384], strides = [1, 1]} : vector<16x512xf32> to vector<16x384xf32>
    %45 = vector.extract_strided_slice %33 {offsets = [0, 20], sizes = [16, 384], strides = [1, 1]} : vector<16x512xf32> to vector<16x384xf32>
    %46 = vector.extract_strided_slice %34 {offsets = [0, 20], sizes = [16, 384], strides = [1, 1]} : vector<16x512xf32> to vector<16x384xf32>
    %47 = vector.extract_strided_slice %33 {offsets = [0, 21], sizes = [16, 384], strides = [1, 1]} : vector<16x512xf32> to vector<16x384xf32>
    %48 = vector.extract_strided_slice %34 {offsets = [0, 21], sizes = [16, 384], strides = [1, 1]} : vector<16x512xf32> to vector<16x384xf32>
    %49 = vector.extract_strided_slice %33 {offsets = [0, 22], sizes = [16, 384], strides = [1, 1]} : vector<16x512xf32> to vector<16x384xf32>
    %50 = tpu.concatenate %35, %36, %37, %38, %39, %40, %41, %42, %43, %44, %45, %46, %47, %48, %49 in 0 : vector<16x384xf32>, vector<16x384xf32>, vector<16x384xf32>, vector<16x384xf32>, vector<16x384xf32>, vector<16x384xf32>, vector<16x384xf32>, vector<16x384xf32>, vector<16x384xf32>, vector<16x384xf32>, vector<16x384xf32>, vector<16x384xf32>, vector<16x384xf32>, vector<16x384xf32>, vector<16x384xf32> -> vector<240x384xf32>
    %51 = arith.truncf %50 : vector<240x384xf32> to vector<240x384xbf16>
    %c0_12 = arith.constant 0 : index
    %c0_13 = arith.constant 0 : index
    %52 = vector.load %arg6[%c0_12, %c0_13] : memref<32x240xbf16, #tpu.memory_space<vmem>>, vector<32x240xbf16>
    %cst_14 = arith.constant dense<0.000000e+00> : vector<32x384xf32>
    %53 = tpu.matmul %52, %51, %cst_14 {dimension_numbers = #tpu.dot_dimension_numbers<[1], [0], [0], [1], [0, 0, 1, 1], [], []>} : vector<32x240xbf16>, vector<240x384xbf16>, vector<32x384xf32> -> vector<32x384xf32>
    %c0_15 = arith.constant 0 : index
    %c0_16 = arith.constant 0 : index
    %54 = vector.load %arg7[%c0_15, %c0_16] : memref<32x1xf32, #tpu.memory_space<vmem>>, vector<32x1xf32>
    %55 = vector.broadcast %54 : vector<32x1xf32> to vector<32x384xf32>
    %56 = arith.addf %53, %55 : vector<32x384xf32>
    %cst_17 = arith.constant 0.000000e+00 : f32
    %57 = vector.broadcast %cst_17 : f32 to vector<32x384xf32>
    %58 = arith.cmpf oge, %56, %57 : vector<32x384xf32>
    %c0_18 = arith.constant 0 : index
    %c0_19 = arith.constant 0 : index
    %59 = vector.load %arg8[%c0_18, %c0_19] : memref<32x1xf32, #tpu.memory_space<vmem>>, vector<32x1xf32>
    %60 = vector.broadcast %59 : vector<32x1xf32> to vector<32x384xf32>
    %61 = arith.mulf %60, %56 : vector<32x384xf32>
    %62 = arith.select %58, %56, %61 : vector<32x384xi1>, vector<32x384xf32>
    %63 = arith.truncf %62 : vector<32x384xf32> to vector<32x384xbf16>
    %c0_20 = arith.constant 0 : index
    %c0_21 = arith.constant 0 : index
    %64 = vector.load %arg9[%c0_20, %c0_21] : memref<384x768xbf16, #tpu.memory_space<vmem>>, vector<384x768xbf16>
    %cst_22 = arith.constant dense<0.000000e+00> : vector<32x768xf32>
    %65 = tpu.matmul %63, %64, %cst_22 {dimension_numbers = #tpu.dot_dimension_numbers<[1], [0], [0], [1], [0, 0, 1, 1], [], []>} : vector<32x384xbf16>, vector<384x768xbf16>, vector<32x768xf32> -> vector<32x768xf32>
    %66 = vector.extract_strided_slice %65 {offsets = [0, 0], sizes = [32, 384], strides = [1, 1]} : vector<32x768xf32> to vector<32x384xf32>
    %67 = vector.extract_strided_slice %65 {offsets = [0, 384], sizes = [32, 384], strides = [1, 1]} : vector<32x768xf32> to vector<32x384xf32>
    %68 = vector.extract_strided_slice %66 {offsets = [0, 0], sizes = [32, 256], strides = [1, 1]} : vector<32x384xf32> to vector<32x256xf32>
    %69 = vector.extract_strided_slice %67 {offsets = [0, 0], sizes = [32, 256], strides = [1, 1]} : vector<32x384xf32> to vector<32x256xf32>
    %70 = vector.extract_strided_slice %66 {offsets = [0, 1], sizes = [32, 256], strides = [1, 1]} : vector<32x384xf32> to vector<32x256xf32>
    %71 = vector.extract_strided_slice %67 {offsets = [0, 1], sizes = [32, 256], strides = [1, 1]} : vector<32x384xf32> to vector<32x256xf32>
    %72 = vector.extract_strided_slice %66 {offsets = [0, 2], sizes = [32, 256], strides = [1, 1]} : vector<32x384xf32> to vector<32x256xf32>
    %73 = vector.extract_strided_slice %66 {offsets = [0, 6], sizes = [32, 256], strides = [1, 1]} : vector<32x384xf32> to vector<32x256xf32>
    %74 = vector.extract_strided_slice %67 {offsets = [0, 6], sizes = [32, 256], strides = [1, 1]} : vector<32x384xf32> to vector<32x256xf32>
    %75 = vector.extract_strided_slice %66 {offsets = [0, 7], sizes = [32, 256], strides = [1, 1]} : vector<32x384xf32> to vector<32x256xf32>
    %76 = vector.extract_strided_slice %67 {offsets = [0, 7], sizes = [32, 256], strides = [1, 1]} : vector<32x384xf32> to vector<32x256xf32>
    %77 = vector.extract_strided_slice %66 {offsets = [0, 8], sizes = [32, 256], strides = [1, 1]} : vector<32x384xf32> to vector<32x256xf32>
    %78 = vector.extract_strided_slice %66 {offsets = [0, 12], sizes = [32, 256], strides = [1, 1]} : vector<32x384xf32> to vector<32x256xf32>
    %79 = vector.extract_strided_slice %67 {offsets = [0, 12], sizes = [32, 256], strides = [1, 1]} : vector<32x384xf32> to vector<32x256xf32>
    %80 = vector.extract_strided_slice %66 {offsets = [0, 13], sizes = [32, 256], strides = [1, 1]} : vector<32x384xf32> to vector<32x256xf32>
    %81 = vector.extract_strided_slice %67 {offsets = [0, 13], sizes = [32, 256], strides = [1, 1]} : vector<32x384xf32> to vector<32x256xf32>
    %82 = vector.extract_strided_slice %66 {offsets = [0, 14], sizes = [32, 256], strides = [1, 1]} : vector<32x384xf32> to vector<32x256xf32>
    %83 = tpu.concatenate %68, %69, %70, %71, %72, %73, %74, %75, %76, %77, %78, %79, %80, %81, %82 in 0 : vector<32x256xf32>, vector<32x256xf32>, vector<32x256xf32>, vector<32x256xf32>, vector<32x256xf32>, vector<32x256xf32>, vector<32x256xf32>, vector<32x256xf32>, vector<32x256xf32>, vector<32x256xf32>, vector<32x256xf32>, vector<32x256xf32>, vector<32x256xf32>, vector<32x256xf32>, vector<32x256xf32> -> vector<480x256xf32>
    %84 = arith.truncf %83 : vector<480x256xf32> to vector<480x256xbf16>
    %c0_23 = arith.constant 0 : index
    %c0_24 = arith.constant 0 : index
    %85 = vector.load %arg10[%c0_23, %c0_24] : memref<64x480xbf16, #tpu.memory_space<vmem>>, vector<64x480xbf16>
    %cst_25 = arith.constant dense<0.000000e+00> : vector<64x256xf32>
    %86 = tpu.matmul %85, %84, %cst_25 {dimension_numbers = #tpu.dot_dimension_numbers<[1], [0], [0], [1], [0, 0, 1, 1], [], []>} : vector<64x480xbf16>, vector<480x256xbf16>, vector<64x256xf32> -> vector<64x256xf32>
    %c0_26 = arith.constant 0 : index
    %c0_27 = arith.constant 0 : index
    %87 = vector.load %arg11[%c0_26, %c0_27] : memref<64x1xf32, #tpu.memory_space<vmem>>, vector<64x1xf32>
    %88 = vector.broadcast %87 : vector<64x1xf32> to vector<64x256xf32>
    %89 = arith.addf %86, %88 : vector<64x256xf32>
    %cst_28 = arith.constant 0.000000e+00 : f32
    %90 = vector.broadcast %cst_28 : f32 to vector<64x256xf32>
    %91 = arith.cmpf oge, %89, %90 : vector<64x256xf32>
    %c0_29 = arith.constant 0 : index
    %c0_30 = arith.constant 0 : index
    %92 = vector.load %arg12[%c0_29, %c0_30] : memref<64x1xf32, #tpu.memory_space<vmem>>, vector<64x1xf32>
    %93 = vector.broadcast %92 : vector<64x1xf32> to vector<64x256xf32>
    %94 = arith.mulf %93, %89 : vector<64x256xf32>
    %95 = arith.select %91, %89, %94 : vector<64x256xi1>, vector<64x256xf32>
    %96 = arith.truncf %95 : vector<64x256xf32> to vector<64x256xbf16>
    %c0_31 = arith.constant 0 : index
    %c0_32 = arith.constant 0 : index
    %97 = vector.load %arg13[%c0_31, %c0_32] : memref<256x128xbf16, #tpu.memory_space<vmem>>, vector<256x128xbf16>
    %cst_33 = arith.constant dense<0.000000e+00> : vector<64x128xf32>
    %98 = tpu.matmul %96, %97, %cst_33 {dimension_numbers = #tpu.dot_dimension_numbers<[1], [0], [0], [1], [0, 0, 1, 1], [], []>} : vector<64x256xbf16>, vector<256x128xbf16>, vector<64x128xf32> -> vector<64x128xf32>
    %c0_34 = arith.constant 0 : index
    %c0_35 = arith.constant 0 : index
    %c0_36 = arith.constant 0 : index
    %99 = vector.load %arg14[%c0_34, %c0_35, %c0_36] : memref<1x64x128xf32, #tpu.memory_space<vmem>>, vector<1x64x128xf32>
    %100 = vector.shape_cast %99 : vector<1x64x128xf32> to vector<64x128xf32>
    %101 = vector.shape_cast %98 : vector<64x128xf32> to vector<1x64x128xf32>
    tpu.vector_store %arg14[%c0_34, %c0_35, %c0_36], %101 {strides = array<i32>} : memref<1x64x128xf32, #tpu.memory_space<vmem>>, vector<1x64x128xf32>,
    return
  }
  func.func @transform_0(%arg0: i32) -> (i32, i32, i32) {
    %c0_i32 = arith.constant 0 : i32
    %c0_i32_0 = arith.constant 0 : i32
    %c0_i32_1 = arith.constant 0 : i32
    return %arg0, %c0_i32, %c0_i32_0 : i32, i32, i32
  }
  func.func @transform_1(%arg0: i32) -> (i32, i32) {
    %c0_i32 = arith.constant 0 : i32
    %c0_i32_0 = arith.constant 0 : i32
    %c0_i32_1 = arith.constant 0 : i32
    return %c0_i32, %c0_i32_0 : i32, i32
  }
  func.func @transform_2(%arg0: i32) -> (i32, i32) {
    %c0_i32 = arith.constant 0 : i32
    %c0_i32_0 = arith.constant 0 : i32
    %c0_i32_1 = arith.constant 0 : i32
    return %c0_i32, %c0_i32_0 : i32, i32
  }
  func.func @transform_3(%arg0: i32) -> (i32, i32) {
    %c0_i32 = arith.constant 0 : i32
    %c0_i32_0 = arith.constant 0 : i32
    %c0_i32_1 = arith.constant 0 : i32
    return %c0_i32, %c0_i32_0 : i32, i32
  }
  func.func @transform_4(%arg0: i32) -> (i32, i32) {
    %c0_i32 = arith.constant 0 : i32
    %c0_i32_0 = arith.constant 0 : i32
    %c0_i32_1 = arith.constant 0 : i32
    return %c0_i32, %c0_i32_0 : i32, i32
  }
  func.func @transform_5(%arg0: i32) -> (i32, i32) {
    %c0_i32 = arith.constant 0 : i32
    %c0_i32_0 = arith.constant 0 : i32
    %c0_i32_1 = arith.constant 0 : i32
    return %c0_i32, %c0_i32_0 : i32, i32
  }
  func.func @transform_6(%arg0: i32) -> (i32, i32) {
    %c0_i32 = arith.constant 0 : i32
    %c0_i32_0 = arith.constant 0 : i32
    %c0_i32_1 = arith.constant 0 : i32
    return %c0_i32, %c0_i32_0 : i32, i32
  }
  func.func @transform_7(%arg0: i32) -> (i32, i32) {
    %c0_i32 = arith.constant 0 : i32
    %c0_i32_0 = arith.constant 0 : i32
    %c0_i32_1 = arith.constant 0 : i32
    return %c0_i32, %c0_i32_0 : i32, i32
  }
  func.func @transform_8(%arg0: i32) -> (i32, i32) {
    %c0_i32 = arith.constant 0 : i32
    %c0_i32_0 = arith.constant 0 : i32
    %c0_i32_1 = arith.constant 0 : i32
    return %c0_i32, %c0_i32_0 : i32, i32
  }
  func.func @transform_9(%arg0: i32) -> (i32, i32) {
    %c0_i32 = arith.constant 0 : i32
    %c0_i32_0 = arith.constant 0 : i32
    %c0_i32_1 = arith.constant 0 : i32
    return %c0_i32, %c0_i32_0 : i32, i32
  }
  func.func @transform_10(%arg0: i32) -> (i32, i32) {
    %c0_i32 = arith.constant 0 : i32
    %c0_i32_0 = arith.constant 0 : i32
    %c0_i32_1 = arith.constant 0 : i32
    return %c0_i32, %c0_i32_0 : i32, i32
  }
  func.func @transform_11(%arg0: i32) -> (i32, i32) {
    %c0_i32 = arith.constant 0 : i32
    %c0_i32_0 = arith.constant 0 : i32
    %c0_i32_1 = arith.constant 0 : i32
    return %c0_i32, %c0_i32_0 : i32, i32
  }
  func.func @transform_12(%arg0: i32) -> (i32, i32) {
    %c0_i32 = arith.constant 0 : i32
    %c0_i32_0 = arith.constant 0 : i32
    %c0_i32_1 = arith.constant 0 : i32
    return %c0_i32, %c0_i32_0 : i32, i32
  }
  func.func @transform_13(%arg0: i32) -> (i32, i32, i32) {
    %c0_i32 = arith.constant 0 : i32
    %c0_i32_0 = arith.constant 0 : i32
    %c0_i32_1 = arith.constant 0 : i32
    return %arg0, %c0_i32, %c0_i32_0 : i32, i32, i32
  }
}

</mosaic_0001>

<bundles_post_ra>
// kernel: encoder_forward.1
= control target key start
LH: loop header
LB: loop body
LE: loop exit
PB: predicated region body
PF: predicated region fallthrough
CT: control target
= control target key end

     0   :  { %v53_v0 = vlaneseq  ;;  %v8524_v2 = vmov 1983009808   ;;  %s8525_s27 = smov 127   ;;  %s8526_s28 = smov 124   ;;  %v8539_v32 = vmov 0   ;;  %vm112_vm0 = vcmask 1039360   ;;  %s11993_s0 = inlined_call_operand.vmem [shape: f32[1,2,896], index: 0, kind: input, shape index: {}]   ;;  %s11994_s1 = inlined_call_operand.vmem [shape: bf16[16,30], index: 1, kind: input, shape index: {}]   ;;  %s11995_s2 = inlined_call_operand.vmem [shape: f32[16,1], index: 2, kind: input, shape index: {}]   ;;  %s11996_s3 = inlined_call_operand.vmem [shape: f32[16,1], index: 3, kind: input, shape index: {}]   ;;  %s11997_s4 = inlined_call_operand.vmem [shape: bf16[768,1024], index: 4, kind: input, shape index: {}]   ;;  %s11998_s5 = inlined_call_operand.vmem [shape: bf16[32,240], index: 5, kind: input, shape index: {}]   ;;  %s11999_s6 = inlined_call_operand.vmem [shape: f32[32,1], index: 6, kind: input, shape index: {}]   ;;  %s12000_s7 = inlined_call_operand.vmem [shape: f32[32,1], index: 7, kind: input, shape index: {}]   ;;  %s12001_s8 = inlined_call_operand.vmem [shape: bf16[384,768], index: 8, kind: input, shape index: {}]   ;;  %s12002_s9 = inlined_call_operand.vmem [shape: bf16[64,480], index: 9, kind: input, shape index: {}]   ;;  %s12003_s10 = inlined_call_operand.vmem [shape: f32[64,1], index: 10, kind: input, shape index: {}]   ;;  %s12004_s11 = inlined_call_operand.vmem [shape: f32[64,1], index: 11, kind: input, shape index: {}]   ;;  %s12005_s12 = inlined_call_operand.vmem [shape: bf16[256,128], index: 12, kind: input, shape index: {}]   ;;  %s12006_s13 = inlined_call_operand.vmem [shape: f32[1,64,128], index: 13, kind: output, shape index: {}]  }
   0x1   :  { %v45_v1 = vld [vmem:[%s11993_s0] sm:$0xff]  ;;  %v51_v3 = vunpack.c.l.s4 %v8524_v2  ;;  %s8527_s29 = smov 108   ;;  %s8528_s30 = smov 107   ;;  %v46_v24 = vld [vmem:[%s11993_s0 + $0x8] sm:$0x3f]  ;;  %645 = vmatprep.mubr.bf16.mxu0 %v8539_v32  ;;  %688 = vmatprep.mubr.bf16.mxu1 %v8539_v32  ;;  %vm207_vm1 = vcmask 1014784  }
   0x2   :  { %v54_v4 = vshrl.u32 %v53_v0, 7  ;;  %v80_v6 = vcombine.low %v45_v1, %v45_v1  ;;  %v49_v8 = vcombine.high %v45_v1, %v45_v1  ;;  %s8529_s14 = smov 126   ;;  %s8530_s15 = smov 125   ;;  %v89_v25 = vcombine.low %v46_v24, %v46_v24  ;;  %7606 = vset.pattern.permute.xlu1 %v8539_v32  ;;  %7605 = vset.pattern.permute.xlu0 %v8539_v32  ;;  %v574_v46 = vld [vmem:[%s11995_s2 + $0x8] sm:$0xff]  ;;  %v573_v47 = vld [vmem:[%s11995_s2] sm:$0xff] }
   0x3   :  { %v52_v5 = vunpack.c.0.s8 %v51_v3  ;;  %s8531_s16 = smov 106   ;;  %s8532_s17 = smov 105   ;;  %v127_v37 = vcombine.high %v46_v24, %v46_v24  ;;  %v754_v48 = vld [vmem:[%s11996_s3] sm:$0xff]  ;;  %v755_v50 = vld [vmem:[%s11996_s3 + $0x8] sm:$0xff]  ;;  %vm234_vm2 = vcmask 883712   ;;  %vm151_vm3 = vcmask 1031168  }
   0x4   :  { %s8533_s18 = smov 104   ;;  %s8534_s19 = smov 88   ;;  %vm12010_vm4 = vcmask 875520   ;;  %vm180_vm5 = vcmask 1022976   ;;  %vm490_vm6 = vcmask 1041408   ;;  %vm497_vm7 = vcmask 1043456  }
   0x5   :  { %v8621_v7 = vsub.s32 %v52_v5, %v54_v4  ;;  %s8535_s20 = smov 86   ;;  %s8536_s21 = smov 85   ;;  %vm12007_vm8 = vcmask 867328   ;;  %vm504_vm9 = vcmask 1045504   ;;  %vm342_vm10 = vcmask 850944  }
   0x6   :  { %s8537_s24 = smov 87   ;;  %s8538_s25 = smov 84   ;;  %vm315_vm11 = vcmask 859136   ;;  %vm369_vm12 = vcmask 719872   ;;  %vm12012_vm13 = vcmask 703488   ;;  %vm450_vm14 = vcmask 695296  }
   0x7   :  { %v87_v9 = vrot.slane %v80_v6, %v8621_v7  ;;  %v8625_v10 = vrot.slane %v45_v1, %v8621_v7  ;;  %v8629_v11 = vrot.slane %v49_v8, %v8621_v7  ;;  %v8677_v26 = vrot.slane %v46_v24, %v8621_v7  ;;  %s8544_s26 = smov 121  }
   0x8   :  { %v96_v29 = vrot.slane %v89_v25, %v8621_v7  ;;  %v134_v38 = vrot.slane %v127_v37, %v8621_v7  ;;  %vm12008_vm15 = vcmask 711680  }
   0x9   :  { %98 = vrot.lane.b32.xlu1 %v87_v9, %s8525_s27  ;;  %v88_v12 = vcombine.high %v87_v9, %v87_v9  ;;  %v8633_v13 = vcombine.high %v8625_v10, %v8625_v10  ;;  %v126_v16 = vcombine.low %v8629_v11, %v8629_v11  ;;  %v125_v18 = vcombine.low %v8625_v10, %v8625_v10 }
   0xa   :  { %v164_v20 = vcombine.low %v87_v9, %v87_v9  ;;  %v8683_v28 = vcombine.high %v8629_v11, %v8629_v11  ;;  %v135_v31 = vcombine.low %v8677_v26, %v8677_v26  ;;  %v165_v35 = vcombine.low %v96_v29, %v96_v29 }
   0xb   :  { %v7395_v14 = vpack.i.bf16 %v8625_v10, %v88_v12  ;;  %v7400_v15 = vpack.i.bf16 %v8629_v11, %v8633_v13  ;;  %v7415_v17 = vpack.i.bf16 %v126_v16, %v8625_v10  ;;  %v7420_v19 = vpack.i.bf16 %v125_v18, %v87_v9 }
   0xc   :  { %v7430_v21 = vpack.i.bf16 %v8633_v13, %v8625_v10  ;;  %v7435_v22 = vpack.i.bf16 %v88_v12, %v87_v9  ;;  %v7440_v23 = vpack.i.bf16 %v8625_v10, %v125_v18  ;;  %v7455_v27 = vpack.i.bf16 %v87_v9, %v164_v20 }
   0xd   :  { %7396 = vrot.lane.b32.xlu0 %v7395_v14, %s8525_s27  ;;  %193 = vrot.lane.b32.xlu1 %v8625_v10, %s8526_s28  ;;  %v7470_v30 = vpack.i.bf16 %v8677_v26, %v8683_v28  ;;  %v7465_v33 = vpack.i.bf16 %v96_v29, %v8633_v13  ;;  %v7480_v34 = vpack.i.bf16 %v135_v31, %v8629_v11 }
   0xe   :  { %v7490_v36 = vpack.i.bf16 %v165_v35, %v8625_v10  ;;  %v8714_v39 = vcombine.high %v8677_v26, %v8677_v26  ;;  %v97_v40 = vcombine.high %v96_v29, %v96_v29  ;;  %v136_v42 = vcombine.low %v134_v38, %v134_v38 }
   0xf   :  { %v7560_v45 = vpack.i.bf16 %v135_v31, %v96_v29 }
  0x10   :  { %v7540_v41 = vpack.i.bf16 %v134_v38, %v8714_v39  ;;  %v7535_v43 = vpack.i.bf16 %v8677_v26, %v97_v40  ;;  %v7550_v44 = vpack.i.bf16 %v136_v42, %v8677_v26 }
  0x11   :  { %7406 = vrot.lane.b32.xlu1 %v7395_v14, %s8527_s29  ;;  %7401 = vrot.lane.b32.xlu0 %v7400_v15, %s8526_s28 }
  0x15   :  { %7416 = vrot.lane.b32.xlu1 %v7415_v17, %s8528_s30  ;;  %7411 = vrot.lane.b32.xlu0 %v7415_v17, %s8529_s14 }
  0x19   :  { %7421 = vrot.lane.b32.xlu1 %v7420_v19, %s8530_s15  ;;  %220 = vrot.lane.b32.xlu0 %v87_v9, %s8527_s29 }
  0x1d   :  { %7426 = vrot.lane.b32.xlu1 %v7420_v19, %s8531_s16  ;;  %137 = vrot.lane.b32.xlu0 %v125_v18, %s8529_s14 }
  0x21   :  { %274 = vrot.lane.b32.xlu1 %v164_v20, %s8531_s16  ;;  %247 = vrot.lane.b32.xlu0 %v125_v18, %s8528_s30 }
  0x25   :  { %305 = vrot.lane.b32.xlu1 %v8629_v11, %s8532_s17  ;;  %166 = vrot.lane.b32.xlu0 %v164_v20, %s8530_s15 }
  0x29   :  { %332 = vrot.lane.b32.xlu1 %v8625_v10, %s8533_s18  ;;  %7431 = vrot.lane.b32.xlu0 %v7430_v21, %s8532_s17 }
  0x2d   :  { %359 = vrot.lane.b32.xlu1 %v126_v16, %s8534_s19  ;;  %7436 = vrot.lane.b32.xlu0 %v7435_v22, %s8533_s18 }
  0x31   :  { %413 = vrot.lane.b32.xlu1 %v8629_v11, %s8535_s20  ;;  %7441 = vrot.lane.b32.xlu0 %v7440_v23, %s8534_s19 }
  0x35   :  { %440 = vrot.lane.b32.xlu1 %v8625_v10, %s8536_s21  ;;  %7446 = vrot.lane.b32.xlu0 %v7430_v21, %s8535_s20 }
  0x39   :  { %386 = vrot.lane.b32.xlu1 %v125_v18, %s8537_s24  ;;  %7451 = vrot.lane.b32.xlu0 %v7435_v22, %s8536_s21 }
  0x3d   :  { %467 = vrot.lane.b32.xlu1 %v126_v16, %s8538_s25  ;;  %7456 = vrot.lane.b32.xlu0 %v7455_v27, %s8537_s24 }
  0x41   :  { %7461 = vrot.lane.b32.xlu0 %v7440_v23, %s8538_s25  ;;  %7471 = vrot.lane.b32.xlu1 %v7470_v30, %s8526_s28 }
  0x45   :  { %7466 = vrot.lane.b32.xlu0 %v7465_v33, %s8525_s27  ;;  %7481 = vrot.lane.b32.xlu1 %v7480_v34, %s8529_s14 }
  0x49   :  { %7476 = vrot.lane.b32.xlu0 %v7465_v33, %s8527_s29  ;;  %7491 = vrot.lane.b32.xlu1 %v7490_v36, %s8530_s15 }
  0x4d   :  { %7486 = vrot.lane.b32.xlu0 %v7480_v34, %s8528_s30  ;;  %7501 = vrot.lane.b32.xlu1 %v7470_v30, %s8532_s17 }
  0x51   :  { %7496 = vrot.lane.b32.xlu0 %v7490_v36, %s8531_s16  ;;  %7511 = vrot.lane.b32.xlu1 %v7480_v34, %s8534_s19 }
  0x55   :  { %7506 = vrot.lane.b32.xlu0 %v7465_v33, %s8533_s18  ;;  %7521 = vrot.lane.b32.xlu1 %v7465_v33, %s8536_s21 }
  0x59   :  { %7516 = vrot.lane.b32.xlu0 %v7470_v30, %s8535_s20  ;;  %7531 = vrot.lane.b32.xlu1 %v7480_v34, %s8538_s25 }
  0x5d   :  { %7526 = vrot.lane.b32.xlu0 %v7490_v36, %s8537_s24  ;;  %7541 = vrot.lane.b32.xlu1 %v7540_v41, %s8526_s28 }
  0x61   :  { %7536 = vrot.lane.b32.xlu0 %v7535_v43, %s8525_s27  ;;  %7551 = vrot.lane.b32.xlu1 %v7550_v44, %s8529_s14 }
  0x65   :  { %7546 = vrot.lane.b32.xlu0 %v7535_v43, %s8527_s29  ;;  %7561 = vrot.lane.b32.xlu1 %v7560_v45, %s8530_s15  ;;  %s8546_s15 = smov 115  }
  0x69   :  { %7556 = vrot.lane.b32.xlu0 %v7550_v44, %s8528_s30  ;;  %7571 = vrot.lane.b32.xlu1 %v7540_v41, %s8532_s17 }
  0x6d   :  { %7566 = vrot.lane.b32.xlu0 %v7560_v45, %s8531_s16  ;;  %7581 = vrot.lane.b32.xlu1 %v7550_v44, %s8534_s19 }
  0x71   :  { %7576 = vrot.lane.b32.xlu0 %v7535_v43, %s8533_s18  ;;  %7591 = vrot.lane.b32.xlu1 %v7535_v43, %s8536_s21  ;;  %s8542_s21 = smov 116  }
  0x75   :  { %7586 = vrot.lane.b32.xlu0 %v7540_v41, %s8535_s20  ;;  %7601 = vrot.lane.b32.xlu1 %v7550_v44, %s8538_s25 }
  0x79   :  { %7596 = vrot.lane.b32.xlu0 %v7560_v45, %s8537_s24  ;;  %582 = vperm.xlu1 %7606, %v574_v46  }
  0x7b   :  { %v99_v49 = vpop.permute.xlu1 %98 }
  0x7d   :  { %577 = vperm.xlu0 %7605, %v573_v47   ;;  %758 = vperm.xlu1 %7606, %v754_v48  }
  0x7f   :  { %v8748_v51 = vpop.permute.xlu0 %7396  ;;  %v194_v52 = vpop.permute.xlu1 %193 }
  0x80   :  { %v7399_v57 = vunpack.i.h.bf16 %v8748_v51  ;;  %v7398_v58 = vunpack.i.l.bf16 %v8748_v51 }
  0x81   :  { %763 = vperm.xlu0 %7605, %v755_v50  }
  0x82   :  { %v114_v7 = vsel %vm112_vm0, %v7398_v58, %v7399_v57 }
  0x83   :  { %v8750_v53 = vpop.permute.xlu1 %7406  ;;  %v8752_v54 = vpop.permute.xlu0 %7401  ;;  %v492_v20 = vsel %vm490_vm6, %v8633_v13, %v114_v7  ;;  %v113_v13 = vsel %vm112_vm0, %v99_v49, %v7398_v58 }
  0x84   :  { %v7409_v59 = vunpack.i.h.bf16 %v8750_v53  ;;  %v7408_v60 = vunpack.i.l.bf16 %v8750_v53  ;;  %v7404_v61 = vunpack.i.h.bf16 %v8752_v54  ;;  %v7403_v62 = vunpack.i.l.bf16 %v8752_v54 }
  0x85   :  { %v491_v41 = vsel %vm490_vm6, %v8625_v10, %v113_v13 }
  0x86   :  { %v209_v8 = vsel %vm207_vm1, %v7403_v62, %v7404_v61  ;;  %v236_v9 = vsel %vm234_vm2, %v7408_v60, %v7409_v59  ;;  %v208_v33 = vsel %vm207_vm1, %v194_v52, %v7403_v62 }
  0x87   :  { %v8754_v55 = vpop.permute.xlu1 %7416  ;;  %v8756_v56 = vpop.permute.xlu0 %7411  ;;  %v512_v21 = vsel %vm490_vm6, %v209_v8, %v236_v9 }
  0x88   :  { %v7419_v63 = vunpack.i.h.bf16 %v8754_v55  ;;  %v7418_v0 = vunpack.i.l.bf16 %v8754_v55  ;;  %v7414_v1 = vunpack.i.h.bf16 %v8756_v56  ;;  %v7413_v2 = vunpack.i.l.bf16 %v8756_v56 }
  0x8a   :  { %v153_v15 = vsel %vm151_vm3, %v7413_v2, %v7414_v1  ;;  %v263_v16 = vsel %vm12010_vm4, %v7418_v0, %v7419_v63 }
  0x8b   :  { %v8768_v3 = vpop.permute.xlu1 %7421  ;;  %v221_v4 = vpop.permute.xlu0 %220  ;;  %v499_v24 = vsel %vm497_vm7, %v492_v20, %v153_v15  ;;  %v518_v25 = vsel %vm497_vm7, %v512_v21, %v263_v16 }
  0x8c   :  { %v7424_v5 = vunpack.i.h.bf16 %v8768_v3  ;;  %v7423_v6 = vunpack.i.l.bf16 %v8768_v3  ;;  %v235_v22 = vsel %vm234_vm2, %v221_v4, %v7408_v60 }
  0x8d   :  { %v511_v36 = vsel %vm490_vm6, %v208_v33, %v235_v22 }
  0x8e   :  { %v182_v19 = vsel %vm180_vm5, %v7423_v6, %v7424_v5 }
  0x8f   :  { %v8781_v12 = vpop.permute.xlu1 %7426  ;;  %v138_v14 = vpop.permute.xlu0 %137  ;;  %v506_v30 = vsel %vm504_vm9, %v499_v24, %v182_v19 }
  0x90   :  { %v7429_v17 = vunpack.i.h.bf16 %v8781_v12  ;;  %v7428_v18 = vunpack.i.l.bf16 %v8781_v12  ;;  %v152_v37 = vsel %vm151_vm3, %v138_v14, %v7413_v2 }
  0x91   :  { %v498_v44 = vsel %vm497_vm7, %v491_v41, %v152_v37 }
  0x92   :  { %v290_v23 = vsel %vm12007_vm8, %v7428_v18, %v7429_v17 }
  0x93   :  { %v275_v27 = vpop.permute.xlu1 %274  ;;  %v248_v29 = vpop.permute.xlu0 %247  ;;  %v524_v31 = vsel %vm504_vm9, %v518_v25, %v290_v23 }
  0x94   :  { %v262_v34 = vsel %vm12010_vm4, %v248_v29, %v7418_v0  ;;  %v560_v35 = vpack.c.bf16 %v524_v31, %v506_v30  ;;  %v289_v38 = vsel %vm12007_vm8, %v275_v27, %v7428_v18  ;;  %vm12009_vm8 = vcmask 687104  }
  0x95   :  { %v517_v40 = vsel %vm497_vm7, %v511_v36, %v262_v34 }
  0x96   :  { %613 = vmatprep.subr.bf16.mxu0 %v560_v35  ;;  %v523_v47 = vsel %vm504_vm9, %v517_v40, %v289_v38 }
  0x97   :  { %v8814_v42 = vpop.permute.xlu1 %305  ;;  %v167_v43 = vpop.permute.xlu0 %166 }
  0x98   :  { %v181_v45 = vsel %vm180_vm5, %v167_v43, %v7423_v6 }
  0x99   :  { %v505_v46 = vsel %vm504_vm9, %v498_v44, %v181_v45 }
  0x9a   :  { %v559_v48 = vpack.c.bf16 %v523_v47, %v505_v46 }
  0x9b   :  { %v8820_v49 = vpop.permute.xlu1 %332  ;;  %v7432_v50 = vpop.permute.xlu0 %7431 }
  0x9c   :  { %614 = vmatpush1.bf16.msra.mxu0 %v559_v48  ;;  %v7434_v8 = vunpack.i.h.bf16 %v7432_v50  ;;  %v7433_v9 = vunpack.i.l.bf16 %v7432_v50 }
  0x9e   :  { %v317_v29 = vsel %vm315_vm11, %v7434_v8, %v8814_v42  ;;  %v316_v30 = vsel %vm315_vm11, %v7433_v9, %v7434_v8 }
  0x9f   :  { %v8822_v52 = vpop.permute.xlu1 %359  ;;  %v7437_v58 = vpop.permute.xlu0 %7436 }
  0xa0   :  { %v7439_v6 = vunpack.i.h.bf16 %v7437_v58  ;;  %v7438_v7 = vunpack.i.l.bf16 %v7437_v58 }
  0xa2   :  { %v344_v19 = vsel %vm342_vm10, %v7439_v6, %v8820_v49  ;;  %v343_v20 = vsel %vm342_vm10, %v7438_v7, %v7439_v6 }
  0xa3   :  { %v8824_v10 = vpop.permute.xlu1 %413  ;;  %v7442_v60 = vpop.permute.xlu0 %7441  ;;  %v530_v31 = vsel %vm490_vm6, %v317_v29, %v344_v19  ;;  %v529_v36 = vsel %vm490_vm6, %v316_v30, %v343_v20 }
  0xa4   :  { %v7444_v21 = vunpack.i.h.bf16 %v7442_v60  ;;  %v7443_v22 = vunpack.i.l.bf16 %v7442_v60 }
  0xa6   :  { %v371_v37 = vsel %vm369_vm12, %v7444_v21, %v8822_v52  ;;  %v370_v38 = vsel %vm369_vm12, %v7443_v22, %v7444_v21 }
  0xa7   :  { %v8826_v62 = vpop.permute.xlu1 %440  ;;  %v7447_v0 = vpop.permute.xlu0 %7446  ;;  %v536_v60 = vsel %vm497_vm7, %v530_v31, %v371_v37  ;;  %v535_v7 = vsel %vm497_vm7, %v529_v36, %v370_v38 }
  0xa8   :  { %v7449_v23 = vunpack.i.h.bf16 %v7447_v0  ;;  %v7448_v24 = vunpack.i.l.bf16 %v7447_v0 }
  0xaa   :  { %v425_v43 = vsel %vm12012_vm13, %v7449_v23, %v8824_v10  ;;  %v424_v44 = vsel %vm12012_vm13, %v7448_v24, %v7449_v23 }
  0xab   :  { %v8828_v2 = vpop.permute.xlu1 %386  ;;  %v7452_v4 = vpop.permute.xlu0 %7451 }
  0xac   :  { %v7454_v14 = vunpack.i.h.bf16 %v7452_v4  ;;  %v7453_v15 = vunpack.i.l.bf16 %v7452_v4 }
  0xae   :  { %v452_v13 = vsel %vm450_vm14, %v7454_v14, %v8826_v62  ;;  %v451_v33 = vsel %vm450_vm14, %v7453_v15, %v7454_v14 }
  0xaf   :  { %v8830_v16 = vpop.permute.xlu1 %467  ;;  %v7457_v18 = vpop.permute.xlu0 %7456  ;;  %v548_v47 = vsel %vm490_vm6, %v425_v43, %v452_v13  ;;  %v547_v58 = vsel %vm490_vm6, %v424_v44, %v451_v33 }
  0xb0   :  { %v7459_v25 = vunpack.i.h.bf16 %v7457_v18  ;;  %v7458_v27 = vunpack.i.l.bf16 %v7457_v18 }
  0xb2   :  { %v398_v45 = vsel %vm12008_vm15, %v7459_v25, %v8828_v2  ;;  %v397_v46 = vsel %vm12008_vm15, %v7458_v27, %v7459_v25  ;;  %vm594_vm15 = vcmask 1046528   ;;  %v8882_v27 = vld [vmem:[%s11994_s1] sm:$0xff]   ;;  %s8541_s1 = smov 117  }
  0xb3   :  { %v7462_v34 = vpop.permute.xlu0 %7461  ;;  %v8842_v35 = vpop.permute.xlu1 %7471  ;;  %v542_v14 = vsel %vm504_vm9, %v536_v60, %v398_v45  ;;  %v541_v15 = vsel %vm504_vm9, %v535_v7, %v397_v46 }
  0xb4   :  { %v7464_v40 = vunpack.i.h.bf16 %v7462_v34  ;;  %v7463_v41 = vunpack.i.l.bf16 %v7462_v34  ;;  %v7474_v20 = vunpack.i.h.bf16 %v8842_v35  ;;  %v7473_v29 = vunpack.i.l.bf16 %v8842_v35 }
  0xb6   :  { %v479_v48 = vsel %vm12009_vm8, %v7464_v40, %v8830_v16  ;;  %v478_v50 = vsel %vm12009_vm8, %v7463_v41, %v7464_v40  ;;  %vm12011_vm8 = vcmask 244736   ;;  %v211_v37 = vsel %vm207_vm1, %v7473_v29, %v7474_v20 }
  0xb7   :  { %v8860_v0 = vpop.permute.xlu0 %7466  ;;  %v8862_v4 = vpop.permute.xlu1 %7481  ;;  %v554_v6 = vsel %vm497_vm7, %v548_v47, %v479_v48  ;;  %v553_v8 = vsel %vm497_vm7, %v547_v58, %v478_v50  ;;  %v210_v56 = vsel %vm207_vm1, %v7404_v61, %v7473_v29 }
  0xb8   :  { %v7469_v9 = vunpack.i.h.bf16 %v8860_v0  ;;  %v566_v18 = vpack.c.bf16 %v554_v6, %v542_v14  ;;  %v565_v19 = vpack.c.bf16 %v553_v8, %v541_v15  ;;  %v7468_v21 = vunpack.i.l.bf16 %v8860_v0  ;;  %v812_v0 = vld [vmem:[%s11997_s4 + $0x80] sm:$0xff] }
  0xb9   :  { %v7484_v22 = vunpack.i.h.bf16 %v8862_v4  ;;  %v7483_v33 = vunpack.i.l.bf16 %v8862_v4 }
  0xba   :  { %6665 = vmatprep.subr.msk.bf16.mxu0 %vm594_vm15, %v566_v18  ;;  %v596_v24 = vsel %vm594_vm15, %v565_v19, 0  ;;  %v116_v13 = vsel %vm112_vm0, %v7468_v21, %v7469_v9  ;;  %v115_v34 = vsel %vm112_vm0, %v7399_v57, %v7468_v21 }
  0xbb   :  { %v8874_v23 = vpop.permute.xlu0 %7476  ;;  %v8877_v25 = vpop.permute.xlu1 %7491  ;;  %616 = vmatpush1.bf16.msra.mxu0 %v596_v24  ;;  %v155_v51 = vsel %vm151_vm3, %v7483_v33, %v7484_v22  ;;  %v494_v57 = vsel %vm490_vm6, %v8683_v28, %v116_v13  ;;  %v154_v47 = vsel %vm151_vm3, %v7414_v1, %v7483_v33  ;;  %v493_v48 = vsel %vm490_vm6, %v8629_v11, %v115_v34 }
  0xbc   :  { %v7479_v30 = vunpack.i.h.bf16 %v8874_v23  ;;  %v7478_v31 = vunpack.i.l.bf16 %v8874_v23  ;;  %v7494_v36 = vunpack.i.h.bf16 %v8877_v25  ;;  %v7493_v43 = vunpack.i.l.bf16 %v8877_v25  ;;  %v824_v23 = vld [vmem:[%s11997_s4 + $0xe0] sm:$0xff] }
  0xbd   :  { %v501_v60 = vsel %vm497_vm7, %v494_v57, %v155_v51  ;;  %v500_v8 = vsel %vm497_vm7, %v493_v48, %v154_v47 }
  0xbe   :  { %v238_v38 = vsel %vm234_vm2, %v7478_v31, %v7479_v30  ;;  %6666 = vmatmul.mubr.msk.bf16.vlgmr.msra.gmra.mrb[0].mxu0 %vm12011_vm8, %v8882_v27  ;;  %v237_v28 = vsel %vm234_vm2, %v7409_v59, %v7478_v31  ;;  %v184_v50 = vsel %vm180_vm5, %v7493_v43, %v7494_v36  ;;  %v183_v54 = vsel %vm180_vm5, %v7424_v5, %v7493_v43 }
  0xbf   :  { %v8903_v40 = vpop.permute.xlu0 %7486  ;;  %v8905_v41 = vpop.permute.xlu1 %7501  ;;  %731 = vmatprep.mubr.bf16.mxu0 %v8539_v32  ;;  %v514_v46 = vsel %vm490_vm6, %v211_v37, %v238_v38  ;;  %v508_v61 = vsel %vm504_vm9, %v501_v60, %v184_v50  ;;  %v513_v14 = vsel %vm490_vm6, %v210_v56, %v237_v28  ;;  %v507_v21 = vsel %vm504_vm9, %v500_v8, %v183_v54 }
  0xc0   :  { %v7489_v44 = vunpack.i.h.bf16 %v8903_v40  ;;  %v7488_v45 = vunpack.i.l.bf16 %v8903_v40  ;;  %v7504_v55 = vunpack.i.h.bf16 %v8905_v41  ;;  %v7503_v29 = vunpack.i.l.bf16 %v8905_v41 }
  0xc2   :  { %v265_v58 = vsel %vm12010_vm4, %v7488_v45, %v7489_v44  ;;  %v264_v53 = vsel %vm12010_vm4, %v7419_v63, %v7488_v45  ;;  %vm12014_vm4 = vcmask 867328   ;;  %v319_v38 = vsel %vm315_vm11, %v7503_v29, %v7504_v55 }
  0xc3   :  { %v8935_v1 = vpop.permute.xlu0 %7496  ;;  %v8937_v11 = vpop.permute.xlu1 %7511  ;;  %v520_v7 = vsel %vm497_vm7, %v514_v46, %v265_v58  ;;  %vm12015_vm8 = vmmov %vm12014_vm4  ;;  %v519_v3 = vsel %vm497_vm7, %v513_v14, %v264_v53  ;;  %v318_v56 = vsel %vm315_vm11, %v8814_v42, %v7503_v29 }
  0xc4   :  { %v7499_v59 = vunpack.i.h.bf16 %v8935_v1  ;;  %v7498_v6 = vunpack.i.l.bf16 %v8935_v1  ;;  %v7514_v13 = vunpack.i.h.bf16 %v8937_v11  ;;  %v7513_v57 = vunpack.i.l.bf16 %v8937_v11 }
  0xc6   :  { %v292_v63 = vsel %vm12014_vm4, %v7498_v6, %v7499_v59  ;;  %v291_v15 = vsel %vm12015_vm8, %v7429_v17, %v7498_v6  ;;  %vm12016_vm4 = vcmask 687104  }
  0xc7   :  { %v8959_v18 = vpop.permute.xlu0 %7506  ;;  %v8961_v5 = vpop.permute.xlu1 %7521  ;;  %v526_v19 = vsel %vm504_vm9, %v520_v7, %v292_v63  ;;  %v525_v24 = vsel %vm504_vm9, %v519_v3, %v291_v15  ;;  %v372_v3 = vsel %vm369_vm12, %v8822_v52, %v7513_v57  ;;  %vm12017_vm8 = vmmov %vm12016_vm4  ;;  %v796_v52 = vld [vmem:[%s11997_s4] sm:$0xff] }
  0xc8   :  { %v7509_v31 = vunpack.i.h.bf16 %v8959_v18  ;;  %v7508_v12 = vunpack.i.l.bf16 %v8959_v18  ;;  %v7524_v17 = vunpack.i.h.bf16 %v8961_v5  ;;  %v7523_v33 = vunpack.i.l.bf16 %v8961_v5 }
  0xc9   :  { %v562_v34 = vpack.c.bf16 %v526_v19, %v508_v61  ;;  %v561_v37 = vpack.c.bf16 %v525_v24, %v507_v21 }
  0xca   :  { %v346_v51 = vsel %vm342_vm10, %v7508_v12, %v7509_v31  ;;  %v345_v43 = vsel %vm342_vm10, %v8820_v49, %v7508_v12  ;;  %v454_v45 = vsel %vm450_vm14, %v7523_v33, %v7524_v17  ;;  %v373_v49 = vsel %vm369_vm12, %v7513_v57, %v7514_v13 }
  0xcb   :  { %656 = vmatprep.subr.bf16.mxu1 %v562_v34  ;;  %v8984_v46 = vpop.permute.xlu0 %7516  ;;  %v8986_v47 = vpop.permute.xlu1 %7531  ;;  %v532_v60 = vsel %vm490_vm6, %v319_v38, %v346_v51  ;;  %v531_v14 = vsel %vm490_vm6, %v318_v56, %v345_v43  ;;  %v453_v42 = vsel %vm450_vm14, %v8826_v62, %v7523_v33  ;;  %v800_v33 = vld [vmem:[%s11997_s4 + $0x20] sm:$0xff] }
  0xcc   :  { %v7519_v48 = vunpack.i.h.bf16 %v8984_v46  ;;  %v7518_v28 = vunpack.i.l.bf16 %v8984_v46  ;;  %v7534_v50 = vunpack.i.h.bf16 %v8986_v47  ;;  %v7533_v58 = vunpack.i.l.bf16 %v8986_v47  ;;  %657 = vmatpush1.bf16.msra.mxu1 %v561_v37  ;;  %v808_v56 = vld [vmem:[%s11997_s4 + $0x60] sm:$0xff]  ;;  %v797_v47 = vld [vmem:[%s11997_s4 + $0x8] sm:$0xff] }
  0xcd   :  { %v538_v15 = vsel %vm497_vm7, %v532_v60, %v373_v49  ;;  %v537_v12 = vsel %vm497_vm7, %v531_v14, %v372_v3  ;;  %v804_v60 = vld [vmem:[%s11997_s4 + $0x40] sm:$0xff] }
  0xce   :  { %v426_v53 = vsel %vm12012_vm13, %v8824_v10, %v7518_v28  ;;  %v427_v6 = vsel %vm12012_vm13, %v7518_v28, %v7519_v48  ;;  %v481_v7 = vsel %vm12016_vm4, %v7533_v58, %v7534_v50  ;;  %v480_v21 = vsel %vm12017_vm8, %v8830_v16, %v7533_v58 }
  0xcf   :  { %v550_v54 = vsel %vm490_vm6, %v427_v6, %v454_v45  ;;  %v9007_v61 = vpop.permute.xlu0 %7526  ;;  %v7542_v8 = vpop.permute.xlu1 %7541  ;;  %v549_v24 = vsel %vm490_vm6, %v426_v53, %v453_v42  ;;  %vm12018_vm4 = vcmask 711680   ;;  %v6672_v28 = vcombine.high %v796_v52, %v800_v33 }
  0xd0   :  { %v7529_v10 = vunpack.i.h.bf16 %v9007_v61  ;;  %v7528_v63 = vunpack.i.l.bf16 %v9007_v61  ;;  %v556_v19 = vsel %vm497_vm7, %v550_v54, %v481_v7  ;;  %vm12019_vm13 = vmmov %vm12018_vm4  ;;  %v7544_v58 = vunpack.i.h.bf16 %v7542_v8 }
  0xd1   :  { %v7543_v49 = vunpack.i.l.bf16 %v7542_v8  ;;  %v6671_v42 = vcombine.low %v796_v52, %v800_v33 }
  0xd2   :  { %v400_v62 = vsel %vm12018_vm4, %v7528_v63, %v7529_v10  ;;  %v399_v29 = vsel %vm12019_vm13, %v8828_v2, %v7528_v63  ;;  %v555_v2 = vsel %vm497_vm7, %v549_v24, %v480_v21  ;;  %v6680_v21 = vcombine.high %v804_v60, %v808_v56 }
  0xd3   :  { %v7537_v16 = vpop.permute.xlu0 %7536  ;;  %v544_v34 = vsel %vm504_vm9, %v538_v15, %v400_v62  ;;  %v7552_v37 = vpop.permute.xlu1 %7551  ;;  %v543_v38 = vsel %vm504_vm9, %v537_v12, %v399_v29  ;;  %v212_v24 = vsel %vm207_vm1, %v7474_v20, %v7543_v49  ;;  %v213_v62 = vsel %vm207_vm1, %v7543_v49, %v7544_v58 }
  0xd4   :  { %v7539_v51 = vunpack.i.h.bf16 %v7537_v16  ;;  %v7538_v57 = vunpack.i.l.bf16 %v7537_v16  ;;  %v568_v43 = vpack.c.bf16 %v556_v19, %v544_v34  ;;  %v567_v45 = vpack.c.bf16 %v555_v2, %v543_v38 }
  0xd5   :  { %v7554_v6 = vunpack.i.h.bf16 %v7552_v37  ;;  %v7553_v7 = vunpack.i.l.bf16 %v7552_v37  ;;  %v6679_v19 = vcombine.low %v804_v60, %v808_v56  ;;  %vm12020_vm1 = vcmask 244736  }
  0xd6   :  { %6667 = vmatprep.subr.msk.bf16.mxu1 %vm594_vm15, %v568_v43  ;;  %v602_v54 = vsel %vm594_vm15, %v567_v45, 0  ;;  %v117_v8 = vsel %vm112_vm0, %v7469_v9, %v7538_v57  ;;  %v118_v63 = vsel %vm112_vm0, %v7538_v57, %v7539_v51  ;;  %v816_v9 = vld [vmem:[%s11997_s4 + $0xa0] sm:$0xff]  ;;  %vm12021_vm13 = vcmask 875520  }
  0xd7   :  { %v7547_v53 = vpop.permute.xlu0 %7546  ;;  %v7562_v14 = vpop.permute.xlu1 %7561  ;;  %659 = vmatpush1.bf16.msra.mxu1 %v602_v54  ;;  %v495_v52 = vsel %vm490_vm6, %v8677_v26, %v117_v8  ;;  %v156_v35 = vsel %vm151_vm3, %v7484_v22, %v7553_v7  ;;  %v157_v20 = vsel %vm151_vm3, %v7553_v7, %v7554_v6  ;;  %v496_v34 = vsel %vm490_vm6, %v8714_v39, %v118_v63  ;;  %v820_v39 = vld [vmem:[%s11997_s4 + $0xc0] sm:$0xff]  ;;  %vm12022_vm8 = vmmov %vm12021_vm13 }
  0xd8   :  { %v7549_v15 = vunpack.i.h.bf16 %v7547_v53  ;;  %v7548_v3 = vunpack.i.l.bf16 %v7547_v53  ;;  %3100 = vmatprep.subr.bf16.mxu1 %v6672_v28  ;;  %v7564_v12 = vunpack.i.h.bf16 %v7562_v14  ;;  %v7563_v51 = vunpack.i.l.bf16 %v7562_v14  ;;  %v832_v63 = vld [vmem:[%s11997_s4 + $0x120] sm:$0xff] }
  0xd9   :  { %v6688_v22 = vcombine.high %v812_v0, %v816_v9  ;;  %v503_v2 = vsel %vm497_vm7, %v496_v34, %v157_v20  ;;  %v502_v45 = vsel %vm497_vm7, %v495_v52, %v156_v35  ;;  %v6687_v60 = vcombine.low %v812_v0, %v816_v9  ;;  %v836_v34 = vld [vmem:[%s11997_s4 + $0x140] sm:$0xff] }
  0xda   :  { %v240_v29 = vsel %vm234_vm2, %v7548_v3, %v7549_v15  ;;  %6668 = vmatmul.mubr.msk.bf16.vlgmr.msra.gmra.mrb[0].mxu1 %vm12020_vm1, %v8882_v27  ;;  %v239_v37 = vsel %vm234_vm2, %v7479_v30, %v7548_v3  ;;  %v186_v43 = vsel %vm180_vm5, %v7563_v51, %v7564_v12  ;;  %v185_v56 = vsel %vm180_vm5, %v7494_v36, %v7563_v51  ;;  %v828_v36 = vld [vmem:[%s11997_s4 + $0x100] sm:$0xff] }
  0xdb   :  { %v7557_v33 = vpop.permute.xlu0 %7556  ;;  %v7572_v16 = vpop.permute.xlu1 %7571  ;;  %3101 = vmatpush1.bf16.msra.mxu1 %v6671_v42  ;;  %v516_v4 = vsel %vm490_vm6, %v213_v62, %v240_v29  ;;  %v515_v30 = vsel %vm490_vm6, %v212_v24, %v239_v37  ;;  %v510_v54 = vsel %vm504_vm9, %v503_v2, %v186_v43  ;;  %v6695_v14 = vcombine.low %v820_v39, %v824_v23  ;;  %v840_v37 = vld [vmem:[%s11997_s4 + $0x160] sm:$0xff] }
  0xdc   :  { %v7559_v38 = vunpack.i.h.bf16 %v7557_v33  ;;  %v7558_v26 = vunpack.i.l.bf16 %v7557_v33  ;;  %3102 = vmatprep.subr.bf16.mxu1 %v6680_v21  ;;  %v6696_v42 = vcombine.high %v820_v39, %v824_v23  ;;  %vm12023_vm4 = vcmask 867328  }
  0xdd   :  { %v7574_v8 = vunpack.i.h.bf16 %v7572_v16  ;;  %vm12024_vm1 = vmmov %vm12023_vm4  ;;  %v7573_v15 = vunpack.i.l.bf16 %v7572_v16  ;;  %v509_v1 = vsel %vm504_vm9, %v502_v45, %v185_v56  ;;  %v6704_v35 = vcombine.high %v828_v36, %v832_v63 }
  0xde   :  { %v267_v57 = vsel %vm12021_vm13, %v7558_v26, %v7559_v38  ;;  %v266_v28 = vsel %vm12022_vm8, %v7489_v44, %v7558_v26  ;;  %vm12025_vm5 = vcmask 703488  }
  0xdf   :  { %v7567_v58 = vpop.permute.xlu0 %7566  ;;  %v7582_v49 = vpop.permute.xlu1 %7581  ;;  %v522_v7 = vsel %vm497_vm7, %v516_v4, %v267_v57  ;;  %3103 = vmatpush1.bf16.msra.mxu1 %v6679_v19  ;;  %v521_v40 = vsel %vm497_vm7, %v515_v30, %v266_v28  ;;  %v321_v20 = vsel %vm315_vm11, %v7573_v15, %v7574_v8  ;;  %v320_v38 = vsel %vm315_vm11, %v7504_v55, %v7573_v15  ;;  %v844_v28 = vld [vmem:[%s11997_s4 + $0x180] sm:$0xff] }
  0xe0   :  { %v7569_v53 = vunpack.i.h.bf16 %v7567_v58  ;;  %v7568_v6 = vunpack.i.l.bf16 %v7567_v58  ;;  %3104 = vmatprep.subr.bf16.mxu1 %v6688_v22  ;;  %v7584_v0 = vunpack.i.h.bf16 %v7582_v49  ;;  %v7583_v16 = vunpack.i.l.bf16 %v7582_v49  ;;  %v848_v58 = vld [vmem:[%s11997_s4 + $0x1a0] sm:$0xff] }
  0xe1   :  { %v6703_v57 = vcombine.low %v828_v36, %v832_v63  ;;  %vm12027_vm11 = vcmask 687104   ;;  %v852_v8 = vld [vmem:[%s11997_s4 + $0x1c0] sm:$0xff] }
  0xe2   :  { %v293_v44 = vsel %vm12023_vm4, %v7499_v59, %v7568_v6  ;;  %v294_v25 = vsel %vm12024_vm1, %v7568_v6, %v7569_v53  ;;  %v375_v55 = vsel %vm369_vm12, %v7583_v16, %v7584_v0  ;;  %v6711_v6 = vcombine.low %v836_v34, %v840_v37 }
  0xe3   :  { %v7577_v3 = vpop.permute.xlu0 %7576  ;;  %v528_v19 = vsel %vm504_vm9, %v522_v7, %v294_v25  ;;  %v7592_v21 = vpop.permute.xlu1 %7591  ;;  %v527_v59 = vsel %vm504_vm9, %v521_v40, %v293_v44  ;;  %3105 = vmatpush1.bf16.msra.mxu1 %v6687_v60  ;;  %v856_v25 = vld [vmem:[%s11997_s4 + $0x1e0] sm:$0xff] }
  0xe4   :  { %v7579_v24 = vunpack.i.h.bf16 %v7577_v3  ;;  %v7578_v62 = vunpack.i.l.bf16 %v7577_v3  ;;  %v564_v29 = vpack.c.bf16 %v528_v19, %v510_v54  ;;  %v7594_v12 = vunpack.i.h.bf16 %v7592_v21  ;;  %3106 = vmatprep.subr.bf16.mxu1 %v6696_v42  ;;  %v805_v19 = vld [vmem:[%s11997_s4 + $0x48] sm:$0xff] }
  0xe5   :  { %v7593_v9 = vunpack.i.l.bf16 %v7592_v21  ;;  %v563_v52 = vpack.c.bf16 %v527_v59, %v509_v1  ;;  %v809_v21 = vld [vmem:[%s11997_s4 + $0x68] sm:$0xff]  ;;  %v6728_v1 = vcombine.high %v852_v8, %v856_v25  ;;  %v6727_v0 = vcombine.low %v852_v8, %v856_v25 }
  0xe6   :  { %v348_v33 = vsel %vm342_vm10, %v7578_v62, %v7579_v24  ;;  %699 = vmatprep.subr.bf16.mxu0 %v564_v29  ;;  %v347_v26 = vsel %vm342_vm10, %v7509_v31, %v7578_v62  ;;  %v6712_v31 = vcombine.high %v836_v34, %v840_v37  ;;  %vm12026_vm10 = vmmov %vm12025_vm5  ;;  %v860_v24 = vld [vmem:[%s11997_s4 + $0x200] sm:$0xff]  ;;  %v861_v8 = vld [vmem:[%s11997_s4 + $0x208] sm:$0xff] }
  0xe7   :  { %v7587_v51 = vpop.permute.xlu0 %7586  ;;  %v455_v4 = vsel %vm450_vm14, %v7524_v17, %v7593_v9  ;;  %700 = vmatpush1.bf16.msra.mxu0 %v563_v52  ;;  %v7602_v22 = vpop.permute.xlu1 %7601  ;;  %v456_v39 = vsel %vm450_vm14, %v7593_v9, %v7594_v12  ;;  %3107 = vmatpush1.bf16.msra.mxu1 %v6695_v14  ;;  %v534_v41 = vsel %vm490_vm6, %v321_v20, %v348_v33  ;;  %v864_v62 = vld [vmem:[%s11997_s4 + $0x220] sm:$0xff]  ;;  %v813_v9 = vld [vmem:[%s11997_s4 + $0x88] sm:$0xff] }
  0xe8   :  { %v7589_v43 = vunpack.i.h.bf16 %v7587_v51  ;;  %v7588_v2 = vunpack.i.l.bf16 %v7587_v51  ;;  %v7604_v23 = vunpack.i.h.bf16 %v7602_v22  ;;  %v7603_v18 = vunpack.i.l.bf16 %v7602_v22  ;;  %3108 = vmatprep.subr.bf16.mxu1 %v6704_v35  ;;  %v817_v52 = vld [vmem:[%s11997_s4 + $0xa8] sm:$0xff]  ;;  %v868_v20 = vld [vmem:[%s11997_s4 + $0x240] sm:$0xff] }
  0xe9   :  { %v533_v5 = vsel %vm490_vm6, %v320_v38, %v347_v26  ;;  %v374_v17 = vsel %vm369_vm12, %v7514_v13, %v7583_v16  ;;  %vm12028_vm12 = vmmov %vm12027_vm11  ;;  %v6720_v14 = vcombine.high %v844_v28, %v848_v58  ;;  %v6682_v12 = vcombine.high %v805_v19, %v809_v21  ;;  %v872_v33 = vld [vmem:[%s11997_s4 + $0x260] sm:$0xff]  ;;  %v821_v38 = vld [vmem:[%s11997_s4 + $0xc8] sm:$0xff] }
  0xea   :  { %v428_v30 = vsel %vm12025_vm5, %v7519_v48, %v7588_v2  ;;  %v429_v45 = vsel %vm12026_vm10, %v7588_v2, %v7589_v43  ;;  %v482_v11 = vsel %vm12027_vm11, %v7534_v50, %v7603_v18  ;;  %v483_v13 = vsel %vm12028_vm12, %v7603_v18, %v7604_v23  ;;  %v801_v50 = vld [vmem:[%s11997_s4 + $0x28] sm:$0xff]  ;;  %v876_v51 = vld [vmem:[%s11997_s4 + $0x280] sm:$0xff] }
  0xeb   :  { %v552_v49 = vsel %vm490_vm6, %v429_v45, %v456_v39  ;;  %v7597_v60 = vpop.permute.xlu0 %7596  ;;  %v551_v46 = vsel %vm490_vm6, %v428_v30, %v455_v4  ;;  %v540_v48 = vsel %vm497_vm7, %v534_v41, %v375_v55  ;;  %3109 = vmatpush1.bf16.msra.mxu1 %v6703_v57  ;;  %vm12029_vm6 = vcmask 711680   ;;  %v880_v4 = vld [vmem:[%s11997_s4 + $0x2a0] sm:$0xff]  ;;  %v829_v2 = vld [vmem:[%s11997_s4 + $0x108] sm:$0xff] }
  0xec   :  { %v7599_v56 = vunpack.i.h.bf16 %v7597_v60  ;;  %v7598_v53 = vunpack.i.l.bf16 %v7597_v60  ;;  %v558_v7 = vsel %vm497_vm7, %v552_v49, %v483_v13  ;;  %v557_v54 = vsel %vm497_vm7, %v551_v46, %v482_v11  ;;  %3110 = vmatprep.subr.bf16.mxu1 %v6712_v31  ;;  %vm12030_vm14 = vmmov %vm12029_vm6  ;;  %v833_v39 = vld [vmem:[%s11997_s4 + $0x128] sm:$0xff]  ;;  %v884_v41 = vld [vmem:[%s11997_s4 + $0x2c0] sm:$0xff] }
  0xed   :  { %v539_v44 = vsel %vm497_vm7, %v533_v5, %v374_v17  ;;  %v6674_v3 = vcombine.high %v797_v47, %v801_v50  ;;  %v6673_v29 = vcombine.low %v797_v47, %v801_v50  ;;  %v6736_v35 = vcombine.high %v860_v24, %v864_v62  ;;  %v888_v55 = vld [vmem:[%s11997_s4 + $0x2e0] sm:$0xff]  ;;  %v837_v17 = vld [vmem:[%s11997_s4 + $0x148] sm:$0xff] }
  0xee   :  { %v401_v42 = vsel %vm12029_vm6, %v7529_v10, %v7598_v53  ;;  %v402_v40 = vsel %vm12030_vm14, %v7598_v53, %v7599_v56  ;;  %v6719_v10 = vcombine.low %v844_v28, %v848_v58  ;;  %vm12031_vm7 = vcmask 244736   ;;  %v841_v30 = vld [vmem:[%s11997_s4 + $0x168] sm:$0xff]  ;;  %v892_v28 = vld [vmem:[%s11997_s4 + $0x300] sm:$0xff] }
  0xef   :  { %v546_v36 = vsel %vm504_vm9, %v540_v48, %v402_v40  ;;  %v545_v63 = vsel %vm504_vm9, %v539_v44, %v401_v42  ;;  %3111 = vmatpush1.bf16.msra.mxu1 %v6711_v6  ;;  %v6681_v16 = vcombine.low %v805_v19, %v809_v21  ;;  %v6690_v34 = vcombine.high %v813_v9, %v817_v52  ;;  %v896_v58 = vld [vmem:[%s11997_s4 + $0x320] sm:$0xff]  ;;  %v845_v13 = vld [vmem:[%s11997_s4 + $0x188] sm:$0xff] }
  0xf0   :  { %v570_v15 = vpack.c.bf16 %v558_v7, %v546_v36  ;;  %v569_v61 = vpack.c.bf16 %v557_v54, %v545_v63  ;;  %3112 = vmatprep.subr.bf16.mxu1 %v6720_v14  ;;  %v6735_v37 = vcombine.low %v860_v24, %v864_v62  ;;  %v6744_v26 = vcombine.high %v868_v20, %v872_v33  ;;  %v849_v46 = vld [vmem:[%s11997_s4 + $0x1a8] sm:$0xff]  ;;  %v900_v56 = vld [vmem:[%s11997_s4 + $0x340] sm:$0xff] }
  0xf1   :  { %v6689_v22 = vcombine.low %v813_v9, %v817_v52  ;;  %v6743_v43 = vcombine.low %v868_v20, %v872_v33  ;;  %v6752_v23 = vcombine.high %v876_v51, %v880_v4  ;;  %v6706_v31 = vcombine.high %v829_v2, %v833_v39  ;;  %v904_v53 = vld [vmem:[%s11997_s4 + $0x360] sm:$0xff]  ;;  %v853_v47 = vld [vmem:[%s11997_s4 + $0x1c8] sm:$0xff] }
  0xf2   :  { %6669 = vmatprep.subr.msk.bf16.mxu0 %vm594_vm15, %v570_v15  ;;  %v608_v59 = vsel %vm594_vm15, %v569_v61, 0  ;;  %v6751_v5 = vcombine.low %v876_v51, %v880_v4  ;;  %v6760_v45 = vcombine.high %v884_v41, %v888_v55  ;;  %v6705_v49 = vcombine.low %v829_v2, %v833_v39  ;;  %v857_v50 = vld [vmem:[%s11997_s4 + $0x1e8] sm:$0xff] }
  0xf3   :  { %702 = vmatpush1.bf16.msra.mxu0 %v608_v59  ;;  %3113 = vmatpush1.bf16.msra.mxu1 %v6719_v10  ;;  %v6714_v60 = vcombine.high %v837_v17, %v841_v30  ;;  %v6759_v11 = vcombine.low %v884_v41, %v888_v55  ;;  %v6768_v48 = vcombine.high %v892_v28, %v896_v58  ;;  %v865_v25 = vld [vmem:[%s11997_s4 + $0x228] sm:$0xff]  ;;  %v912_v10 = vld [vmem:[%s11997_s4 + $0x3a0] sm:$0xff] }
  0xf4   :  { %3229 = vmatprep.subr.bf16.mxu0 %v6674_v3  ;;  %3114 = vmatprep.subr.bf16.mxu1 %v6728_v1  ;;  %v6713_v6 = vcombine.low %v837_v17, %v841_v30  ;;  %v6722_v7 = vcombine.high %v845_v13, %v849_v46  ;;  %v6767_v54 = vcombine.low %v892_v28, %v896_v58  ;;  %v869_v15 = vld [vmem:[%s11997_s4 + $0x248] sm:$0xff]  ;;  %v908_v3 = vld [vmem:[%s11997_s4 + $0x380] sm:$0xff] }
  0xf5   :  { %v6776_v14 = vcombine.high %v900_v56, %v904_v53  ;;  %v6721_v42 = vcombine.low %v845_v13, %v849_v46  ;;  %v6730_v40 = vcombine.high %v853_v47, %v857_v50  ;;  %v6775_v44 = vcombine.low %v900_v56, %v904_v53  ;;  %v873_v61 = vld [vmem:[%s11997_s4 + $0x268] sm:$0xff] }
  0xf6   :  { %6670 = vmatmul.mubr.msk.bf16.vlgmr.msra.gmra.mrb[4].mxu0 %vm12031_vm7, %v8882_v27  ;;  %v825_v27 = vld [vmem:[%s11997_s4 + $0xe8] sm:$0xff]  ;;  %v6729_v36 = vcombine.low %v853_v47, %v857_v50  ;;  %v6738_v63 = vcombine.high %v861_v8, %v865_v25  ;;  %v6737_v19 = vcombine.low %v861_v8, %v865_v25  ;;  %v6784_v21 = vcombine.high %v908_v3, %v912_v10 }
  0xf7   :  { %3230 = vmatpush1.bf16.msra.mxu0 %v6673_v29  ;;  %3115 = vmatpush1.bf16.msra.mxu1 %v6727_v0  ;;  %v6698_v57 = vcombine.high %v821_v38, %v825_v27  ;;  %v6697_v18 = vcombine.low %v821_v38, %v825_v27  ;;  %v6746_v1 = vcombine.high %v869_v15, %v873_v61  ;;  %v877_v24 = vld [vmem:[%s11997_s4 + $0x288] sm:$0xff]  ;;  %v916_v29 = vld [vmem:[%s11997_s4 + $0x3c0] sm:$0xff]  ;;  %vm4090_vm7 = vcmask 916480  }
  0xf8   :  { %3231 = vmatprep.subr.bf16.mxu0 %v6682_v12  ;;  %3116 = vmatprep.subr.bf16.mxu1 %v6736_v35  ;;  %v6783_v59 = vcombine.low %v908_v3, %v912_v10  ;;  %v881_v62 = vld [vmem:[%s11997_s4 + $0x2a8] sm:$0xff]  ;;  %v920_v12 = vld [vmem:[%s11997_s4 + $0x3e0] sm:$0xff]  ;;  %v6745_v0 = vcombine.low %v869_v15, %v873_v61  ;;  %v9338_v13 = vpop.permute.xlu1 %582 }
  0xf9   :  { %v6792_v9 = vcombine.high %v916_v29, %v920_v12  ;;  %v6754_v52 = vcombine.high %v877_v24, %v881_v62  ;;  %v6791_v35 = vcombine.low %v916_v29, %v920_v12  ;;  %v885_v20 = vld [vmem:[%s11997_s4 + $0x2c8] sm:$0xff]  ;;  %v6753_v38 = vcombine.low %v877_v24, %v881_v62  ;;  %v936_v61 = vld [vmem:[%s11997_s4 + $0x460] sm:$0xff] }
  0xfa   :  { %v889_v33 = vld [vmem:[%s11997_s4 + $0x2e8] sm:$0xff]  ;;  %v940_v29 = vld [vmem:[%s11997_s4 + $0x480] sm:$0xff] }
  0xfb   :  { %3232 = vmatpush1.bf16.msra.mxu0 %v6681_v16  ;;  %3117 = vmatpush1.bf16.msra.mxu1 %v6735_v37  ;;  %v9289_v16 = vld [vmem:[%s11997_s4 + $0x400] sm:$0xff]  ;;  %v9299_v37 = vld [vmem:[%s11997_s4 + $0x408] sm:$0xff]  ;;  %v6762_v51 = vcombine.high %v885_v20, %v889_v33  ;;  %v6761_v2 = vcombine.low %v885_v20, %v889_v33 }
  0xfc   :  { %3233 = vmatprep.subr.bf16.mxu0 %v6690_v34  ;;  %3118 = vmatprep.subr.bf16.mxu1 %v6744_v26  ;;  %v9294_v34 = vld [vmem:[%s11997_s4 + $0x420] sm:$0xff]  ;;  %v9306_v26 = vld [vmem:[%s11997_s4 + $0x428] sm:$0xff]  ;;  %v9340_v46 = vpop.permute.xlu0 %577  ;;  %v9342_v56 = vpop.permute.xlu1 %758 }
  0xfd   :  { %v6800_v27 = vcombine.high %v9289_v16, %v9294_v34  ;;  %v6799_v4 = vcombine.low %v9289_v16, %v9294_v34  ;;  %v905_v41 = vld [vmem:[%s11997_s4 + $0x368] sm:$0xff]  ;;  %v944_v12 = vld [vmem:[%s11997_s4 + $0x4a0] sm:$0xff] }
  0xfe   :  { %v921_v28 = vld [vmem:[%s11997_s4 + $0x3e8] sm:$0xff]  ;;  %v6816_v20 = vcombine.high %v940_v29, %v944_v12 }
  0xff   :  { %3234 = vmatpush1.bf16.msra.mxu0 %v6689_v22  ;;  %3119 = vmatpush1.bf16.msra.mxu1 %v6743_v43  ;;  %v6801_v22 = vcombine.low %v9299_v37, %v9306_v26  ;;  %v897_v43 = vld [vmem:[%s11997_s4 + $0x328] sm:$0xff] }
 0x100   :  { %3235 = vmatprep.subr.bf16.mxu0 %v6698_v57  ;;  %3120 = vmatprep.subr.bf16.mxu1 %v6752_v23  ;;  %v893_v57 = vld [vmem:[%s11997_s4 + $0x308] sm:$0xff] }
 0x101   :  { %v6770_v39 = vcombine.high %v893_v57, %v897_v43  ;;  %v901_v23 = vld [vmem:[%s11997_s4 + $0x348] sm:$0xff]  ;;  %v6769_v55 = vcombine.low %v893_v57, %v897_v43  ;;  %v960_v57 = vld [vmem:[%s11997_s4 + $0x520] sm:$0xff] }
 0x102   :  { %v6777_v17 = vcombine.low %v901_v23, %v905_v41  ;;  %v933_v3 = vld [vmem:[%s11997_s4 + $0x448] sm:$0xff] }
 0x103   :  { %3236 = vmatpush1.bf16.msra.mxu0 %v6697_v18  ;;  %3121 = vmatpush1.bf16.msra.mxu1 %v6751_v5  ;;  %v6778_v18 = vcombine.high %v901_v23, %v905_v41  ;;  %v913_v5 = vld [vmem:[%s11997_s4 + $0x3a8] sm:$0xff] }
 0x104   :  { %3237 = vmatprep.subr.bf16.mxu0 %v6706_v31  ;;  %3122 = vmatprep.subr.bf16.mxu1 %v6760_v45  ;;  %v909_v31 = vld [vmem:[%s11997_s4 + $0x388] sm:$0xff] }
 0x105   :  { %v6786_v30 = vcombine.high %v909_v31, %v913_v5  ;;  %v917_v45 = vld [vmem:[%s11997_s4 + $0x3c8] sm:$0xff]  ;;  %v6785_v58 = vcombine.low %v909_v31, %v913_v5  ;;  %v968_v31 = vld [vmem:[%s11997_s4 + $0x560] sm:$0xff] }
 0x106   :  { %v937_v10 = vld [vmem:[%s11997_s4 + $0x468] sm:$0xff] }
 0x107   :  { %3238 = vmatpush1.bf16.msra.mxu0 %v6705_v49  ;;  %3123 = vmatpush1.bf16.msra.mxu1 %v6759_v11  ;;  %v6794_v49 = vcombine.high %v917_v45, %v921_v28  ;;  %v6802_v11 = vcombine.high %v9299_v37, %v9306_v26  ;;  %v6810_v62 = vcombine.high %v933_v3, %v937_v10  ;;  %v949_v16 = vld [vmem:[%s11997_s4 + $0x4c8] sm:$0xff] }
 0x108   :  { %3239 = vmatprep.subr.bf16.mxu0 %v6714_v60  ;;  %3124 = vmatprep.subr.bf16.mxu1 %v6768_v48  ;;  %v6793_v60 = vcombine.low %v917_v45, %v921_v28  ;;  %v953_v34 = vld [vmem:[%s11997_s4 + $0x4e8] sm:$0xff]  ;;  %v6815_v37 = vcombine.low %v940_v29, %v944_v12 }
 0x109   :  { %v957_v43 = vld [vmem:[%s11997_s4 + $0x508] sm:$0xff]  ;;  %v6825_v23 = vcombine.low %v949_v16, %v953_v34 }
 0x10a   :  { %v965_v5 = vld [vmem:[%s11997_s4 + $0x548] sm:$0xff] }
 0x10b   :  { %3240 = vmatpush1.bf16.msra.mxu0 %v6713_v6  ;;  %3125 = vmatpush1.bf16.msra.mxu1 %v6767_v54 }
 0x10c   :  { %3241 = vmatprep.subr.bf16.mxu0 %v6722_v7  ;;  %3126 = vmatprep.subr.bf16.mxu1 %v6776_v14 }
 0x10f   :  { %3242 = vmatpush1.bf16.msra.mxu0 %v6721_v42  ;;  %3127 = vmatpush1.bf16.msra.mxu1 %v6775_v44  ;;  %v9348_v42 = vpop.permute.xlu0 %763 }
 0x110   :  { %3243 = vmatprep.subr.bf16.mxu0 %v6730_v40  ;;  %3128 = vmatprep.subr.bf16.mxu1 %v6784_v21 }
 0x113   :  { %3244 = vmatpush1.bf16.msra.mxu0 %v6729_v36  ;;  %3129 = vmatpush1.bf16.msra.mxu1 %v6783_v59  ;;  %v932_v36 = vld [vmem:[%s11997_s4 + $0x440] sm:$0xff] }
 0x114   :  { %3245 = vmatprep.subr.bf16.mxu0 %v6738_v63  ;;  %3130 = vmatprep.subr.bf16.mxu1 %v6792_v9  ;;  %v6808_v24 = vcombine.high %v932_v36, %v936_v61  ;;  %v945_v9 = vld [vmem:[%s11997_s4 + $0x4a8] sm:$0xff] }
 0x117   :  { %3246 = vmatpush1.bf16.msra.mxu0 %v6737_v19  ;;  %3131 = vmatpush1.bf16.msra.mxu1 %v6791_v35  ;;  %v6809_v35 = vcombine.low %v933_v3, %v937_v10  ;;  %v985_v3 = vld [vmem:[%s11997_s4 + $0x5e8] sm:$0xff] }
 0x118   :  { %3247 = vmatprep.subr.bf16.mxu0 %v6746_v1  ;;  %3143 = vmatprep.subr.bf16.mxu1 %v6800_v27  ;;  %v952_v27 = vld [vmem:[%s11997_s4 + $0x4e0] sm:$0xff] }
 0x11b   :  { %3248 = vmatpush1.bf16.msra.mxu0 %v6745_v0  ;;  %v941_v0 = vld [vmem:[%s11997_s4 + $0x488] sm:$0xff] }
 0x11c   :  { %3249 = vmatprep.subr.bf16.mxu0 %v6754_v52  ;;  %v6807_v52 = vcombine.low %v932_v36, %v936_v61  ;;  %v6818_v33 = vcombine.high %v941_v0, %v945_v9  ;;  %v6817_v26 = vcombine.low %v941_v0, %v945_v9  ;;  %v981_v61 = vld [vmem:[%s11997_s4 + $0x5c8] sm:$0xff]  ;;  %v988_v9 = vld [vmem:[%s11997_s4 + $0x600] sm:$0xff] }
 0x11d   :  { %v6858_v0 = vcombine.high %v981_v61, %v985_v3 }
 0x11f   :  { %3250 = vmatpush1.bf16.msra.mxu0 %v6753_v38  ;;  %v948_v38 = vld [vmem:[%s11997_s4 + $0x4c0] sm:$0xff] }
 0x120   :  { %3251 = vmatprep.subr.bf16.mxu0 %v6762_v51  ;;  %v6824_v51 = vcombine.high %v948_v38, %v952_v27 }
 0x123   :  { %3252 = vmatpush1.bf16.msra.mxu0 %v6761_v2  ;;  %v961_v2 = vld [vmem:[%s11997_s4 + $0x528] sm:$0xff] }
 0x124   :  { %3253 = vmatprep.subr.bf16.mxu0 %v6770_v39  ;;  %v6823_v39 = vcombine.low %v948_v38, %v952_v27  ;;  %v6833_v45 = vcombine.low %v957_v43, %v961_v2  ;;  %v993_v38 = vld [vmem:[%s11997_s4 + $0x628] sm:$0xff] }
 0x127   :  { %3254 = vmatpush1.bf16.msra.mxu0 %v6769_v55  ;;  %v6834_v55 = vcombine.high %v957_v43, %v961_v2  ;;  %v1000_v43 = vld [vmem:[%s11997_s4 + $0x660] sm:$0xff]  ;;  %v997_v2 = vld [vmem:[%s11997_s4 + $0x648] sm:$0xff] }
 0x128   :  { %3255 = vmatprep.subr.bf16.mxu0 %v6778_v18  ;;  %v964_v18 = vld [vmem:[%s11997_s4 + $0x540] sm:$0xff] }
 0x129   :  { %v6840_v28 = vcombine.high %v964_v18, %v968_v31 }
 0x12b   :  { %3256 = vmatpush1.bf16.msra.mxu0 %v6777_v17  ;;  %v969_v17 = vld [vmem:[%s11997_s4 + $0x568] sm:$0xff] }
 0x12c   :  { %3257 = vmatprep.subr.bf16.mxu0 %v6786_v30 }
 0x12f   :  { %3258 = vmatpush1.bf16.msra.mxu0 %v6785_v58  ;;  %v6842_v58 = vcombine.high %v965_v5, %v969_v17 }
 0x130   :  { %3259 = vmatprep.subr.bf16.mxu0 %v6794_v49  ;;  %v972_v49 = vld [vmem:[%s11997_s4 + $0x580] sm:$0xff] }
 0x133   :  { %3260 = vmatpush1.bf16.msra.mxu0 %v6793_v60  ;;  %v976_v60 = vld [vmem:[%s11997_s4 + $0x5a0] sm:$0xff] }
 0x134   :  { %3272 = vmatprep.subr.bf16.mxu0 %v6802_v11  ;;  %v973_v11 = vld [vmem:[%s11997_s4 + $0x588] sm:$0xff] }
 0x191   :  { %v647_v48 = vpop.f32.mrb[0].mxu0 }
 0x192   :  { %v648_v53 = vadd.f32 %v647_v48, %v9340_v46  ;;  %v649_v6 = vpop.f32.mrb[1].mxu0  ;;  %v977_v48 = vld [vmem:[%s11997_s4 + $0x5a8] sm:$0xff] }
 0x193   :  { %v650_v7 = vadd.f32 %v649_v6, %v9340_v46  ;;  %v651_v54 = vpop.f32.mrb[2].mxu0 }
 0x194   :  { %v652_v47 = vadd.f32 %v651_v54, %v9338_v13  ;;  %v766_v50 = vmul.f32 %v9342_v56, %v648_v53  ;;  %v653_v14 = vpop.f32.mrb[3].mxu0  ;;  %vm742_vm9 = vcmp.ge.f32.partialorder %v648_v53, 0.0  ;;  %v6839_v54 = vcombine.low %v964_v18, %v968_v31  ;;  %v1004_v31 = vld [vmem:[%s11997_s4 + $0x680] sm:$0xff] }
 0x195   :  { %v654_v40 = vadd.f32 %v653_v14, %v9338_v13  ;;  %v767_v44 = vmul.f32 %v9342_v56, %v650_v7  ;;  %vm743_vm15 = vcmp.ge.f32.partialorder %v650_v7, 0.0 }
 0x196   :  { %vm748_vm13 = vcmp.ge.f32.partialorder %v652_v47, 0.0  ;;  %v772_v8 = vmul.f32 %v9348_v42, %v652_v47  ;;  %v778_v63 = vsel %vm742_vm9, %v648_v53, %v766_v50  ;;  %vm3732_vm9 = vcmask 965632  }
 0x197   :  { %vm749_vm8 = vcmp.ge.f32.partialorder %v654_v40, 0.0  ;;  %v773_v25 = vmul.f32 %v9348_v42, %v654_v40  ;;  %v779_v21 = vsel %vm743_vm15, %v650_v7, %v767_v44  ;;  %v6850_v44 = vcombine.high %v973_v11, %v977_v48 }
 0x198   :  { %v784_v15 = vsel %vm748_vm13, %v652_v47, %v772_v8  ;;  %v6841_v47 = vcombine.low %v965_v5, %v969_v17  ;;  %v980_v8 = vld [vmem:[%s11997_s4 + $0x5c0] sm:$0xff]  ;;  %v1005_v17 = vld [vmem:[%s11997_s4 + $0x688] sm:$0xff]  ;;  %vm3789_vm15 = vcmask 957440   ;;  %vm3846_vm13 = vcmask 949248  }
 0x199   :  { %v9366_v19 = vpack.c.bf16 %v784_v15, %v778_v63  ;;  %v785_v1 = vsel %vm749_vm8, %v654_v40, %v773_v25  ;;  %v6848_v40 = vcombine.high %v972_v49, %v976_v60  ;;  %v984_v15 = vld [vmem:[%s11997_s4 + $0x5e0] sm:$0xff]  ;;  %vm12032_vm8 = vcmask 875520  }
 0x19a   :  { %v9368_v59 = vpack.c.bf16 %v785_v1, %v779_v21  ;;  %v6847_v1 = vcombine.low %v972_v49, %v976_v60  ;;  %v6856_v12 = vcombine.high %v980_v8, %v984_v15  ;;  %v1008_v5 = vld [vmem:[%s11997_s4 + $0x6a0] sm:$0xff] }
 0x19b   :  { %v1012_v60 = vld [vmem:[%s11997_s4 + $0x6c0] sm:$0xff] }
 0x19c   :  { %3132 = vmatprep.mubr.bf16.mxu1 %v9368_v59  ;;  %3261 = vmatprep.mubr.bf16.mxu0 %v9368_v59 }
 0x19d   :  { %3133 = vmatmul.mubr.bf16.vlgmr.msra.gmra.mrb[4].mxu1 %v9366_v19  ;;  %3262 = vmatmul.mubr.bf16.vlgmr.msra.gmra.mrb[8].mxu0 %v9366_v19 }
 0x19e   :  { %3144 = vmatpush1.bf16.msra.mxu1 %v6799_v4  ;;  %3273 = vmatpush1.bf16.msra.mxu0 %v6801_v22  ;;  %v6826_v4 = vcombine.high %v949_v16, %v953_v34  ;;  %v956_v22 = vld [vmem:[%s11997_s4 + $0x500] sm:$0xff] }
 0x19f   :  { %3145 = vmatprep.subr.bf16.mxu1 %v6808_v24  ;;  %3274 = vmatprep.subr.bf16.mxu0 %v6810_v62  ;;  %v6832_v41 = vcombine.high %v956_v22, %v960_v57  ;;  %v6831_v30 = vcombine.low %v956_v22, %v960_v57  ;;  %v6849_v62 = vcombine.low %v973_v11, %v977_v48  ;;  %v996_v57 = vld [vmem:[%s11997_s4 + $0x640] sm:$0xff]  ;;  %v1013_v48 = vld [vmem:[%s11997_s4 + $0x6c8] sm:$0xff] }
 0x1a0   :  { %v1016_v11 = vld [vmem:[%s11997_s4 + $0x6e0] sm:$0xff] }
 0x1a2   :  { %3146 = vmatpush1.bf16.msra.mxu1 %v6807_v52  ;;  %3275 = vmatpush1.bf16.msra.mxu0 %v6809_v35 }
 0x1a3   :  { %3147 = vmatprep.subr.bf16.mxu1 %v6816_v20  ;;  %3276 = vmatprep.subr.bf16.mxu0 %v6818_v33  ;;  %v992_v20 = vld [vmem:[%s11997_s4 + $0x620] sm:$0xff]  ;;  %v989_v33 = vld [vmem:[%s11997_s4 + $0x608] sm:$0xff] }
 0x1a4   :  { %v6866_v22 = vcombine.high %v989_v33, %v993_v38 }
 0x1a6   :  { %3148 = vmatpush1.bf16.msra.mxu1 %v6815_v37  ;;  %3277 = vmatpush1.bf16.msra.mxu0 %v6817_v26  ;;  %v6855_v26 = vcombine.low %v980_v8, %v984_v15  ;;  %v6887_v8 = vcombine.low %v1012_v60, %v1016_v11  ;;  %v1028_v15 = vld [vmem:[%s11997_s4 + $0x740] sm:$0xff] }
 0x1a7   :  { %3149 = vmatprep.subr.bf16.mxu1 %v6824_v51  ;;  %3278 = vmatprep.subr.bf16.mxu0 %v6826_v4  ;;  %v6857_v51 = vcombine.low %v981_v61, %v985_v3  ;;  %v6864_v4 = vcombine.high %v988_v9, %v992_v20  ;;  %v1032_v61 = vld [vmem:[%s11997_s4 + $0x760] sm:$0xff] }
 0x1aa   :  { %3150 = vmatpush1.bf16.msra.mxu1 %v6823_v39  ;;  %3279 = vmatpush1.bf16.msra.mxu0 %v6825_v23  ;;  %v1001_v39 = vld [vmem:[%s11997_s4 + $0x668] sm:$0xff]  ;;  %v6863_v23 = vcombine.low %v988_v9, %v992_v20  ;;  %v6904_v9 = vcombine.high %v1028_v15, %v1032_v61 }
 0x1ab   :  { %3151 = vmatprep.subr.bf16.mxu1 %v6832_v41  ;;  %3280 = vmatprep.subr.bf16.mxu0 %v6834_v55  ;;  %v6865_v41 = vcombine.low %v989_v33, %v993_v38  ;;  %v6872_v55 = vcombine.high %v996_v57, %v1000_v43  ;;  %v6874_v18 = vcombine.high %v997_v2, %v1001_v39  ;;  %v1036_v38 = vld [vmem:[%s11997_s4 + $0x780] sm:$0xff] }
 0x1ad   :  { %v690_v53 = vpop.f32.mrb[0].mxu1 }
 0x1ae   :  { %v691_v6 = vadd.f32 %v690_v53, %v9340_v46  ;;  %3152 = vmatpush1.bf16.msra.mxu1 %v6831_v30  ;;  %3281 = vmatpush1.bf16.msra.mxu0 %v6833_v45  ;;  %v692_v7 = vpop.f32.mrb[1].mxu1  ;;  %v1009_v30 = vld [vmem:[%s11997_s4 + $0x6a8] sm:$0xff]  ;;  %v6871_v45 = vcombine.low %v996_v57, %v1000_v43 }
 0x1af   :  { %v693_v50 = vadd.f32 %v692_v7, %v9340_v46  ;;  %v694_v14 = vpop.f32.mrb[2].mxu1  ;;  %3153 = vmatprep.subr.bf16.mxu1 %v6840_v28  ;;  %3282 = vmatprep.subr.bf16.mxu0 %v6842_v58  ;;  %v6873_v28 = vcombine.low %v997_v2, %v1001_v39  ;;  %v6880_v58 = vcombine.high %v1004_v31, %v1008_v5  ;;  %v1017_v53 = vld [vmem:[%s11997_s4 + $0x6e8] sm:$0xff] }
 0x1b0   :  { %v768_v25 = vmul.f32 %v9342_v56, %v691_v6  ;;  %v695_v36 = vadd.f32 %v694_v14, %v9338_v13  ;;  %v696_v63 = vpop.f32.mrb[3].mxu1  ;;  %vm744_vm4 = vcmp.ge.f32.partialorder %v691_v6, 0.0  ;;  %v6882_v49 = vcombine.high %v1005_v17, %v1009_v30  ;;  %v1024_v14 = vld [vmem:[%s11997_s4 + $0x720] sm:$0xff] }
 0x1b1   :  { %v769_v10 = vmul.f32 %v9342_v56, %v693_v50  ;;  %v697_v21 = vadd.f32 %v696_v63, %v9338_v13  ;;  %vm745_vm1 = vcmp.ge.f32.partialorder %v693_v50, 0.0  ;;  %v6881_v7 = vcombine.low %v1005_v17, %v1009_v30 }
 0x1b2   :  { %vm750_vm5 = vcmp.ge.f32.partialorder %v695_v36, 0.0  ;;  %v774_v24 = vmul.f32 %v9348_v42, %v695_v36  ;;  %3154 = vmatpush1.bf16.msra.mxu1 %v6839_v54  ;;  %3283 = vmatpush1.bf16.msra.mxu0 %v6841_v47  ;;  %v780_v52 = vsel %vm744_vm4, %v691_v6, %v768_v25  ;;  %v6879_v6 = vcombine.low %v1004_v31, %v1008_v5  ;;  %v1045_v31 = vld [vmem:[%s11997_s4 + $0x7c8] sm:$0xff]  ;;  %vm12033_vm4 = vmmov %vm12032_vm8 }
 0x1b3   :  { %vm751_vm10 = vcmp.ge.f32.partialorder %v697_v21, 0.0  ;;  %v775_v29 = vmul.f32 %v9348_v42, %v697_v21  ;;  %3155 = vmatprep.subr.bf16.mxu1 %v6848_v40  ;;  %3284 = vmatprep.subr.bf16.mxu0 %v6850_v44  ;;  %v781_v27 = vsel %vm745_vm1, %v693_v50, %v769_v10  ;;  %v6888_v54 = vcombine.high %v1012_v60, %v1016_v11  ;;  %v1020_v50 = vld [vmem:[%s11997_s4 + $0x700] sm:$0xff]  ;;  %v1021_v40 = vld [vmem:[%s11997_s4 + $0x708] sm:$0xff]  ;;  %vm12034_vm1 = vmmov %vm12033_vm4 }
 0x1b4   :  { %v786_v35 = vsel %vm750_vm5, %v695_v36, %v774_v24  ;;  %v6890_v47 = vcombine.high %v1013_v48, %v1017_v53  ;;  %v1025_v44 = vld [vmem:[%s11997_s4 + $0x728] sm:$0xff]  ;;  %v6889_v25 = vcombine.low %v1013_v48, %v1017_v53  ;;  %v6896_v36 = vcombine.high %v1020_v50, %v1024_v14  ;;  %v1056_v60 = vld [vmem:[%s11997_s4 + $0x820] sm:$0xff]  ;;  %vm12035_vm5 = vmmov %vm12034_vm1 }
 0x1b5   :  { %v9474_v16 = vpack.c.bf16 %v786_v35, %v780_v52  ;;  %v787_v34 = vsel %vm751_vm10, %v697_v21, %v775_v29  ;;  %v6898_v63 = vcombine.high %v1021_v40, %v1025_v44  ;;  %v1029_v10 = vld [vmem:[%s11997_s4 + $0x748] sm:$0xff]  ;;  %vm12036_vm10 = vmmov %vm12034_vm1 }
 0x1b6   :  { %v9476_v37 = vpack.c.bf16 %v787_v34, %v781_v27  ;;  %3156 = vmatpush1.bf16.msra.mxu1 %v6847_v1  ;;  %3285 = vmatpush1.bf16.msra.mxu0 %v6849_v62  ;;  %v1033_v21 = vld [vmem:[%s11997_s4 + $0x768] sm:$0xff]  ;;  %v6895_v62 = vcombine.low %v1020_v50, %v1024_v14  ;;  %v1040_v27 = vld [vmem:[%s11997_s4 + $0x7a0] sm:$0xff] }
 0x1b7   :  { %3157 = vmatprep.subr.bf16.mxu1 %v6856_v12  ;;  %3286 = vmatprep.subr.bf16.mxu0 %v6858_v0  ;;  %v6897_v0 = vcombine.low %v1021_v40, %v1025_v44  ;;  %v6906_v33 = vcombine.high %v1029_v10, %v1033_v21  ;;  %v1049_v5 = vld [vmem:[%s11997_s4 + $0x7e8] sm:$0xff]  ;;  %v6911_v30 = vcombine.low %v1036_v38, %v1040_v27  ;;  %v1064_v50 = vld [vmem:[%s11997_s4 + $0x860] sm:$0xff] }
 0x1b8   :  { %3175 = vmatprep.mubr.bf16.mxu1 %v9476_v37  ;;  %3304 = vmatprep.mubr.bf16.mxu0 %v9476_v37  ;;  %v1053_v11 = vld [vmem:[%s11997_s4 + $0x808] sm:$0xff] }
 0x1b9   :  { %v1057_v48 = vld [vmem:[%s11997_s4 + $0x828] sm:$0xff] }
 0x1ba   :  { %3158 = vmatpush1.bf16.msra.mxu1 %v6855_v26  ;;  %3287 = vmatpush1.bf16.msra.mxu0 %v6857_v51  ;;  %v1037_v26 = vld [vmem:[%s11997_s4 + $0x788] sm:$0xff] }
 0x1bb   :  { %3159 = vmatprep.subr.bf16.mxu1 %v6864_v4  ;;  %3288 = vmatprep.subr.bf16.mxu0 %v6866_v22  ;;  %v1041_v51 = vld [vmem:[%s11997_s4 + $0x7a8] sm:$0xff]  ;;  %v6903_v22 = vcombine.low %v1028_v15, %v1032_v61  ;;  %v1072_v15 = vld [vmem:[%s11997_s4 + $0x8a0] sm:$0xff] }
 0x1bc   :  { %v6914_v39 = vcombine.high %v1037_v26, %v1041_v51  ;;  %v1061_v14 = vld [vmem:[%s11997_s4 + $0x848] sm:$0xff] }
 0x1bd   :  { %v1065_v40 = vld [vmem:[%s11997_s4 + $0x868] sm:$0xff] }
 0x1be   :  { %3160 = vmatpush1.bf16.msra.mxu1 %v6863_v23  ;;  %3289 = vmatpush1.bf16.msra.mxu0 %v6865_v41  ;;  %v1044_v23 = vld [vmem:[%s11997_s4 + $0x7c0] sm:$0xff]  ;;  %v1069_v61 = vld [vmem:[%s11997_s4 + $0x888] sm:$0xff] }
 0x1bf   :  { %3161 = vmatprep.subr.bf16.mxu1 %v6872_v55  ;;  %3290 = vmatprep.subr.bf16.mxu0 %v6874_v18 }
 0x1c2   :  { %3162 = vmatpush1.bf16.msra.mxu1 %v6871_v45  ;;  %3291 = vmatpush1.bf16.msra.mxu0 %v6873_v28  ;;  %v6913_v45 = vcombine.low %v1037_v26, %v1041_v51 }
 0x1c3   :  { %3163 = vmatprep.subr.bf16.mxu1 %v6880_v58  ;;  %3292 = vmatprep.subr.bf16.mxu0 %v6882_v49  ;;  %v6922_v58 = vcombine.high %v1045_v31, %v1049_v5  ;;  %v1052_v49 = vld [vmem:[%s11997_s4 + $0x800] sm:$0xff] }
 0x1c4   :  { %v6927_v44 = vcombine.low %v1052_v49, %v1056_v60 }
 0x1c6   :  { %3164 = vmatpush1.bf16.msra.mxu1 %v6879_v6  ;;  %3293 = vmatpush1.bf16.msra.mxu0 %v6881_v7  ;;  %v6921_v6 = vcombine.low %v1045_v31, %v1049_v5  ;;  %v6928_v7 = vcombine.high %v1052_v49, %v1056_v60  ;;  %v1105_v31 = vld [vmem:[%s11997_s4 + $0x9a8] sm:$0xff]  ;;  %v1112_v49 = vld [vmem:[%s11997_s4 + $0x9e0] sm:$0xff] }
 0x1c7   :  { %3165 = vmatprep.subr.bf16.mxu1 %v6888_v54  ;;  %3294 = vmatprep.subr.bf16.mxu0 %v6890_v47  ;;  %v6930_v54 = vcombine.high %v1053_v11, %v1057_v48  ;;  %v1060_v47 = vld [vmem:[%s11997_s4 + $0x840] sm:$0xff]  ;;  %v1109_v60 = vld [vmem:[%s11997_s4 + $0x9c8] sm:$0xff] }
 0x1c9   :  { %v733_v3 = vpop.f32.mrb[4].mxu0 }
 0x1ca   :  { %v734_v1 = vadd.f32 %v733_v3, %v9340_v46  ;;  %v735_v24 = vpop.f32.mrb[5].mxu0  ;;  %3166 = vmatpush1.bf16.msra.mxu1 %v6887_v8  ;;  %3295 = vmatpush1.bf16.msra.mxu0 %v6889_v25  ;;  %v6929_v8 = vcombine.low %v1053_v11, %v1057_v48  ;;  %v6936_v25 = vcombine.high %v1060_v47, %v1064_v50  ;;  %v1073_v3 = vld [vmem:[%s11997_s4 + $0x8a8] sm:$0xff] }
 0x1cb   :  { %v736_v29 = vadd.f32 %v735_v24, %v9340_v46  ;;  %v737_v12 = vpop.f32.mrb[6].mxu0  ;;  %3167 = vmatprep.subr.bf16.mxu1 %v6896_v36  ;;  %3296 = vmatprep.subr.bf16.mxu0 %v6898_v63  ;;  %v6938_v36 = vcombine.high %v1061_v14, %v1065_v40  ;;  %v1068_v63 = vld [vmem:[%s11997_s4 + $0x880] sm:$0xff]  ;;  %v6946_v24 = vcombine.high %v1069_v61, %v1073_v3  ;;  %v1113_v11 = vld [vmem:[%s11997_s4 + $0x9e8] sm:$0xff] }
 0x1cc   :  { %v770_v52 = vmul.f32 %v9342_v56, %v734_v1  ;;  %v738_v35 = vadd.f32 %v737_v12, %v9338_v13  ;;  %v739_v20 = vpop.f32.mrb[7].mxu0  ;;  %vm746_vm11 = vcmp.ge.f32.partialorder %v734_v1, 0.0  ;;  %v1077_v12 = vld [vmem:[%s11997_s4 + $0x8c8] sm:$0xff] }
 0x1cd   :  { %v771_v46 = vmul.f32 %v9342_v56, %v736_v29  ;;  %v740_v34 = vadd.f32 %v739_v20, %v9338_v13  ;;  %vm747_vm12 = vcmp.ge.f32.partialorder %v736_v29, 0.0  ;;  %v6905_v56 = vcombine.low %v1029_v10, %v1033_v21 }
 0x1ce   :  { %vm752_vm6 = vcmp.ge.f32.partialorder %v738_v35, 0.0  ;;  %v776_v4 = vmul.f32 %v9348_v42, %v738_v35  ;;  %3168 = vmatpush1.bf16.msra.mxu1 %v6895_v62  ;;  %3297 = vmatpush1.bf16.msra.mxu0 %v6897_v0  ;;  %v6912_v13 = vcombine.high %v1036_v38, %v1040_v27  ;;  %v782_v43 = vsel %vm746_vm11, %v734_v1, %v770_v52  ;;  %v1076_v62 = vld [vmem:[%s11997_s4 + $0x8c0] sm:$0xff]  ;;  %v1081_v0 = vld [vmem:[%s11997_s4 + $0x8e8] sm:$0xff]  ;;  %vm12037_vm11 = vmmov %vm12034_vm1 }
 0x1cf   :  { %vm753_vm14 = vcmp.ge.f32.partialorder %v740_v34, 0.0  ;;  %v777_v57 = vmul.f32 %v9348_v42, %v740_v34  ;;  %3169 = vmatprep.subr.bf16.mxu1 %v6904_v9  ;;  %3298 = vmatprep.subr.bf16.mxu0 %v6906_v33  ;;  %v783_v41 = vsel %vm747_vm12, %v736_v29, %v771_v46  ;;  %v1048_v42 = vld [vmem:[%s11997_s4 + $0x7e0] sm:$0xff]  ;;  %v6935_v10 = vcombine.low %v1060_v47, %v1064_v50  ;;  %v1085_v27 = vld [vmem:[%s11997_s4 + $0x908] sm:$0xff]  ;;  %vm12038_vm12 = vmmov %vm12034_vm1 }
 0x1d0   :  { %v788_v2 = vsel %vm752_vm6, %v738_v35, %v776_v4  ;;  %v6920_v28 = vcombine.high %v1044_v23, %v1048_v42  ;;  %v6919_v53 = vcombine.low %v1044_v23, %v1048_v42  ;;  %v6937_v21 = vcombine.low %v1061_v14, %v1065_v40  ;;  %v1080_v29 = vld [vmem:[%s11997_s4 + $0x8e0] sm:$0xff]  ;;  %v1089_v46 = vld [vmem:[%s11997_s4 + $0x928] sm:$0xff]  ;;  %vm12039_vm6 = vmmov %vm12034_vm1 }
 0x1d1   :  { %v9564_v55 = vpack.c.bf16 %v788_v2, %v782_v43  ;;  %v789_v18 = vsel %vm753_vm14, %v740_v34, %v777_v57  ;;  %v6944_v1 = vcombine.high %v1068_v63, %v1072_v15  ;;  %v6943_v9 = vcombine.low %v1068_v63, %v1072_v15  ;;  %v1084_v33 = vld [vmem:[%s11997_s4 + $0x900] sm:$0xff]  ;;  %v1101_v42 = vld [vmem:[%s11997_s4 + $0x988] sm:$0xff] }
 0x1d2   :  { %v9575_v17 = vpack.c.bf16 %v789_v18, %v783_v41  ;;  %3170 = vmatpush1.bf16.msra.mxu1 %v6903_v22  ;;  %3299 = vmatpush1.bf16.msra.mxu0 %v6905_v56  ;;  %v6945_v52 = vcombine.low %v1069_v61, %v1073_v3  ;;  %v6952_v35 = vcombine.high %v1076_v62, %v1080_v29  ;;  %v1088_v38 = vld [vmem:[%s11997_s4 + $0x920] sm:$0xff]  ;;  %v1093_v56 = vld [vmem:[%s11997_s4 + $0x948] sm:$0xff]  ;;  %vm12040_vm14 = vcmask 867328  }
 0x1d3   :  { %3171 = vmatprep.subr.bf16.mxu1 %v6912_v13  ;;  %3300 = vmatprep.subr.bf16.mxu0 %v6914_v39  ;;  %v6954_v20 = vcombine.high %v1077_v12, %v1081_v0  ;;  %v6951_v34 = vcombine.low %v1076_v62, %v1080_v29  ;;  %v6953_v26 = vcombine.low %v1077_v12, %v1081_v0  ;;  %v1092_v22 = vld [vmem:[%s11997_s4 + $0x940] sm:$0xff]  ;;  %v1097_v13 = vld [vmem:[%s11997_s4 + $0x968] sm:$0xff] }
 0x1d4   :  { %v6960_v51 = vcombine.high %v1084_v33, %v1088_v38  ;;  %v6962_v4 = vcombine.high %v1085_v27, %v1089_v46  ;;  %v1096_v57 = vld [vmem:[%s11997_s4 + $0x960] sm:$0xff]  ;;  %v6959_v43 = vcombine.low %v1084_v33, %v1088_v38  ;;  %v6961_v2 = vcombine.low %v1085_v27, %v1089_v46  ;;  %v1117_v50 = vld [vmem:[%s11997_s4 + $0xa08] sm:$0xff] }
 0x1d5   :  { %v6968_v39 = vcombine.high %v1092_v22, %v1096_v57  ;;  %v6970_v23 = vcombine.high %v1093_v56, %v1097_v13  ;;  %v1100_v41 = vld [vmem:[%s11997_s4 + $0x980] sm:$0xff]  ;;  %v6967_v5 = vcombine.low %v1092_v22, %v1096_v57  ;;  %v1121_v14 = vld [vmem:[%s11997_s4 + $0xa28] sm:$0xff] }
 0x1d6   :  { %3172 = vmatpush1.bf16.msra.mxu1 %v6911_v30  ;;  %3301 = vmatpush1.bf16.msra.mxu0 %v6913_v45  ;;  %v1104_v18 = vld [vmem:[%s11997_s4 + $0x9a0] sm:$0xff]  ;;  %v6969_v30 = vcombine.low %v1093_v56, %v1097_v13  ;;  %v1125_v15 = vld [vmem:[%s11997_s4 + $0xa48] sm:$0xff] }
 0x1d7   :  { %3173 = vmatprep.subr.bf16.mxu1 %v6920_v28  ;;  %3302 = vmatprep.subr.bf16.mxu0 %v6922_v58  ;;  %v6976_v45 = vcombine.high %v1100_v41, %v1104_v18  ;;  %v6978_v28 = vcombine.high %v1101_v42, %v1105_v31  ;;  %v1108_v58 = vld [vmem:[%s11997_s4 + $0x9c0] sm:$0xff]  ;;  %v6975_v48 = vcombine.low %v1100_v41, %v1104_v18  ;;  %v1129_v61 = vld [vmem:[%s11997_s4 + $0xa68] sm:$0xff] }
 0x1d8   :  { %v1120_v47 = vld [vmem:[%s11997_s4 + $0xa20] sm:$0xff]  ;;  %v6983_v40 = vcombine.low %v1108_v58, %v1112_v49  ;;  %v1133_v29 = vld [vmem:[%s11997_s4 + $0xa88] sm:$0xff] }
 0x1d9   :  { %v1128_v63 = vld [vmem:[%s11997_s4 + $0xa60] sm:$0xff]  ;;  %v1137_v12 = vld [vmem:[%s11997_s4 + $0xaa8] sm:$0xff] }
 0x1da   :  { %3174 = vmatpush1.bf16.msra.mxu1 %v6919_v53  ;;  %3303 = vmatpush1.bf16.msra.mxu0 %v6921_v6  ;;  %v6977_v53 = vcombine.low %v1101_v42, %v1105_v31  ;;  %v6984_v6 = vcombine.high %v1108_v58, %v1112_v49  ;;  %v1136_v62 = vld [vmem:[%s11997_s4 + $0xaa0] sm:$0xff]  ;;  %v1141_v38 = vld [vmem:[%s11997_s4 + $0xac8] sm:$0xff] }
 0x1db   :  { %3186 = vmatprep.subr.bf16.mxu1 %v6928_v7  ;;  %3315 = vmatprep.subr.bf16.mxu0 %v6930_v54  ;;  %v6986_v7 = vcombine.high %v1109_v60, %v1113_v11  ;;  %v1116_v54 = vld [vmem:[%s11997_s4 + $0xa00] sm:$0xff]  ;;  %v1145_v27 = vld [vmem:[%s11997_s4 + $0xae8] sm:$0xff] }
 0x1dc   :  { %v6991_v3 = vcombine.low %v1116_v54, %v1120_v47  ;;  %v1144_v33 = vld [vmem:[%s11997_s4 + $0xae0] sm:$0xff]  ;;  %v1149_v57 = vld [vmem:[%s11997_s4 + $0xb08] sm:$0xff] }
 0x1dd   :  { %3176 = vmatmul.mubr.bf16.vlgmr.msra.gmra.mrb[4].mxu1 %v9474_v16  ;;  %3305 = vmatmul.mubr.bf16.vlgmr.msra.gmra.mrb[8].mxu0 %v9474_v16  ;;  %v1152_v22 = vld [vmem:[%s11997_s4 + $0xb20] sm:$0xff]  ;;  %v1153_v56 = vld [vmem:[%s11997_s4 + $0xb28] sm:$0xff] }
 0x1de   :  { %3187 = vmatpush1.bf16.msra.mxu1 %v6927_v44  ;;  %3218 = vmatprep.mubr.bf16.mxu1 %v9575_v17  ;;  %v6985_v44 = vcombine.low %v1109_v60, %v1113_v11  ;;  %v1160_v41 = vld [vmem:[%s11997_s4 + $0xb60] sm:$0xff]  ;;  %v1157_v18 = vld [vmem:[%s11997_s4 + $0xb48] sm:$0xff] }
 0x1df   :  { %3316 = vmatpush1.bf16.msra.mxu0 %v6929_v8  ;;  %3347 = vmatprep.mubr.bf16.mxu0 %v9575_v17  ;;  %v6992_v8 = vcombine.high %v1116_v54, %v1120_v47  ;;  %v1161_v42 = vld [vmem:[%s11997_s4 + $0xb68] sm:$0xff]  ;;  %v1168_v58 = vld [vmem:[%s11997_s4 + $0xba0] sm:$0xff] }
 0x1e0   :  { %3188 = vmatprep.subr.bf16.mxu1 %v6936_v25  ;;  %3317 = vmatprep.subr.bf16.mxu0 %v6938_v36  ;;  %v6994_v25 = vcombine.high %v1117_v50, %v1121_v14  ;;  %v1124_v36 = vld [vmem:[%s11997_s4 + $0xa40] sm:$0xff]  ;;  %v1165_v49 = vld [vmem:[%s11997_s4 + $0xb88] sm:$0xff] }
 0x1e1   :  { %v6999_v0 = vcombine.low %v1124_v36, %v1128_v63  ;;  %v1169_v60 = vld [vmem:[%s11997_s4 + $0xba8] sm:$0xff]  ;;  %v1176_v54 = vld [vmem:[%s11997_s4 + $0xbe0] sm:$0xff] }
 0x1e2   :  { %3189 = vmatpush1.bf16.msra.mxu1 %v6935_v10  ;;  %v6993_v10 = vcombine.low %v1117_v50, %v1121_v14  ;;  %v1173_v47 = vld [vmem:[%s11997_s4 + $0xbc8] sm:$0xff] }
 0x1e3   :  { %3318 = vmatpush1.bf16.msra.mxu0 %v6937_v21  ;;  %3190 = vmatprep.subr.bf16.mxu1 %v6944_v1  ;;  %v7000_v21 = vcombine.high %v1124_v36, %v1128_v63  ;;  %v7002_v1 = vcombine.high %v1125_v15, %v1129_v61  ;;  %v1177_v50 = vld [vmem:[%s11997_s4 + $0xbe8] sm:$0xff]  ;;  %v802_v36 = vld [vmem:[%s11997_s4 + $0x30] sm:$0xff]  ;;  %v799_v63 = vld [vmem:[%s11997_s4 + $0x18] sm:$0xff] }
 0x1e4   :  { %3319 = vmatprep.subr.bf16.mxu0 %v6946_v24  ;;  %v1132_v24 = vld [vmem:[%s11997_s4 + $0xa80] sm:$0xff] }
 0x1e5   :  { %v7007_v46 = vcombine.low %v1132_v24, %v1136_v62 }
 0x1e6   :  { %3191 = vmatpush1.bf16.msra.mxu1 %v6943_v9  ;;  %v7001_v9 = vcombine.low %v1125_v15, %v1129_v61  ;;  %v803_v15 = vld [vmem:[%s11997_s4 + $0x38] sm:$0xff] }
 0x1e7   :  { %3320 = vmatpush1.bf16.msra.mxu0 %v6945_v52  ;;  %3192 = vmatprep.subr.bf16.mxu1 %v6952_v35  ;;  %v7008_v52 = vcombine.high %v1132_v24, %v1136_v62  ;;  %v7010_v35 = vcombine.high %v1133_v29, %v1137_v12  ;;  %v810_v24 = vld [vmem:[%s11997_s4 + $0x70] sm:$0xff] }
 0x1e8   :  { %3321 = vmatprep.subr.bf16.mxu0 %v6954_v20  ;;  %v1140_v20 = vld [vmem:[%s11997_s4 + $0xac0] sm:$0xff] }
 0x1e9   :  { %v7015_v13 = vcombine.low %v1140_v20, %v1144_v33 }
 0x1ea   :  { %3193 = vmatpush1.bf16.msra.mxu1 %v6951_v34  ;;  %v7009_v34 = vcombine.low %v1133_v29, %v1137_v12  ;;  %v807_v29 = vld [vmem:[%s11997_s4 + $0x58] sm:$0xff] }
 0x1eb   :  { %3322 = vmatpush1.bf16.msra.mxu0 %v6953_v26  ;;  %3194 = vmatprep.subr.bf16.mxu1 %v6960_v51  ;;  %v7016_v26 = vcombine.high %v1140_v20, %v1144_v33  ;;  %v7018_v51 = vcombine.high %v1141_v38, %v1145_v27  ;;  %v811_v12 = vld [vmem:[%s11997_s4 + $0x78] sm:$0xff] }
 0x1ec   :  { %3323 = vmatprep.subr.bf16.mxu0 %v6962_v4  ;;  %v1148_v4 = vld [vmem:[%s11997_s4 + $0xb00] sm:$0xff]  ;;  %v6686_v20 = vcombine.high %v807_v29, %v811_v12  ;;  %v815_v33 = vld [vmem:[%s11997_s4 + $0x98] sm:$0xff] }
 0x1ed   :  { %v7023_v31 = vcombine.low %v1148_v4, %v1152_v22 }
 0x1ee   :  { %3195 = vmatpush1.bf16.msra.mxu1 %v6959_v43  ;;  %v7017_v43 = vcombine.low %v1141_v38, %v1145_v27  ;;  %v819_v38 = vld [vmem:[%s11997_s4 + $0xb8] sm:$0xff] }
 0x1ef   :  { %3324 = vmatpush1.bf16.msra.mxu0 %v6961_v2  ;;  %3196 = vmatprep.subr.bf16.mxu1 %v6968_v39  ;;  %v7024_v2 = vcombine.high %v1148_v4, %v1152_v22  ;;  %v7026_v39 = vcombine.high %v1149_v57, %v1153_v56  ;;  %v826_v4 = vld [vmem:[%s11997_s4 + $0xf0] sm:$0xff]  ;;  %v823_v22 = vld [vmem:[%s11997_s4 + $0xd8] sm:$0xff] }
 0x1f0   :  { %3325 = vmatprep.subr.bf16.mxu0 %v6970_v23  ;;  %v1156_v23 = vld [vmem:[%s11997_s4 + $0xb40] sm:$0xff] }
 0x1f1   :  { %v7031_v11 = vcombine.low %v1156_v23, %v1160_v41 }
 0x1f2   :  { %3197 = vmatpush1.bf16.msra.mxu1 %v6967_v5  ;;  %v7025_v5 = vcombine.low %v1149_v57, %v1153_v56  ;;  %v827_v57 = vld [vmem:[%s11997_s4 + $0xf8] sm:$0xff]  ;;  %v6693_v56 = vcombine.low %v815_v33, %v819_v38 }
 0x1f3   :  { %3326 = vmatpush1.bf16.msra.mxu0 %v6969_v30  ;;  %3198 = vmatprep.subr.bf16.mxu1 %v6976_v45  ;;  %v7032_v30 = vcombine.high %v1156_v23, %v1160_v41  ;;  %v7034_v45 = vcombine.high %v1157_v18, %v1161_v42  ;;  %v831_v23 = vld [vmem:[%s11997_s4 + $0x118] sm:$0xff] }
 0x1f4   :  { %3327 = vmatprep.subr.bf16.mxu0 %v6978_v28  ;;  %v1164_v28 = vld [vmem:[%s11997_s4 + $0xb80] sm:$0xff]  ;;  %v835_v41 = vld [vmem:[%s11997_s4 + $0x138] sm:$0xff] }
 0x1f5   :  { %v7039_v14 = vcombine.low %v1164_v28, %v1168_v58 }
 0x1f6   :  { %3199 = vmatpush1.bf16.msra.mxu1 %v6975_v48  ;;  %v7033_v48 = vcombine.low %v1157_v18, %v1161_v42  ;;  %v6701_v42 = vcombine.low %v823_v22, %v827_v57 }
 0x1f7   :  { %3328 = vmatpush1.bf16.msra.mxu0 %v6977_v53  ;;  %3200 = vmatprep.subr.bf16.mxu1 %v6984_v6  ;;  %v7040_v53 = vcombine.high %v1164_v28, %v1168_v58  ;;  %v7042_v6 = vcombine.high %v1165_v49, %v1169_v60  ;;  %v839_v28 = vld [vmem:[%s11997_s4 + $0x158] sm:$0xff] }
 0x1f8   :  { %3329 = vmatprep.subr.bf16.mxu0 %v6986_v7  ;;  %v1172_v7 = vld [vmem:[%s11997_s4 + $0xbc0] sm:$0xff]  ;;  %v843_v58 = vld [vmem:[%s11997_s4 + $0x178] sm:$0xff] }
 0x1f9   :  { %v7047_v61 = vcombine.low %v1172_v7, %v1176_v54 }
 0x1fa   :  { %3201 = vmatpush1.bf16.msra.mxu1 %v6983_v40  ;;  %v7041_v40 = vcombine.low %v1165_v49, %v1169_v60  ;;  %v6709_v60 = vcombine.low %v831_v23, %v835_v41 }
 0x1fb   :  { %3330 = vmatpush1.bf16.msra.mxu0 %v6985_v44  ;;  %3202 = vmatprep.subr.bf16.mxu1 %v6992_v8  ;;  %v7048_v44 = vcombine.high %v1172_v7, %v1176_v54  ;;  %v7050_v8 = vcombine.high %v1173_v47, %v1177_v50  ;;  %v847_v7 = vld [vmem:[%s11997_s4 + $0x198] sm:$0xff] }
 0x1fc   :  { %3331 = vmatprep.subr.bf16.mxu0 %v6994_v25  ;;  %v798_v25 = vld [vmem:[%s11997_s4 + $0x10] sm:$0xff]  ;;  %v851_v54 = vld [vmem:[%s11997_s4 + $0x1b8] sm:$0xff] }
 0x1fd   :  { %v6675_v62 = vcombine.low %v798_v25, %v802_v36 }
 0x1fe   :  { %3203 = vmatpush1.bf16.msra.mxu1 %v6991_v3  ;;  %v7049_v3 = vcombine.low %v1173_v47, %v1177_v50  ;;  %v6717_v50 = vcombine.low %v839_v28, %v843_v58 }
 0x1ff   :  { %3332 = vmatpush1.bf16.msra.mxu0 %v6993_v10  ;;  %3204 = vmatprep.subr.bf16.mxu1 %v7000_v21  ;;  %v6676_v10 = vcombine.high %v798_v25, %v802_v36  ;;  %v6678_v21 = vcombine.high %v799_v63, %v803_v15  ;;  %v855_v25 = vld [vmem:[%s11997_s4 + $0x1d8] sm:$0xff] }
 0x200   :  { %3333 = vmatprep.subr.bf16.mxu0 %v7002_v1  ;;  %v806_v1 = vld [vmem:[%s11997_s4 + $0x50] sm:$0xff]  ;;  %v859_v36 = vld [vmem:[%s11997_s4 + $0x1f8] sm:$0xff] }
 0x201   :  { %v6683_v27 = vcombine.low %v806_v1, %v810_v24 }
 0x202   :  { %3205 = vmatpush1.bf16.msra.mxu1 %v6999_v0  ;;  %v6677_v0 = vcombine.low %v799_v63, %v803_v15  ;;  %v6725_v15 = vcombine.low %v847_v7, %v851_v54 }
 0x203   :  { %3334 = vmatpush1.bf16.msra.mxu0 %v7001_v9  ;;  %3206 = vmatprep.subr.bf16.mxu1 %v7008_v52  ;;  %v6684_v9 = vcombine.high %v806_v1, %v810_v24  ;;  %v814_v52 = vld [vmem:[%s11997_s4 + $0x90] sm:$0xff]  ;;  %v863_v1 = vld [vmem:[%s11997_s4 + $0x218] sm:$0xff] }
 0x204   :  { %3335 = vmatprep.subr.bf16.mxu0 %v7010_v35  ;;  %v818_v35 = vld [vmem:[%s11997_s4 + $0xb0] sm:$0xff]  ;;  %v867_v24 = vld [vmem:[%s11997_s4 + $0x238] sm:$0xff] }
 0x206   :  { %3207 = vmatpush1.bf16.msra.mxu1 %v7007_v46  ;;  %v6685_v46 = vcombine.low %v807_v29, %v811_v12  ;;  %v6733_v29 = vcombine.low %v855_v25, %v859_v36 }
 0x207   :  { %3336 = vmatpush1.bf16.msra.mxu0 %v7009_v34  ;;  %3208 = vmatprep.subr.bf16.mxu1 %v7016_v26  ;;  %v6692_v34 = vcombine.high %v814_v52, %v818_v35  ;;  %v6694_v26 = vcombine.high %v815_v33, %v819_v38  ;;  %v6741_v38 = vcombine.low %v863_v1, %v867_v24 }
 0x208   :  { %3337 = vmatprep.subr.bf16.mxu0 %v7018_v51  ;;  %v822_v51 = vld [vmem:[%s11997_s4 + $0xd0] sm:$0xff] }
 0x209   :  { %v6699_v18 = vcombine.low %v822_v51, %v826_v4 }
 0x20a   :  { %3209 = vmatpush1.bf16.msra.mxu1 %v7015_v13  ;;  %v6700_v13 = vcombine.high %v822_v51, %v826_v4  ;;  %v879_v51 = vld [vmem:[%s11997_s4 + $0x298] sm:$0xff] }
 0x20b   :  { %3338 = vmatpush1.bf16.msra.mxu0 %v7017_v43  ;;  %3210 = vmatprep.subr.bf16.mxu1 %v7024_v2  ;;  %v6702_v43 = vcombine.high %v823_v22, %v827_v57  ;;  %v830_v2 = vld [vmem:[%s11997_s4 + $0x110] sm:$0xff]  ;;  %v883_v4 = vld [vmem:[%s11997_s4 + $0x2b8] sm:$0xff] }
 0x20c   :  { %3339 = vmatprep.subr.bf16.mxu0 %v7026_v39  ;;  %v834_v39 = vld [vmem:[%s11997_s4 + $0x130] sm:$0xff] }
 0x20d   :  { %v6707_v49 = vcombine.low %v830_v2, %v834_v39 }
 0x20e   :  { %3211 = vmatpush1.bf16.msra.mxu1 %v7023_v31  ;;  %v6708_v31 = vcombine.high %v830_v2, %v834_v39  ;;  %v887_v2 = vld [vmem:[%s11997_s4 + $0x2d8] sm:$0xff] }
 0x20f   :  { %3340 = vmatpush1.bf16.msra.mxu0 %v7025_v5  ;;  %3212 = vmatprep.subr.bf16.mxu1 %v7032_v30  ;;  %v6710_v5 = vcombine.high %v831_v23, %v835_v41  ;;  %v838_v30 = vld [vmem:[%s11997_s4 + $0x150] sm:$0xff]  ;;  %v891_v39 = vld [vmem:[%s11997_s4 + $0x2f8] sm:$0xff]  ;;  %v6757_v41 = vcombine.low %v879_v51, %v883_v4 }
 0x210   :  { %3341 = vmatprep.subr.bf16.mxu0 %v7034_v45  ;;  %v842_v45 = vld [vmem:[%s11997_s4 + $0x170] sm:$0xff] }
 0x211   :  { %v6715_v47 = vcombine.low %v838_v30, %v842_v45 }
 0x212   :  { %3213 = vmatpush1.bf16.msra.mxu1 %v7031_v11  ;;  %v6716_v11 = vcombine.high %v838_v30, %v842_v45  ;;  %v895_v30 = vld [vmem:[%s11997_s4 + $0x318] sm:$0xff] }
 0x213   :  { %3342 = vmatpush1.bf16.msra.mxu0 %v7033_v48  ;;  %3214 = vmatprep.subr.bf16.mxu1 %v7040_v53  ;;  %v6718_v48 = vcombine.high %v839_v28, %v843_v58  ;;  %v846_v53 = vld [vmem:[%s11997_s4 + $0x190] sm:$0xff]  ;;  %v899_v45 = vld [vmem:[%s11997_s4 + $0x338] sm:$0xff]  ;;  %v6765_v58 = vcombine.low %v887_v2, %v891_v39 }
 0x214   :  { %3343 = vmatprep.subr.bf16.mxu0 %v7042_v6  ;;  %v850_v6 = vld [vmem:[%s11997_s4 + $0x1b0] sm:$0xff] }
 0x215   :  { %v6723_v63 = vcombine.low %v846_v53, %v850_v6 }
 0x216   :  { %3215 = vmatpush1.bf16.msra.mxu1 %v7039_v14  ;;  %v6724_v14 = vcombine.high %v846_v53, %v850_v6  ;;  %v903_v53 = vld [vmem:[%s11997_s4 + $0x358] sm:$0xff] }
 0x217   :  { %3344 = vmatpush1.bf16.msra.mxu0 %v7041_v40  ;;  %3216 = vmatprep.subr.bf16.mxu1 %v7048_v44  ;;  %v6726_v40 = vcombine.high %v847_v7, %v851_v54  ;;  %v854_v44 = vld [vmem:[%s11997_s4 + $0x1d0] sm:$0xff]  ;;  %v907_v6 = vld [vmem:[%s11997_s4 + $0x378] sm:$0xff]  ;;  %v6773_v54 = vcombine.low %v895_v30, %v899_v45 }
 0x218   :  { %3345 = vmatprep.subr.bf16.mxu0 %v7050_v8  ;;  %v858_v8 = vld [vmem:[%s11997_s4 + $0x1f0] sm:$0xff] }
 0x21a   :  { %3217 = vmatpush1.bf16.msra.mxu1 %v7047_v61  ;;  %v6732_v61 = vcombine.high %v854_v44, %v858_v8 }
 0x21b   :  { %3346 = vmatpush1.bf16.msra.mxu0 %v7049_v3  ;;  %3358 = vmatprep.subr.bf16.mxu1 %v6676_v10  ;;  %v6734_v3 = vcombine.high %v855_v25, %v859_v36  ;;  %v862_v10 = vld [vmem:[%s11997_s4 + $0x210] sm:$0xff]  ;;  %v6781_v36 = vcombine.low %v903_v53, %v907_v6 }
 0x21c   :  { %3487 = vmatprep.subr.bf16.mxu0 %v6678_v21  ;;  %v866_v21 = vld [vmem:[%s11997_s4 + $0x230] sm:$0xff] }
 0x21d   :  { %3219 = vmatmul.mubr.bf16.vlgmr.msra.gmra.mrb[4].mxu1 %v9564_v55  ;;  %v6740_v12 = vcombine.high %v862_v10, %v866_v21  ;;  %v6739_v33 = vcombine.low %v862_v10, %v866_v21  ;;  %v919_v10 = vld [vmem:[%s11997_s4 + $0x3d8] sm:$0xff] }
 0x21e   :  { %3348 = vmatmul.mubr.bf16.vlgmr.msra.gmra.mrb[8].mxu0 %v9564_v55  ;;  %3359 = vmatpush1.bf16.msra.mxu1 %v6675_v62  ;;  %v6731_v62 = vcombine.low %v854_v44, %v858_v8  ;;  %v911_v44 = vld [vmem:[%s11997_s4 + $0x398] sm:$0xff] }
 0x21f   :  { %3390 = vmatprep.mubr.bf16.mxu1 %v9368_v59  ;;  %3488 = vmatpush1.bf16.msra.mxu0 %v6677_v0  ;;  %v6742_v0 = vcombine.high %v863_v1, %v867_v24  ;;  %v915_v8 = vld [vmem:[%s11997_s4 + $0x3b8] sm:$0xff] }
 0x220   :  { %3519 = vmatprep.mubr.bf16.mxu0 %v9368_v59  ;;  %3360 = vmatprep.subr.bf16.mxu1 %v6684_v9  ;;  %v6691_v59 = vcombine.low %v814_v52, %v818_v35  ;;  %v870_v9 = vld [vmem:[%s11997_s4 + $0x250] sm:$0xff]  ;;  %v871_v35 = vld [vmem:[%s11997_s4 + $0x258] sm:$0xff]  ;;  %v6789_v24 = vcombine.low %v911_v44, %v915_v8 }
 0x221   :  { %3489 = vmatprep.subr.bf16.mxu0 %v6686_v20  ;;  %v874_v52 = vld [vmem:[%s11997_s4 + $0x270] sm:$0xff]  ;;  %v875_v20 = vld [vmem:[%s11997_s4 + $0x278] sm:$0xff] }
 0x222   :  { %3361 = vmatpush1.bf16.msra.mxu1 %v6683_v27  ;;  %v6748_v27 = vcombine.high %v870_v9, %v874_v52  ;;  %v6747_v22 = vcombine.low %v870_v9, %v874_v52  ;;  %v6749_v57 = vcombine.low %v871_v35, %v875_v20  ;;  %v923_v21 = vld [vmem:[%s11997_s4 + $0x3f8] sm:$0xff] }
 0x223   :  { %3490 = vmatpush1.bf16.msra.mxu0 %v6685_v46  ;;  %3362 = vmatprep.subr.bf16.mxu1 %v6692_v34  ;;  %v6750_v46 = vcombine.high %v871_v35, %v875_v20  ;;  %v878_v34 = vld [vmem:[%s11997_s4 + $0x290] sm:$0xff]  ;;  %v927_v9 = vld [vmem:[%s11997_s4 + $0x418] sm:$0xff]  ;;  %v6797_v20 = vcombine.low %v919_v10, %v923_v21 }
 0x224   :  { %3491 = vmatprep.subr.bf16.mxu0 %v6694_v26  ;;  %v882_v26 = vld [vmem:[%s11997_s4 + $0x2b0] sm:$0xff]  ;;  %v931_v52 = vld [vmem:[%s11997_s4 + $0x438] sm:$0xff] }
 0x225   :  { %v6755_v23 = vcombine.low %v878_v34, %v882_v26 }
 0x226   :  { %3363 = vmatpush1.bf16.msra.mxu1 %v6691_v59  ;;  %v6756_v59 = vcombine.high %v878_v34, %v882_v26  ;;  %v935_v26 = vld [vmem:[%s11997_s4 + $0x458] sm:$0xff] }
 0x227   :  { %3492 = vmatpush1.bf16.msra.mxu0 %v6693_v56  ;;  %3364 = vmatprep.subr.bf16.mxu1 %v6700_v13  ;;  %v6758_v56 = vcombine.high %v879_v51, %v883_v4  ;;  %v886_v13 = vld [vmem:[%s11997_s4 + $0x2d0] sm:$0xff]  ;;  %v939_v51 = vld [vmem:[%s11997_s4 + $0x478] sm:$0xff]  ;;  %v6805_v4 = vcombine.low %v927_v9, %v931_v52 }
 0x228   :  { %3493 = vmatprep.subr.bf16.mxu0 %v6702_v43  ;;  %v890_v43 = vld [vmem:[%s11997_s4 + $0x2f0] sm:$0xff] }
 0x229   :  { %v6763_v28 = vcombine.low %v886_v13, %v890_v43 }
 0x22a   :  { %3365 = vmatpush1.bf16.msra.mxu1 %v6699_v18  ;;  %v6764_v18 = vcombine.high %v886_v13, %v890_v43  ;;  %v943_v13 = vld [vmem:[%s11997_s4 + $0x498] sm:$0xff] }
 0x22b   :  { %3494 = vmatpush1.bf16.msra.mxu0 %v6701_v42  ;;  %3366 = vmatprep.subr.bf16.mxu1 %v6708_v31  ;;  %v6766_v42 = vcombine.high %v887_v2, %v891_v39  ;;  %v894_v31 = vld [vmem:[%s11997_s4 + $0x310] sm:$0xff]  ;;  %v947_v43 = vld [vmem:[%s11997_s4 + $0x4b8] sm:$0xff]  ;;  %v6813_v39 = vcombine.low %v935_v26, %v939_v51 }
 0x22c   :  { %3495 = vmatprep.subr.bf16.mxu0 %v6710_v5  ;;  %v898_v5 = vld [vmem:[%s11997_s4 + $0x330] sm:$0xff] }
 0x22d   :  { %v6771_v7 = vcombine.low %v894_v31, %v898_v5 }
 0x22e   :  { %3367 = vmatpush1.bf16.msra.mxu1 %v6707_v49  ;;  %v6772_v49 = vcombine.high %v894_v31, %v898_v5  ;;  %v955_v31 = vld [vmem:[%s11997_s4 + $0x4f8] sm:$0xff]  ;;  %v6821_v5 = vcombine.low %v943_v13, %v947_v43 }
 0x22f   :  { %3496 = vmatpush1.bf16.msra.mxu0 %v6709_v60  ;;  %3368 = vmatprep.subr.bf16.mxu1 %v6716_v11  ;;  %v6774_v60 = vcombine.high %v895_v30, %v899_v45  ;;  %v902_v11 = vld [vmem:[%s11997_s4 + $0x350] sm:$0xff] }
 0x230   :  { %3497 = vmatprep.subr.bf16.mxu0 %v6718_v48  ;;  %v906_v48 = vld [vmem:[%s11997_s4 + $0x370] sm:$0xff] }
 0x231   :  { %v6779_v25 = vcombine.low %v902_v11, %v906_v48 }
 0x232   :  { %3369 = vmatpush1.bf16.msra.mxu1 %v6715_v47  ;;  %v6780_v47 = vcombine.high %v902_v11, %v906_v48 }
 0x233   :  { %3498 = vmatpush1.bf16.msra.mxu0 %v6717_v50  ;;  %3370 = vmatprep.subr.bf16.mxu1 %v6724_v14  ;;  %v6782_v50 = vcombine.high %v903_v53, %v907_v6  ;;  %v910_v14 = vld [vmem:[%s11997_s4 + $0x390] sm:$0xff] }
 0x234   :  { %3499 = vmatprep.subr.bf16.mxu0 %v6726_v40  ;;  %v914_v40 = vld [vmem:[%s11997_s4 + $0x3b0] sm:$0xff] }
 0x235   :  { %v6787_v1 = vcombine.low %v910_v14, %v914_v40 }
 0x236   :  { %3371 = vmatpush1.bf16.msra.mxu1 %v6723_v63  ;;  %v6788_v63 = vcombine.high %v910_v14, %v914_v40 }
 0x237   :  { %3500 = vmatpush1.bf16.msra.mxu0 %v6725_v15  ;;  %3372 = vmatprep.subr.bf16.mxu1 %v6732_v61  ;;  %v6790_v15 = vcombine.high %v911_v44, %v915_v8  ;;  %v918_v61 = vld [vmem:[%s11997_s4 + $0x3d0] sm:$0xff] }
 0x238   :  { %3501 = vmatprep.subr.bf16.mxu0 %v6734_v3  ;;  %v922_v3 = vld [vmem:[%s11997_s4 + $0x3f0] sm:$0xff] }
 0x239   :  { %v6795_v35 = vcombine.low %v918_v61, %v922_v3 }
 0x23a   :  { %3373 = vmatpush1.bf16.msra.mxu1 %v6731_v62  ;;  %v6796_v62 = vcombine.high %v918_v61, %v922_v3 }
 0x23b   :  { %3502 = vmatpush1.bf16.msra.mxu0 %v6733_v29  ;;  %3374 = vmatprep.subr.bf16.mxu1 %v6740_v12  ;;  %v6798_v29 = vcombine.high %v919_v10, %v923_v21  ;;  %v926_v12 = vld [vmem:[%s11997_s4 + $0x410] sm:$0xff] }
 0x23c   :  { %3503 = vmatprep.subr.bf16.mxu0 %v6742_v0  ;;  %v930_v0 = vld [vmem:[%s11997_s4 + $0x430] sm:$0xff] }
 0x23d   :  { %v6803_v34 = vcombine.low %v926_v12, %v930_v0 }
 0x23e   :  { %3375 = vmatpush1.bf16.msra.mxu1 %v6739_v33  ;;  %v6804_v33 = vcombine.high %v926_v12, %v930_v0 }
 0x23f   :  { %3504 = vmatpush1.bf16.msra.mxu0 %v6741_v38  ;;  %3376 = vmatprep.subr.bf16.mxu1 %v6748_v27  ;;  %v6806_v38 = vcombine.high %v927_v9, %v931_v52  ;;  %v934_v27 = vld [vmem:[%s11997_s4 + $0x450] sm:$0xff] }
 0x240   :  { %3505 = vmatprep.subr.bf16.mxu0 %v6750_v46  ;;  %v938_v46 = vld [vmem:[%s11997_s4 + $0x470] sm:$0xff] }
 0x241   :  { %v6811_v2 = vcombine.low %v934_v27, %v938_v46 }
 0x242   :  { %3377 = vmatpush1.bf16.msra.mxu1 %v6747_v22  ;;  %v6812_v22 = vcombine.high %v934_v27, %v938_v46 }
 0x243   :  { %3506 = vmatpush1.bf16.msra.mxu0 %v6749_v57  ;;  %3378 = vmatprep.subr.bf16.mxu1 %v6756_v59  ;;  %v942_v57 = vld [vmem:[%s11997_s4 + $0x490] sm:$0xff] }
 0x244   :  { %3507 = vmatprep.subr.bf16.mxu0 %v6758_v56  ;;  %v946_v59 = vld [vmem:[%s11997_s4 + $0x4b0] sm:$0xff]  ;;  %v6814_v56 = vcombine.high %v935_v26, %v939_v51 }
 0x245   :  { %v998_v51 = vld [vmem:[%s11997_s4 + $0x650] sm:$0xff] }
 0x246   :  { %3379 = vmatpush1.bf16.msra.mxu1 %v6755_v23  ;;  %v6820_v23 = vcombine.high %v942_v57, %v946_v59 }
 0x247   :  { %3508 = vmatpush1.bf16.msra.mxu0 %v6757_v41  ;;  %3380 = vmatprep.subr.bf16.mxu1 %v6764_v18  ;;  %v6822_v41 = vcombine.high %v943_v13, %v947_v43  ;;  %v950_v18 = vld [vmem:[%s11997_s4 + $0x4d0] sm:$0xff] }
 0x248   :  { %3509 = vmatprep.subr.bf16.mxu0 %v6766_v42  ;;  %v954_v42 = vld [vmem:[%s11997_s4 + $0x4f0] sm:$0xff] }
 0x249   :  { %v6828_v30 = vcombine.high %v950_v18, %v954_v42  ;;  %v6827_v11 = vcombine.low %v950_v18, %v954_v42 }
 0x24a   :  { %3381 = vmatpush1.bf16.msra.mxu1 %v6763_v28  ;;  %v958_v28 = vld [vmem:[%s11997_s4 + $0x510] sm:$0xff] }
 0x24b   :  { %3510 = vmatpush1.bf16.msra.mxu0 %v6765_v58  ;;  %3382 = vmatprep.subr.bf16.mxu1 %v6772_v49  ;;  %v962_v58 = vld [vmem:[%s11997_s4 + $0x530] sm:$0xff]  ;;  %v959_v49 = vld [vmem:[%s11997_s4 + $0x518] sm:$0xff] }
 0x24c   :  { %3511 = vmatprep.subr.bf16.mxu0 %v6774_v60  ;;  %v963_v60 = vld [vmem:[%s11997_s4 + $0x538] sm:$0xff]  ;;  %v6836_v53 = vcombine.high %v958_v28, %v962_v58  ;;  %v6835_v14 = vcombine.low %v958_v28, %v962_v58 }
 0x24d   :  { %v6838_v6 = vcombine.high %v959_v49, %v963_v60  ;;  %v6837_v40 = vcombine.low %v959_v49, %v963_v60 }
 0x24e   :  { %3383 = vmatpush1.bf16.msra.mxu1 %v6771_v7  ;;  %v966_v7 = vld [vmem:[%s11997_s4 + $0x550] sm:$0xff] }
 0x24f   :  { %3512 = vmatpush1.bf16.msra.mxu0 %v6773_v54  ;;  %3384 = vmatprep.subr.bf16.mxu1 %v6780_v47  ;;  %v970_v54 = vld [vmem:[%s11997_s4 + $0x570] sm:$0xff]  ;;  %v967_v47 = vld [vmem:[%s11997_s4 + $0x558] sm:$0xff] }
 0x250   :  { %3513 = vmatprep.subr.bf16.mxu0 %v6782_v50  ;;  %v971_v50 = vld [vmem:[%s11997_s4 + $0x578] sm:$0xff]  ;;  %v6844_v44 = vcombine.high %v966_v7, %v970_v54  ;;  %v6843_v61 = vcombine.low %v966_v7, %v970_v54 }
 0x251   :  { %v6846_v8 = vcombine.high %v967_v47, %v971_v50  ;;  %v6845_v3 = vcombine.low %v967_v47, %v971_v50 }
 0x252   :  { %3385 = vmatpush1.bf16.msra.mxu1 %v6779_v25  ;;  %v974_v25 = vld [vmem:[%s11997_s4 + $0x590] sm:$0xff] }
 0x253   :  { %3514 = vmatpush1.bf16.msra.mxu0 %v6781_v36  ;;  %3386 = vmatprep.subr.bf16.mxu1 %v6788_v63  ;;  %v978_v36 = vld [vmem:[%s11997_s4 + $0x5b0] sm:$0xff]  ;;  %v975_v63 = vld [vmem:[%s11997_s4 + $0x598] sm:$0xff] }
 0x254   :  { %3515 = vmatprep.subr.bf16.mxu0 %v6790_v15  ;;  %v979_v15 = vld [vmem:[%s11997_s4 + $0x5b8] sm:$0xff]  ;;  %v6852_v10 = vcombine.high %v974_v25, %v978_v36  ;;  %v6851_v12 = vcombine.low %v974_v25, %v978_v36 }
 0x255   :  { %v6854_v21 = vcombine.high %v975_v63, %v979_v15  ;;  %v6853_v0 = vcombine.low %v975_v63, %v979_v15 }
 0x256   :  { %3387 = vmatpush1.bf16.msra.mxu1 %v6787_v1  ;;  %v982_v1 = vld [vmem:[%s11997_s4 + $0x5d0] sm:$0xff] }
 0x257   :  { %3516 = vmatpush1.bf16.msra.mxu0 %v6789_v24  ;;  %3388 = vmatprep.subr.bf16.mxu1 %v6796_v62  ;;  %v986_v24 = vld [vmem:[%s11997_s4 + $0x5f0] sm:$0xff]  ;;  %v983_v62 = vld [vmem:[%s11997_s4 + $0x5d8] sm:$0xff] }
 0x258   :  { %3517 = vmatprep.subr.bf16.mxu0 %v6798_v29  ;;  %v987_v29 = vld [vmem:[%s11997_s4 + $0x5f8] sm:$0xff]  ;;  %v6860_v9 = vcombine.high %v982_v1, %v986_v24  ;;  %v6859_v27 = vcombine.low %v982_v1, %v986_v24 }
 0x259   :  { %v6862_v52 = vcombine.high %v983_v62, %v987_v29  ;;  %v6861_v46 = vcombine.low %v983_v62, %v987_v29 }
 0x25a   :  { %3389 = vmatpush1.bf16.msra.mxu1 %v6795_v35  ;;  %v990_v35 = vld [vmem:[%s11997_s4 + $0x610] sm:$0xff] }
 0x25b   :  { %3518 = vmatpush1.bf16.msra.mxu0 %v6797_v20  ;;  %3401 = vmatprep.subr.bf16.mxu1 %v6804_v33  ;;  %v994_v20 = vld [vmem:[%s11997_s4 + $0x630] sm:$0xff]  ;;  %v991_v33 = vld [vmem:[%s11997_s4 + $0x618] sm:$0xff] }
 0x25c   :  { %3530 = vmatprep.subr.bf16.mxu0 %v6806_v38  ;;  %v995_v38 = vld [vmem:[%s11997_s4 + $0x638] sm:$0xff] }
 0x25d   :  { %3391 = vmatmul.mubr.bf16.vlgmr.msra.gmra.mrb[8].mxu1 %v9366_v19  ;;  %v6870_v26 = vcombine.high %v991_v33, %v995_v38 }
 0x25e   :  { %3520 = vmatmul.mubr.bf16.vlgmr.msra.gmra.mrb[12].mxu0 %v9366_v19  ;;  %3402 = vmatpush1.bf16.msra.mxu1 %v6803_v34  ;;  %v951_v19 = vld [vmem:[%s11997_s4 + $0x4d8] sm:$0xff]  ;;  %v6868_v34 = vcombine.high %v990_v35, %v994_v20 }
 0x25f   :  { %3433 = vmatprep.mubr.bf16.mxu1 %v9476_v37  ;;  %3531 = vmatpush1.bf16.msra.mxu0 %v6805_v4  ;;  %v6830_v45 = vcombine.high %v951_v19, %v955_v31  ;;  %v6829_v48 = vcombine.low %v951_v19, %v955_v31  ;;  %v1002_v4 = vld [vmem:[%s11997_s4 + $0x670] sm:$0xff] }
 0x260   :  { %3562 = vmatprep.mubr.bf16.mxu0 %v9476_v37  ;;  %3403 = vmatprep.subr.bf16.mxu1 %v6812_v22  ;;  %v6819_v37 = vcombine.low %v942_v57, %v946_v59  ;;  %v999_v22 = vld [vmem:[%s11997_s4 + $0x658] sm:$0xff]  ;;  %v6867_v59 = vcombine.low %v990_v35, %v994_v20  ;;  %v6876_v13 = vcombine.high %v998_v51, %v1002_v4 }
 0x261   :  { %3532 = vmatprep.subr.bf16.mxu0 %v6814_v56  ;;  %v1003_v57 = vld [vmem:[%s11997_s4 + $0x678] sm:$0xff]  ;;  %v6869_v56 = vcombine.low %v991_v33, %v995_v38  ;;  %v6875_v18 = vcombine.low %v998_v51, %v1002_v4 }
 0x262   :  { %3404 = vmatpush1.bf16.msra.mxu1 %v6811_v2  ;;  %v6878_v43 = vcombine.high %v999_v22, %v1003_v57  ;;  %v1006_v2 = vld [vmem:[%s11997_s4 + $0x690] sm:$0xff]  ;;  %v6877_v42 = vcombine.low %v999_v22, %v1003_v57 }
 0x263   :  { %3533 = vmatpush1.bf16.msra.mxu0 %v6813_v39  ;;  %3405 = vmatprep.subr.bf16.mxu1 %v6820_v23  ;;  %v1010_v39 = vld [vmem:[%s11997_s4 + $0x6b0] sm:$0xff]  ;;  %v1007_v23 = vld [vmem:[%s11997_s4 + $0x698] sm:$0xff] }
 0x264   :  { %3534 = vmatprep.subr.bf16.mxu0 %v6822_v41  ;;  %v1011_v41 = vld [vmem:[%s11997_s4 + $0x6b8] sm:$0xff]  ;;  %v6884_v19 = vcombine.high %v1006_v2, %v1010_v39  ;;  %v6883_v28 = vcombine.low %v1006_v2, %v1010_v39 }
 0x265   :  { %v6886_v31 = vcombine.high %v1007_v23, %v1011_v41  ;;  %v6885_v58 = vcombine.low %v1007_v23, %v1011_v41  ;;  %v1067_v2 = vld [vmem:[%s11997_s4 + $0x878] sm:$0xff]  ;;  %v1070_v41 = vld [vmem:[%s11997_s4 + $0x890] sm:$0xff] }
 0x266   :  { %3406 = vmatpush1.bf16.msra.mxu1 %v6819_v37  ;;  %v1014_v37 = vld [vmem:[%s11997_s4 + $0x6d0] sm:$0xff] }
 0x267   :  { %3535 = vmatpush1.bf16.msra.mxu0 %v6821_v5  ;;  %3407 = vmatprep.subr.bf16.mxu1 %v6828_v30  ;;  %v1018_v5 = vld [vmem:[%s11997_s4 + $0x6f0] sm:$0xff]  ;;  %v1015_v30 = vld [vmem:[%s11997_s4 + $0x6d8] sm:$0xff] }
 0x268   :  { %3536 = vmatprep.subr.bf16.mxu0 %v6830_v45  ;;  %v1019_v45 = vld [vmem:[%s11997_s4 + $0x6f8] sm:$0xff]  ;;  %v6892_v49 = vcombine.high %v1014_v37, %v1018_v5  ;;  %v6891_v7 = vcombine.low %v1014_v37, %v1018_v5 }
 0x269   :  { %v6894_v60 = vcombine.high %v1015_v30, %v1019_v45  ;;  %v6893_v54 = vcombine.low %v1015_v30, %v1019_v45 }
 0x26a   :  { %3408 = vmatpush1.bf16.msra.mxu1 %v6827_v11  ;;  %v1022_v11 = vld [vmem:[%s11997_s4 + $0x710] sm:$0xff] }
 0x26b   :  { %3537 = vmatpush1.bf16.msra.mxu0 %v6829_v48  ;;  %3409 = vmatprep.subr.bf16.mxu1 %v6836_v53  ;;  %v1026_v48 = vld [vmem:[%s11997_s4 + $0x730] sm:$0xff]  ;;  %v1023_v53 = vld [vmem:[%s11997_s4 + $0x718] sm:$0xff] }
 0x26c   :  { %3538 = vmatprep.subr.bf16.mxu0 %v6838_v6  ;;  %v1027_v6 = vld [vmem:[%s11997_s4 + $0x738] sm:$0xff]  ;;  %v6900_v47 = vcombine.high %v1022_v11, %v1026_v48  ;;  %v6899_v25 = vcombine.low %v1022_v11, %v1026_v48 }
 0x26d   :  { %v6902_v50 = vcombine.high %v1023_v53, %v1027_v6  ;;  %v6901_v36 = vcombine.low %v1023_v53, %v1027_v6  ;;  %v1086_v53 = vld [vmem:[%s11997_s4 + $0x910] sm:$0xff] }
 0x26e   :  { %3410 = vmatpush1.bf16.msra.mxu1 %v6835_v14  ;;  %v1030_v14 = vld [vmem:[%s11997_s4 + $0x750] sm:$0xff] }
 0x26f   :  { %3539 = vmatpush1.bf16.msra.mxu0 %v6837_v40  ;;  %3411 = vmatprep.subr.bf16.mxu1 %v6844_v44  ;;  %v1034_v40 = vld [vmem:[%s11997_s4 + $0x770] sm:$0xff]  ;;  %v1031_v44 = vld [vmem:[%s11997_s4 + $0x758] sm:$0xff] }
 0x270   :  { %3540 = vmatprep.subr.bf16.mxu0 %v6846_v8  ;;  %v1035_v8 = vld [vmem:[%s11997_s4 + $0x778] sm:$0xff]  ;;  %v6908_v63 = vcombine.high %v1030_v14, %v1034_v40  ;;  %v6907_v1 = vcombine.low %v1030_v14, %v1034_v40  ;;  %v1090_v6 = vld [vmem:[%s11997_s4 + $0x930] sm:$0xff] }
 0x271   :  { %v6910_v15 = vcombine.high %v1031_v44, %v1035_v8  ;;  %v6909_v24 = vcombine.low %v1031_v44, %v1035_v8  ;;  %v6964_v14 = vcombine.high %v1086_v53, %v1090_v6  ;;  %v1094_v44 = vld [vmem:[%s11997_s4 + $0x950] sm:$0xff] }
 0x272   :  { %3412 = vmatpush1.bf16.msra.mxu1 %v6843_v61  ;;  %v1038_v61 = vld [vmem:[%s11997_s4 + $0x790] sm:$0xff] }
 0x273   :  { %3541 = vmatpush1.bf16.msra.mxu0 %v6845_v3  ;;  %3413 = vmatprep.subr.bf16.mxu1 %v6852_v10  ;;  %v1042_v3 = vld [vmem:[%s11997_s4 + $0x7b0] sm:$0xff]  ;;  %v1039_v10 = vld [vmem:[%s11997_s4 + $0x798] sm:$0xff] }
 0x274   :  { %3542 = vmatprep.subr.bf16.mxu0 %v6854_v21  ;;  %v1043_v21 = vld [vmem:[%s11997_s4 + $0x7b8] sm:$0xff]  ;;  %v6916_v62 = vcombine.high %v1038_v61, %v1042_v3  ;;  %v6915_v35 = vcombine.low %v1038_v61, %v1042_v3  ;;  %v1098_v8 = vld [vmem:[%s11997_s4 + $0x970] sm:$0xff] }
 0x275   :  { %v6918_v29 = vcombine.high %v1039_v10, %v1043_v21  ;;  %v6917_v20 = vcombine.low %v1039_v10, %v1043_v21  ;;  %v6972_v61 = vcombine.high %v1094_v44, %v1098_v8  ;;  %v1102_v10 = vld [vmem:[%s11997_s4 + $0x990] sm:$0xff] }
 0x276   :  { %3414 = vmatpush1.bf16.msra.mxu1 %v6851_v12  ;;  %v1046_v12 = vld [vmem:[%s11997_s4 + $0x7d0] sm:$0xff] }
 0x277   :  { %3543 = vmatpush1.bf16.msra.mxu0 %v6853_v0  ;;  %3415 = vmatprep.subr.bf16.mxu1 %v6860_v9  ;;  %v1050_v0 = vld [vmem:[%s11997_s4 + $0x7f0] sm:$0xff]  ;;  %v1047_v9 = vld [vmem:[%s11997_s4 + $0x7d8] sm:$0xff] }
 0x278   :  { %3544 = vmatprep.subr.bf16.mxu0 %v6862_v52  ;;  %v1051_v52 = vld [vmem:[%s11997_s4 + $0x7f8] sm:$0xff]  ;;  %v6924_v33 = vcombine.high %v1046_v12, %v1050_v0  ;;  %v6923_v51 = vcombine.low %v1046_v12, %v1050_v0  ;;  %v1106_v21 = vld [vmem:[%s11997_s4 + $0x9b0] sm:$0xff] }
 0x279   :  { %v6926_v38 = vcombine.high %v1047_v9, %v1051_v52  ;;  %v6925_v4 = vcombine.low %v1047_v9, %v1051_v52  ;;  %v6980_v12 = vcombine.high %v1102_v10, %v1106_v21  ;;  %v1110_v9 = vld [vmem:[%s11997_s4 + $0x9d0] sm:$0xff] }
 0x27a   :  { %3416 = vmatpush1.bf16.msra.mxu1 %v6859_v27  ;;  %v1054_v27 = vld [vmem:[%s11997_s4 + $0x810] sm:$0xff] }
 0x27b   :  { %3545 = vmatpush1.bf16.msra.mxu0 %v6861_v46  ;;  %3417 = vmatprep.subr.bf16.mxu1 %v6868_v34  ;;  %v1058_v46 = vld [vmem:[%s11997_s4 + $0x830] sm:$0xff]  ;;  %v1055_v34 = vld [vmem:[%s11997_s4 + $0x818] sm:$0xff] }
 0x27c   :  { %3546 = vmatprep.subr.bf16.mxu0 %v6870_v26  ;;  %v1059_v26 = vld [vmem:[%s11997_s4 + $0x838] sm:$0xff]  ;;  %v6932_v22 = vcombine.high %v1054_v27, %v1058_v46  ;;  %v1114_v52 = vld [vmem:[%s11997_s4 + $0x9f0] sm:$0xff] }
 0x27d   :  { %v6934_v57 = vcombine.high %v1055_v34, %v1059_v26  ;;  %v6933_v39 = vcombine.low %v1055_v34, %v1059_v26  ;;  %v1118_v34 = vld [vmem:[%s11997_s4 + $0xa10] sm:$0xff] }
 0x27e   :  { %3418 = vmatpush1.bf16.msra.mxu1 %v6867_v59  ;;  %v1062_v59 = vld [vmem:[%s11997_s4 + $0x850] sm:$0xff] }
 0x27f   :  { %3547 = vmatpush1.bf16.msra.mxu0 %v6869_v56  ;;  %3419 = vmatprep.subr.bf16.mxu1 %v6876_v13  ;;  %v1066_v56 = vld [vmem:[%s11997_s4 + $0x870] sm:$0xff]  ;;  %v6931_v13 = vcombine.low %v1054_v27, %v1058_v46  ;;  %v6988_v27 = vcombine.high %v1110_v9, %v1114_v52 }
 0x280   :  { %3548 = vmatprep.subr.bf16.mxu0 %v6878_v43  ;;  %v1063_v43 = vld [vmem:[%s11997_s4 + $0x858] sm:$0xff]  ;;  %v6940_v23 = vcombine.high %v1062_v59, %v1066_v56  ;;  %v6939_v37 = vcombine.low %v1062_v59, %v1066_v56  ;;  %v1122_v26 = vld [vmem:[%s11997_s4 + $0xa30] sm:$0xff] }
 0x281   :  { %v6941_v5 = vcombine.low %v1063_v43, %v1067_v2  ;;  %v6996_v59 = vcombine.high %v1118_v34, %v1122_v26 }
 0x282   :  { %3420 = vmatpush1.bf16.msra.mxu1 %v6875_v18  ;;  %v1074_v18 = vld [vmem:[%s11997_s4 + $0x8b0] sm:$0xff] }
 0x283   :  { %3549 = vmatpush1.bf16.msra.mxu0 %v6877_v42  ;;  %3421 = vmatprep.subr.bf16.mxu1 %v6884_v19  ;;  %v6942_v42 = vcombine.high %v1063_v43, %v1067_v2  ;;  %v1071_v19 = vld [vmem:[%s11997_s4 + $0x898] sm:$0xff]  ;;  %v6948_v30 = vcombine.high %v1070_v41, %v1074_v18  ;;  %v1130_v43 = vld [vmem:[%s11997_s4 + $0xa70] sm:$0xff] }
 0x284   :  { %3550 = vmatprep.subr.bf16.mxu0 %v6886_v31  ;;  %v1075_v31 = vld [vmem:[%s11997_s4 + $0x8b8] sm:$0xff] }
 0x285   :  { %v6950_v45 = vcombine.high %v1071_v19, %v1075_v31  ;;  %v1127_v2 = vld [vmem:[%s11997_s4 + $0xa58] sm:$0xff] }
 0x286   :  { %3422 = vmatpush1.bf16.msra.mxu1 %v6883_v28  ;;  %v1078_v28 = vld [vmem:[%s11997_s4 + $0x8d0] sm:$0xff] }
 0x287   :  { %3551 = vmatpush1.bf16.msra.mxu0 %v6885_v58  ;;  %3423 = vmatprep.subr.bf16.mxu1 %v6892_v49  ;;  %v1082_v58 = vld [vmem:[%s11997_s4 + $0x8f0] sm:$0xff]  ;;  %v1083_v49 = vld [vmem:[%s11997_s4 + $0x8f8] sm:$0xff] }
 0x288   :  { %3552 = vmatprep.subr.bf16.mxu0 %v6894_v60  ;;  %v6949_v60 = vcombine.low %v1071_v19, %v1075_v31  ;;  %v6956_v11 = vcombine.high %v1078_v28, %v1082_v58  ;;  %v1134_v19 = vld [vmem:[%s11997_s4 + $0xa90] sm:$0xff] }
 0x289   :  { %v1138_v31 = vld [vmem:[%s11997_s4 + $0xab0] sm:$0xff] }
 0x28a   :  { %3424 = vmatpush1.bf16.msra.mxu1 %v6891_v7  ;;  %v1087_v7 = vld [vmem:[%s11997_s4 + $0x918] sm:$0xff] }
 0x28b   :  { %3553 = vmatpush1.bf16.msra.mxu0 %v6893_v54  ;;  %3425 = vmatprep.subr.bf16.mxu1 %v6900_v47  ;;  %v1091_v54 = vld [vmem:[%s11997_s4 + $0x938] sm:$0xff]  ;;  %v6955_v47 = vcombine.low %v1078_v28, %v1082_v58  ;;  %v7012_v28 = vcombine.high %v1134_v19, %v1138_v31 }
 0x28c   :  { %3554 = vmatprep.subr.bf16.mxu0 %v6902_v50  ;;  %v6966_v40 = vcombine.high %v1087_v7, %v1091_v54 }
 0x28e   :  { %3426 = vmatpush1.bf16.msra.mxu1 %v6899_v25  ;;  %v1095_v25 = vld [vmem:[%s11997_s4 + $0x958] sm:$0xff] }
 0x28f   :  { %3555 = vmatpush1.bf16.msra.mxu0 %v6901_v36  ;;  %3427 = vmatprep.subr.bf16.mxu1 %v6908_v63  ;;  %v1099_v36 = vld [vmem:[%s11997_s4 + $0x978] sm:$0xff]  ;;  %v6963_v63 = vcombine.low %v1086_v53, %v1090_v6 }
 0x290   :  { %3556 = vmatprep.subr.bf16.mxu0 %v6910_v15  ;;  %v6965_v15 = vcombine.low %v1087_v7, %v1091_v54  ;;  %v6974_v3 = vcombine.high %v1095_v25, %v1099_v36  ;;  %v1150_v7 = vld [vmem:[%s11997_s4 + $0xb10] sm:$0xff] }
 0x291   :  { %v1154_v54 = vld [vmem:[%s11997_s4 + $0xb30] sm:$0xff] }
 0x292   :  { %3428 = vmatpush1.bf16.msra.mxu1 %v6907_v1  ;;  %v1103_v1 = vld [vmem:[%s11997_s4 + $0x998] sm:$0xff] }
 0x293   :  { %3557 = vmatpush1.bf16.msra.mxu0 %v6909_v24  ;;  %3429 = vmatprep.subr.bf16.mxu1 %v6916_v62  ;;  %v1107_v24 = vld [vmem:[%s11997_s4 + $0x9b8] sm:$0xff]  ;;  %v6971_v62 = vcombine.low %v1094_v44, %v1098_v8  ;;  %v7028_v44 = vcombine.high %v1150_v7, %v1154_v54 }
 0x294   :  { %3558 = vmatprep.subr.bf16.mxu0 %v6918_v29  ;;  %v6973_v29 = vcombine.low %v1095_v25, %v1099_v36  ;;  %v6982_v0 = vcombine.high %v1103_v1, %v1107_v24  ;;  %v1158_v25 = vld [vmem:[%s11997_s4 + $0xb50] sm:$0xff] }
 0x295   :  { %v1162_v36 = vld [vmem:[%s11997_s4 + $0xb70] sm:$0xff] }
 0x296   :  { %3430 = vmatpush1.bf16.msra.mxu1 %v6915_v35  ;;  %v1111_v35 = vld [vmem:[%s11997_s4 + $0x9d8] sm:$0xff] }
 0x297   :  { %3559 = vmatpush1.bf16.msra.mxu0 %v6917_v20  ;;  %3431 = vmatprep.subr.bf16.mxu1 %v6924_v33  ;;  %v1115_v20 = vld [vmem:[%s11997_s4 + $0x9f8] sm:$0xff]  ;;  %v6979_v33 = vcombine.low %v1102_v10, %v1106_v21  ;;  %v7036_v10 = vcombine.high %v1158_v25, %v1162_v36 }
 0x298   :  { %3560 = vmatprep.subr.bf16.mxu0 %v6926_v38  ;;  %v6981_v38 = vcombine.low %v1103_v1, %v1107_v24  ;;  %v6990_v46 = vcombine.high %v1111_v35, %v1115_v20  ;;  %v1166_v1 = vld [vmem:[%s11997_s4 + $0xb90] sm:$0xff] }
 0x299   :  { %v1170_v24 = vld [vmem:[%s11997_s4 + $0xbb0] sm:$0xff] }
 0x29a   :  { %3432 = vmatpush1.bf16.msra.mxu1 %v6923_v51  ;;  %v1119_v51 = vld [vmem:[%s11997_s4 + $0xa18] sm:$0xff] }
 0x29b   :  { %3561 = vmatpush1.bf16.msra.mxu0 %v6925_v4  ;;  %3444 = vmatprep.subr.bf16.mxu1 %v6932_v22  ;;  %v1123_v4 = vld [vmem:[%s11997_s4 + $0xa38] sm:$0xff]  ;;  %v6987_v22 = vcombine.low %v1110_v9, %v1114_v52  ;;  %v7044_v9 = vcombine.high %v1166_v1, %v1170_v24 }
 0x29c   :  { %3573 = vmatprep.subr.bf16.mxu0 %v6934_v57  ;;  %v6989_v57 = vcombine.low %v1111_v35, %v1115_v20  ;;  %v6998_v56 = vcombine.high %v1119_v51, %v1123_v4  ;;  %v1174_v35 = vld [vmem:[%s11997_s4 + $0xbd0] sm:$0xff] }
 0x29d   :  { %3434 = vmatmul.mubr.bf16.vlgmr.msra.gmra.mrb[8].mxu1 %v9474_v16  ;;  %v1178_v20 = vld [vmem:[%s11997_s4 + $0xbf0] sm:$0xff] }
 0x29e   :  { %3563 = vmatmul.mubr.bf16.vlgmr.msra.gmra.mrb[12].mxu0 %v9474_v16  ;;  %3445 = vmatpush1.bf16.msra.mxu1 %v6931_v13  ;;  %v1079_v16 = vld [vmem:[%s11997_s4 + $0x8d8] sm:$0xff]  ;;  %v1126_v13 = vld [vmem:[%s11997_s4 + $0xa50] sm:$0xff] }
 0x29f   :  { %3476 = vmatprep.mubr.bf16.mxu1 %v9575_v17  ;;  %3574 = vmatpush1.bf16.msra.mxu0 %v6933_v39  ;;  %v6958_v48 = vcombine.high %v1079_v16, %v1083_v49  ;;  %v6957_v50 = vcombine.low %v1079_v16, %v1083_v49  ;;  %v1131_v39 = vld [vmem:[%s11997_s4 + $0xa78] sm:$0xff]  ;;  %v1142_v16 = vld [vmem:[%s11997_s4 + $0xad0] sm:$0xff] }
 0x2a0   :  { %3605 = vmatprep.mubr.bf16.mxu0 %v9575_v17  ;;  %3446 = vmatprep.subr.bf16.mxu1 %v6940_v23  ;;  %v6947_v17 = vcombine.low %v1070_v41, %v1074_v18  ;;  %v6995_v23 = vcombine.low %v1118_v34, %v1122_v26  ;;  %v6997_v41 = vcombine.low %v1119_v51, %v1123_v4  ;;  %v1146_v49 = vld [vmem:[%s11997_s4 + $0xaf0] sm:$0xff] }
 0x2a1   :  { %3575 = vmatprep.subr.bf16.mxu0 %v6942_v42  ;;  %v7004_v18 = vcombine.high %v1126_v13, %v1130_v43  ;;  %v7006_v42 = vcombine.high %v1127_v2, %v1131_v39  ;;  %v7020_v53 = vcombine.high %v1142_v16, %v1146_v49  ;;  %v7052_v34 = vcombine.high %v1174_v35, %v1178_v20 }
 0x2a2   :  { %3447 = vmatpush1.bf16.msra.mxu1 %v6939_v37  ;;  %v1135_v37 = vld [vmem:[%s11997_s4 + $0xa98] sm:$0xff]  ;;  %v7051_v51 = vcombine.low %v1174_v35, %v1178_v20  ;;  %v4212_v35 = vld [vmem:[%s12000_s7 + $0x8] sm:$0xff]  ;;  %v4211_v20 = vld [vmem:[%s12000_s7] sm:$0xff] }
 0x2a3   :  { %3576 = vmatpush1.bf16.msra.mxu0 %v6941_v5  ;;  %3448 = vmatprep.subr.bf16.mxu1 %v6948_v30  ;;  %v1139_v5 = vld [vmem:[%s11997_s4 + $0xab8] sm:$0xff]  ;;  %v7003_v30 = vcombine.low %v1126_v13, %v1130_v43 }
 0x2a4   :  { %3577 = vmatprep.subr.bf16.mxu0 %v6950_v45  ;;  %v7005_v45 = vcombine.low %v1127_v2, %v1131_v39  ;;  %v7014_v58 = vcombine.high %v1135_v37, %v1139_v5 }
 0x2a6   :  { %3449 = vmatpush1.bf16.msra.mxu1 %v6947_v17  ;;  %v1143_v17 = vld [vmem:[%s11997_s4 + $0xad8] sm:$0xff] }
 0x2a7   :  { %3578 = vmatpush1.bf16.msra.mxu0 %v6949_v60  ;;  %3450 = vmatprep.subr.bf16.mxu1 %v6956_v11  ;;  %v1147_v60 = vld [vmem:[%s11997_s4 + $0xaf8] sm:$0xff]  ;;  %v7011_v11 = vcombine.low %v1134_v19, %v1138_v31 }
 0x2a8   :  { %3579 = vmatprep.subr.bf16.mxu0 %v6958_v48  ;;  %v7013_v48 = vcombine.low %v1135_v37, %v1139_v5  ;;  %v7022_v6 = vcombine.high %v1143_v17, %v1147_v60 }
 0x2aa   :  { %3451 = vmatpush1.bf16.msra.mxu1 %v6955_v47  ;;  %v1151_v47 = vld [vmem:[%s11997_s4 + $0xb18] sm:$0xff] }
 0x2ab   :  { %3580 = vmatpush1.bf16.msra.mxu0 %v6957_v50  ;;  %3452 = vmatprep.subr.bf16.mxu1 %v6964_v14  ;;  %v1155_v50 = vld [vmem:[%s11997_s4 + $0xb38] sm:$0xff]  ;;  %v7019_v14 = vcombine.low %v1142_v16, %v1146_v49 }
 0x2ac   :  { %3581 = vmatprep.subr.bf16.mxu0 %v6966_v40  ;;  %v7021_v40 = vcombine.low %v1143_v17, %v1147_v60  ;;  %v7030_v8 = vcombine.high %v1151_v47, %v1155_v50 }
 0x2ae   :  { %3453 = vmatpush1.bf16.msra.mxu1 %v6963_v63  ;;  %v1159_v63 = vld [vmem:[%s11997_s4 + $0xb58] sm:$0xff] }
 0x2af   :  { %3582 = vmatpush1.bf16.msra.mxu0 %v6965_v15  ;;  %3454 = vmatprep.subr.bf16.mxu1 %v6972_v61  ;;  %v1163_v15 = vld [vmem:[%s11997_s4 + $0xb78] sm:$0xff]  ;;  %v7027_v61 = vcombine.low %v1150_v7, %v1154_v54 }
 0x2b0   :  { %3583 = vmatprep.subr.bf16.mxu0 %v6974_v3  ;;  %v7029_v3 = vcombine.low %v1151_v47, %v1155_v50  ;;  %v7038_v21 = vcombine.high %v1159_v63, %v1163_v15 }
 0x2b2   :  { %3455 = vmatpush1.bf16.msra.mxu1 %v6971_v62  ;;  %v1167_v62 = vld [vmem:[%s11997_s4 + $0xb98] sm:$0xff] }
 0x2b3   :  { %3584 = vmatpush1.bf16.msra.mxu0 %v6973_v29  ;;  %3456 = vmatprep.subr.bf16.mxu1 %v6980_v12  ;;  %v1171_v29 = vld [vmem:[%s11997_s4 + $0xbb8] sm:$0xff]  ;;  %v7035_v12 = vcombine.low %v1158_v25, %v1162_v36 }
 0x2b4   :  { %3585 = vmatprep.subr.bf16.mxu0 %v6982_v0  ;;  %v7037_v0 = vcombine.low %v1159_v63, %v1163_v15  ;;  %v7046_v52 = vcombine.high %v1167_v62, %v1171_v29 }
 0x2b6   :  { %3457 = vmatpush1.bf16.msra.mxu1 %v6979_v33  ;;  %v1175_v33 = vld [vmem:[%s11997_s4 + $0xbd8] sm:$0xff] }
 0x2b7   :  { %3586 = vmatpush1.bf16.msra.mxu0 %v6981_v38  ;;  %3458 = vmatprep.subr.bf16.mxu1 %v6988_v27  ;;  %v1179_v38 = vld [vmem:[%s11997_s4 + $0xbf8] sm:$0xff]  ;;  %v7043_v27 = vcombine.low %v1166_v1, %v1170_v24  ;;  %s8540_s4 = smov 118  }
 0x2b8   :  { %3587 = vmatprep.subr.bf16.mxu0 %v6990_v46  ;;  %v7045_v46 = vcombine.low %v1167_v62, %v1171_v29  ;;  %v7054_v26 = vcombine.high %v1175_v33, %v1179_v38  ;;  %v7053_v4 = vcombine.low %v1175_v33, %v1179_v38  ;;  %v4051_v33 = vld [vmem:[%s11999_s6 + $0x18] sm:$0xff]  ;;  %v4050_v38 = vld [vmem:[%s11999_s6 + $0x10] sm:$0xff] }
 0x2ba   :  { %3459 = vmatpush1.bf16.msra.mxu1 %v6987_v22 }
 0x2bb   :  { %3588 = vmatpush1.bf16.msra.mxu0 %v6989_v57  ;;  %3460 = vmatprep.subr.bf16.mxu1 %v6996_v59 }
 0x2bc   :  { %3589 = vmatprep.subr.bf16.mxu0 %v6998_v56 }
 0x2be   :  { %3461 = vmatpush1.bf16.msra.mxu1 %v6995_v23 }
 0x2bf   :  { %3590 = vmatpush1.bf16.msra.mxu0 %v6997_v41  ;;  %3462 = vmatprep.subr.bf16.mxu1 %v7004_v18 }
 0x2c0   :  { %3591 = vmatprep.subr.bf16.mxu0 %v7006_v42 }
 0x2c2   :  { %3463 = vmatpush1.bf16.msra.mxu1 %v7003_v30 }
 0x2c3   :  { %3592 = vmatpush1.bf16.msra.mxu0 %v7005_v45  ;;  %3464 = vmatprep.subr.bf16.mxu1 %v7012_v28 }
 0x2c4   :  { %3593 = vmatprep.subr.bf16.mxu0 %v7014_v58 }
 0x2c6   :  { %3465 = vmatpush1.bf16.msra.mxu1 %v7011_v11 }
 0x2c7   :  { %3594 = vmatpush1.bf16.msra.mxu0 %v7013_v48  ;;  %3466 = vmatprep.subr.bf16.mxu1 %v7020_v53 }
 0x2c8   :  { %3595 = vmatprep.subr.bf16.mxu0 %v7022_v6 }
 0x2ca   :  { %3467 = vmatpush1.bf16.msra.mxu1 %v7019_v14 }
 0x2cb   :  { %3596 = vmatpush1.bf16.msra.mxu0 %v7021_v40  ;;  %3468 = vmatprep.subr.bf16.mxu1 %v7028_v44 }
 0x2cc   :  { %3597 = vmatprep.subr.bf16.mxu0 %v7030_v8 }
 0x2ce   :  { %3469 = vmatpush1.bf16.msra.mxu1 %v7027_v61 }
 0x2cf   :  { %3598 = vmatpush1.bf16.msra.mxu0 %v7029_v3  ;;  %3470 = vmatprep.subr.bf16.mxu1 %v7036_v10 }
 0x2d0   :  { %3599 = vmatprep.subr.bf16.mxu0 %v7038_v21 }
 0x2d2   :  { %3471 = vmatpush1.bf16.msra.mxu1 %v7035_v12 }
 0x2d3   :  { %3600 = vmatpush1.bf16.msra.mxu0 %v7037_v0  ;;  %3472 = vmatprep.subr.bf16.mxu1 %v7044_v9  ;;  %v8262_v0 = vld [vmem:[%s11998_s5 + $0x4] ss:$8 sps:$4 sm:$0xff]  }
 0x2d4   :  { %3601 = vmatprep.subr.bf16.mxu0 %v7046_v52  ;;  %v4049_v9 = vld [vmem:[%s11999_s6 + $0x8] sm:$0xff]  ;;  %v4048_v52 = vld [vmem:[%s11999_s6] sm:$0xff] }
 0x2d6   :  { %3473 = vmatpush1.bf16.msra.mxu1 %v7043_v27  ;;  %v4214_v27 = vld [vmem:[%s12000_s7 + $0x18] sm:$0xff] }
 0x2d7   :  { %3602 = vmatpush1.bf16.msra.mxu0 %v7045_v46  ;;  %3474 = vmatprep.subr.bf16.mxu1 %v7052_v34  ;;  %v4213_v46 = vld [vmem:[%s12000_s7 + $0x10] sm:$0xff] }
 0x2d8   :  { %3603 = vmatprep.subr.bf16.mxu0 %v7054_v26 }
 0x2da   :  { %3475 = vmatpush1.bf16.msra.mxu1 %v7051_v51 }
 0x2db   :  { %3604 = vmatpush1.bf16.msra.mxu0 %v7053_v4 }
 0x2dc   :  { %4150 = vmatprep.subr.bf16.mxu0 %v8539_v32 }
 0x2dd   :  { %3477 = vmatmul.mubr.bf16.vlgmr.msra.gmra.mrb[8].mxu1 %v9564_v55 }
 0x2de   :  { %3606 = vmatmul.mubr.bf16.vlgmr.msra.gmra.mrb[12].mxu0 %v9564_v55  ;;  %7059 = vmatprep.mubr.msk.bf16.mxu1 %vm4090_vm7, %v8262_v0 }
 0x2df   :  { %7061 = vmatprep.mubr.msk.bf16.mxu0 %vm4090_vm7, %v8262_v0 }
 0x2f0   :  { %v3220_v22 = vpop.f32.mrb[4].mxu1 }
 0x2f1   :  { %v3349_v57 = vpop.f32.mrb[8].mxu0  ;;  %v3222_v59 = vpop.f32.mrb[5].mxu1 }
 0x2f2   :  { %v3351_v56 = vpop.f32.mrb[9].mxu0  ;;  %v3224_v13 = vpop.f32.mrb[6].mxu1  ;;  %v10364_v43 = vpack.i.bf16 %v3349_v57, %v3222_v59 }
 0x2f3   :  { %v3353_v2 = vpop.f32.mrb[10].mxu0  ;;  %v3226_v39 = vpop.f32.mrb[7].mxu1  ;;  %v3999_v23 = vpack.c.bf16 %v3224_v13, %v3220_v22  ;;  %v10366_v41 = vpack.i.bf16 %v3224_v13, %v3220_v22 }
 0x2f4   :  { %v3355_v18 = vpop.f32.mrb[11].mxu0  ;;  %7618 = vrot.lane.b32.xlu0 %v10364_v43, %s8540_s4  ;;  %7608 = vrot.lane.b32.xlu1 %v10364_v43, %s8525_s27  ;;  %v4001_v55 = vpack.c.bf16 %v3353_v2, %v3349_v57  ;;  %v4000_v42 = vpack.c.bf16 %v3226_v39, %v3222_v59  ;;  %v10372_v19 = vpack.i.bf16 %v3353_v2, %v3226_v39 }
 0x2f5   :  { %v10375_v31 = vpack.i.bf16 %v3355_v18, %v3351_v56 }
 0x2f6   :  { %4151 = vmatpush1.bf16.msra.mxu0 %v4001_v55  ;;  %4097 = vmatprep.subr.bf16.mxu1 %v4000_v42 }
 0x2f7   :  { %4098 = vmatpush1.bf16.msra.mxu1 %v3999_v23  ;;  %4152 = vmatprep.subr.bf16.mxu0 %v8539_v32 }
 0x2f8   :  { %7623 = vrot.lane.b32.xlu0 %v10364_v43, %s8541_s1  ;;  %7613 = vrot.lane.b32.xlu1 %v10364_v43, %s8529_s14 }
 0x2fc   :  { %7638 = vrot.lane.b32.xlu0 %v10366_v41, %s8540_s4  ;;  %7628 = vrot.lane.b32.xlu1 %v10366_v41, %s8525_s27 }
 0x300   :  { %7643 = vrot.lane.b32.xlu0 %v10366_v41, %s8541_s1  ;;  %7633 = vrot.lane.b32.xlu1 %v10366_v41, %s8529_s14 }
 0x304   :  { %7658 = vrot.lane.b32.xlu1 %v10372_v19, %s8540_s4  ;;  %7648 = vrot.lane.b32.xlu0 %v10372_v19, %s8525_s27 }
 0x308   :  { %7663 = vrot.lane.b32.xlu1 %v10372_v19, %s8541_s1  ;;  %7653 = vrot.lane.b32.xlu0 %v10372_v19, %s8529_s14 }
 0x366   :  { %v10397_v37 = vpop.permute.xlu0 %7618  ;;  %v10403_v45 = vpop.permute.xlu1 %7608 }
 0x367   :  { %v7611_v60 = vunpack.i.h.bf16 %v10403_v45  ;;  %v7610_v11 = vunpack.i.l.bf16 %v10403_v45  ;;  %v7621_v55 = vunpack.i.h.bf16 %v10397_v37 }
 0x369   :  { %v3641_v54 = vsel %vm112_vm0, %v7610_v11, %v7611_v60 }
 0x36a   :  { %v10399_v5 = vpop.permute.xlu0 %7623  ;;  %v10407_v58 = vpop.permute.xlu1 %7613 }
 0x36b   :  { %v7616_v42 = vunpack.i.h.bf16 %v10407_v58 }
 0x36e   :  { %v10401_v30 = vpop.permute.xlu0 %7638  ;;  %v7629_v48 = vpop.permute.xlu1 %7628 }
 0x36f   :  { %v7631_v6 = vunpack.i.h.bf16 %v7629_v48  ;;  %v7630_v3 = vunpack.i.l.bf16 %v7629_v48  ;;  %v7640_v0 = vunpack.i.l.bf16 %v10401_v30 }
 0x371   :  { %v3640_v29 = vsel %vm112_vm0, %v7630_v3, %v7610_v11 }
 0x372   :  { %v10405_v28 = vpop.permute.xlu0 %7643  ;;  %v7634_v34 = vpop.permute.xlu1 %7633 }
 0x373   :  { %v7646_v45 = vunpack.i.h.bf16 %v10405_v28 }
 0x376   :  { %v10409_v16 = vpop.permute.xlu0 %7648  ;;  %v10513_v26 = vpop.permute.xlu1 %7658 }
 0x377   :  { %v7651_v49 = vunpack.i.h.bf16 %v10409_v16  ;;  %v7650_v17 = vunpack.i.l.bf16 %v10409_v16 }
 0x379   :  { %v3644_v53 = vsel %vm112_vm0, %v7650_v17, %v7651_v49  ;;  %v3643_v47 = vsel %vm112_vm0, %v7631_v6, %v7650_v17  ;;  %v7615_v17 = vunpack.i.l.bf16 %v10407_v58  ;;  %v7620_v6 = vunpack.i.l.bf16 %v10397_v37 }
 0x37a   :  { %v4006_v40 = vpack.c.bf16 %v3644_v53, %v3641_v54  ;;  %v4005_v12 = vpack.c.bf16 %v3643_v47, %v3640_v29  ;;  %v10515_v51 = vpop.permute.xlu1 %7663  ;;  %v10517_v4 = vpop.permute.xlu0 %7653  ;;  %v7660_v54 = vunpack.i.l.bf16 %v10513_v26 }
 0x37b   :  { %v7656_v2 = vunpack.i.h.bf16 %v10517_v4  ;;  %v7655_v39 = vunpack.i.l.bf16 %v10517_v4  ;;  %v3705_v3 = vsel %vm151_vm3, %v7615_v17, %v7616_v42  ;;  %v3734_v29 = vsel %vm3732_vm9, %v7620_v6, %v7621_v55 }
 0x37d   :  { %v3708_v47 = vsel %vm151_vm3, %v7655_v39, %v7656_v2 }
 0x3b0   :  { %v3478_v7 = vpop.f32.mrb[8].mxu1 }
 0x3b1   :  { %v3607_v50 = vpop.f32.mrb[12].mxu0  ;;  %v3480_v14 = vpop.f32.mrb[9].mxu1 }
 0x3b2   :  { %v3609_v44 = vpop.f32.mrb[13].mxu0  ;;  %v3482_v8 = vpop.f32.mrb[10].mxu1  ;;  %v7672_v25 = vpack.i.bf16 %v3607_v50, %v3480_v14 }
 0x3b3   :  { %v3611_v36 = vpop.f32.mrb[14].mxu0  ;;  %v3484_v63 = vpop.f32.mrb[11].mxu1  ;;  %v4002_v15 = vpack.c.bf16 %v3482_v8, %v3478_v7  ;;  %v7682_v61 = vpack.i.bf16 %v3482_v8, %v3478_v7  ;;  %v7661_v7 = vunpack.i.h.bf16 %v10513_v26  ;;  %v7636_v8 = vunpack.i.h.bf16 %v7634_v34 }
 0x3b4   :  { %v3613_v10 = vpop.f32.mrb[15].mxu0  ;;  %7673 = vrot.lane.b32.xlu1 %v7672_v25, %s8540_s4  ;;  %7668 = vrot.lane.b32.xlu0 %v7672_v25, %s8525_s27  ;;  %v4004_v21 = vpack.c.bf16 %v3611_v36, %v3607_v50  ;;  %v4003_v1 = vpack.c.bf16 %v3484_v63, %v3480_v14  ;;  %v7692_v24 = vpack.i.bf16 %v3611_v36, %v3484_v63 }
 0x3b5   :  { %v7802_v62 = vpack.i.bf16 %v3613_v10, %v3609_v44  ;;  %v7641_v10 = vunpack.i.h.bf16 %v10401_v30 }
 0x3b6   :  { %4153 = vmatpush1.bf16.msra.mxu0 %v4004_v21  ;;  %4099 = vmatprep.subr.bf16.mxu1 %v4003_v1  ;;  %v3707_v21 = vsel %vm151_vm3, %v7636_v8, %v7655_v39  ;;  %v4012_v1 = vpack.c.bf16 %v3708_v47, %v3705_v3 }
 0x3b7   :  { %4100 = vmatpush1.bf16.msra.mxu1 %v4002_v15  ;;  %4154 = vmatprep.subr.bf16.mxu0 %v8539_v32 }
 0x3b8   :  { %7678 = vrot.lane.b32.xlu1 %v7672_v25, %s8541_s1  ;;  %7683 = vrot.lane.b32.xlu0 %v7682_v61, %s8525_s27 }
 0x3b9   :  { %4101 = vmatprep.subr.bf16.mxu1 %v4006_v40 }
 0x3bb   :  { %4102 = vmatpush1.bf16.msra.mxu1 %v4005_v12  ;;  %v7625_v12 = vunpack.i.l.bf16 %v10399_v5 }
 0x3bc   :  { %7688 = vrot.lane.b32.xlu1 %v7682_v61, %s8540_s4  ;;  %7703 = vrot.lane.b32.xlu0 %v10364_v43, %s8542_s21 }
 0x3c0   :  { %7713 = vrot.lane.b32.xlu0 %v10366_v41, %s8542_s21  ;;  %7693 = vrot.lane.b32.xlu1 %v7692_v24, %s8525_s27 }
 0x3c4   :  { %7723 = vrot.lane.b32.xlu0 %v10372_v19, %s8527_s29  ;;  %7698 = vrot.lane.b32.xlu1 %v7682_v61, %s8541_s1 }
 0x3c8   :  { %7733 = vrot.lane.b32.xlu0 %v10375_v31, %s8525_s27  ;;  %7708 = vrot.lane.b32.xlu1 %v10372_v19, %s8542_s21 }
 0x3cc   :  { %7753 = vrot.lane.b32.xlu0 %v7692_v24, %s8540_s4  ;;  %7718 = vrot.lane.b32.xlu1 %v10364_v43, %s8527_s29 }
 0x3d0   :  { %7758 = vrot.lane.b32.xlu0 %v10372_v19, %s8528_s30  ;;  %7728 = vrot.lane.b32.xlu1 %v10366_v41, %s8527_s29 }
 0x3d4   :  { %7768 = vrot.lane.b32.xlu0 %v7692_v24, %s8541_s1  ;;  %7738 = vrot.lane.b32.xlu1 %v7672_v25, %s8527_s29 }
 0x3d8   :  { %7773 = vrot.lane.b32.xlu0 %v10375_v31, %s8529_s14  ;;  %7743 = vrot.lane.b32.xlu1 %v7682_v61, %s8527_s29 }
 0x3dc   :  { %7788 = vrot.lane.b32.xlu0 %v10375_v31, %s8540_s4  ;;  %7748 = vrot.lane.b32.xlu1 %v10364_v43, %s8528_s30 }
 0x3e0   :  { %7798 = vrot.lane.b32.xlu0 %v7692_v24, %s8527_s29  ;;  %7763 = vrot.lane.b32.xlu1 %v10366_v41, %s8528_s30 }
 0x3e4   :  { %7803 = vrot.lane.b32.xlu0 %v7802_v62, %s8525_s27  ;;  %7778 = vrot.lane.b32.xlu1 %v7672_v25, %s8528_s30  ;;  %v7635_v25 = vunpack.i.l.bf16 %v7634_v34  ;;  %v7666_v34 = vunpack.i.h.bf16 %v10515_v51 }
 0x3e8   :  { %7808 = vrot.lane.b32.xlu0 %v7692_v24, %s8528_s30  ;;  %7783 = vrot.lane.b32.xlu1 %v7682_v61, %s8528_s30  ;;  %v3737_v24 = vsel %vm3732_vm9, %v7660_v54, %v7661_v7 }
 0x3ec   :  { %7813 = vrot.lane.b32.xlu0 %v10372_v19, %s8531_s16  ;;  %7793 = vrot.lane.b32.xlu1 %v10364_v43, %s8531_s16 }
 0x3f0   :  { %7823 = vrot.lane.b32.xlu0 %v7802_v62, %s8540_s4  ;;  %7818 = vrot.lane.b32.xlu1 %v10366_v41, %s8531_s16 }
 0x3f4   :  { %7833 = vrot.lane.b32.xlu0 %v7802_v62, %s8541_s1  ;;  %7828 = vrot.lane.b32.xlu1 %v10375_v31, %s8541_s1 }
 0x3f8   :  { %7843 = vrot.lane.b32.xlu0 %v10375_v31, %s8527_s29  ;;  %7838 = vrot.lane.b32.xlu1 %v10375_v31, %s8542_s21 }
 0x3fc   :  { %7853 = vrot.lane.b32.xlu0 %v10375_v31, %s8528_s30  ;;  %7848 = vrot.lane.b32.xlu1 %v7802_v62, %s8527_s29  ;;  %s8547_s29 = smov 114  }
 0x400   :  { %7863 = vrot.lane.b32.xlu0 %v10375_v31, %s8531_s16  ;;  %7858 = vrot.lane.b32.xlu1 %v7802_v62, %s8528_s30  ;;  %v7626_v62 = vunpack.i.h.bf16 %v10399_v5 }
 0x404   :  { %4059 = vperm.xlu0 %7605, %v4049_v9   ;;  %4054 = vperm.xlu1 %7606, %v4048_v52   ;;  %v3704_v9 = vsel %vm151_vm3, %v7635_v25, %v7615_v17  ;;  %v3736_v52 = vsel %vm3732_vm9, %v7641_v10, %v7660_v54  ;;  %v7645_v25 = vunpack.i.l.bf16 %v10405_v28 }
 0x408   :  { %4222 = vperm.xlu0 %7605, %v4212_v35   ;;  %4217 = vperm.xlu1 %7606, %v4211_v20  }
 0x40c   :  { %4069 = vperm.xlu0 %7605, %v4051_v33   ;;  %4064 = vperm.xlu1 %7606, %v4050_v38  }
 0x410   :  { %4232 = vperm.xlu0 %7605, %v4214_v27   ;;  %4227 = vperm.xlu1 %7606, %v4213_v46   ;;  %v4011_v27 = vpack.c.bf16 %v3707_v21, %v3704_v9  ;;  %v4015_v46 = vpack.c.bf16 %v3737_v24, %v3734_v29 }
 0x426   :  { %v10519_v22 = vpop.permute.xlu1 %7673  ;;  %v10521_v57 = vpop.permute.xlu0 %7668 }
 0x427   :  { %v7671_v23 = vunpack.i.h.bf16 %v10521_v57  ;;  %v7670_v41 = vunpack.i.l.bf16 %v10521_v57  ;;  %v7676_v39 = vunpack.i.h.bf16 %v10519_v22  ;;  %v7675_v30 = vunpack.i.l.bf16 %v10519_v22  ;;  %v8270_v22 = vld [vmem:[%s12001_s8 + $0x4] ss:$24 sps:$4 sm:$0xff]  }
 0x429   :  { %v3677_v40 = vsel %vm112_vm0, %v7670_v41, %v7671_v23 }
 0x42a   :  { %v10523_v59 = vpop.permute.xlu1 %7678  ;;  %v7684_v56 = vpop.permute.xlu0 %7683 }
 0x42b   :  { %v7685_v18 = vunpack.i.l.bf16 %v7684_v56  ;;  %v7686_v11 = vunpack.i.h.bf16 %v7684_v56  ;;  %v7665_v56 = vunpack.i.l.bf16 %v10515_v51  ;;  %v7680_v24 = vunpack.i.l.bf16 %v10523_v59 }
 0x42d   :  { %v3676_v50 = vsel %vm112_vm0, %v7685_v18, %v7670_v41 }
 0x42e   :  { %v10525_v13 = vpop.permute.xlu1 %7688  ;;  %v10527_v43 = vpop.permute.xlu0 %7703 }
 0x42f   :  { %v7690_v41 = vunpack.i.l.bf16 %v10525_v13  ;;  %v7706_v29 = vunpack.i.h.bf16 %v10527_v43  ;;  %v7705_v9 = vunpack.i.l.bf16 %v10527_v43 }
 0x432   :  { %v10535_v19 = vpop.permute.xlu0 %7713  ;;  %v10537_v31 = vpop.permute.xlu1 %7693 }
 0x433   :  { %v7696_v48 = vunpack.i.h.bf16 %v10537_v31  ;;  %v7695_v53 = vunpack.i.l.bf16 %v10537_v31 }
 0x435   :  { %v3679_v14 = vsel %vm112_vm0, %v7686_v11, %v7695_v53  ;;  %v3680_v44 = vsel %vm112_vm0, %v7695_v53, %v7696_v48  ;;  %v3733_v11 = vsel %vm3732_vm9, %v7640_v0, %v7620_v6  ;;  %v3791_v6 = vsel %vm3789_vm15, %v7625_v12, %v7626_v62 }
 0x436   :  { %v10556_v36 = vpop.permute.xlu0 %7723  ;;  %v10558_v63 = vpop.permute.xlu1 %7698  ;;  %v4009_v15 = vpack.c.bf16 %v3680_v44, %v3677_v40  ;;  %v4008_v61 = vpack.c.bf16 %v3679_v14, %v3676_v50  ;;  %v7691_v50 = vunpack.i.h.bf16 %v10525_v13  ;;  %v3794_v13 = vsel %vm3789_vm15, %v7665_v56, %v7666_v34 }
 0x437   :  { %v3761_v40 = vsel %vm3732_vm9, %v7690_v41, %v7675_v30  ;;  %v4021_v0 = vpack.c.bf16 %v3794_v13, %v3791_v6 }
 0x438   :  { %4103 = vmatprep.subr.bf16.mxu1 %v4009_v15  ;;  %v3793_v15 = vsel %vm3789_vm15, %v7646_v45, %v7665_v56  ;;  %v7715_v45 = vunpack.i.l.bf16 %v10535_v19 }
 0x439   :  { %4104 = vmatpush1.bf16.msra.mxu1 %v4008_v61 }
 0x43a   :  { %v7734_v35 = vpop.permute.xlu0 %7733  ;;  %v10576_v20 = vpop.permute.xlu1 %7708  ;;  %4105 = vmatprep.subr.bf16.mxu1 %v4012_v1  ;;  %v7681_v1 = vunpack.i.h.bf16 %v10523_v59 }
 0x43b   :  { %v7736_v33 = vunpack.i.h.bf16 %v7734_v35  ;;  %v7735_v38 = vunpack.i.l.bf16 %v7734_v35  ;;  %v7711_v28 = vunpack.i.h.bf16 %v10576_v20  ;;  %v7710_v35 = vunpack.i.l.bf16 %v10576_v20  ;;  %v8280_v20 = vld [vmem:[%s12001_s8 + $0x60] ss:$24 sps:$4 sm:$0xff]  }
 0x43d   :  { %v3645_v18 = vsel %vm112_vm0, %v7651_v49, %v7736_v33  ;;  %v3642_v17 = vsel %vm112_vm0, %v7611_v60, %v7735_v38  ;;  %4106 = vmatpush1.bf16.msra.mxu1 %v4011_v27  ;;  %v4014_v49 = vpack.c.bf16 %v3736_v52, %v3733_v11  ;;  %v3762_v60 = vsel %vm3732_vm9, %v7675_v30, %v7676_v39 }
 0x43e   :  { %v10590_v53 = vpop.permute.xlu0 %7753  ;;  %v10592_v54 = vpop.permute.xlu1 %7718  ;;  %4107 = vmatprep.subr.bf16.mxu1 %v4015_v46  ;;  %v4007_v47 = vpack.c.bf16 %v3645_v18, %v3642_v17  ;;  %v7700_v52 = vunpack.i.l.bf16 %v10558_v63  ;;  %v3790_v33 = vsel %vm3789_vm15, %v7645_v25, %v7625_v12  ;;  %v7701_v46 = vunpack.i.h.bf16 %v10558_v63 }
 0x43f   :  { %v7756_v14 = vunpack.i.h.bf16 %v10590_v53  ;;  %v7755_v16 = vunpack.i.l.bf16 %v10590_v53  ;;  %v4020_v41 = vpack.c.bf16 %v3793_v15, %v3790_v33  ;;  %v3819_v17 = vsel %vm3789_vm15, %v7680_v24, %v7681_v1 }
 0x440   :  { %4155 = vmatpush1.bf16.msra.mxu0 %v4007_v47  ;;  %v3818_v18 = vsel %vm3789_vm15, %v7700_v52, %v7680_v24  ;;  %v3848_v12 = vsel %vm3846_vm13, %v7705_v9, %v7706_v29  ;;  %v3851_v11 = vsel %vm3846_vm13, %v7710_v35, %v7711_v28  ;;  %v7721_v63 = vunpack.i.h.bf16 %v10592_v54 }
 0x441   :  { %v3764_v44 = vsel %vm3732_vm9, %v7691_v50, %v7755_v16  ;;  %4108 = vmatpush1.bf16.msra.mxu1 %v4014_v49  ;;  %v3765_v8 = vsel %vm3732_vm9, %v7755_v16, %v7756_v14  ;;  %4156 = vmatprep.subr.bf16.mxu0 %v8539_v32  ;;  %v7720_v47 = vunpack.i.l.bf16 %v10592_v54  ;;  %v7716_v49 = vunpack.i.h.bf16 %v10535_v19  ;;  %v8286_v54 = vld [vmem:[%s12001_s8 + $0x90] ss:$24 sps:$4 sm:$0xff]  }
 0x442   :  { %v10615_v61 = vpop.permute.xlu0 %7758  ;;  %v7729_v3 = vpop.permute.xlu1 %7728  ;;  %v4018_v10 = vpack.c.bf16 %v3765_v8, %v3762_v60  ;;  %v4017_v21 = vpack.c.bf16 %v3764_v44, %v3761_v40  ;;  %v7726_v44 = vunpack.i.h.bf16 %v10556_v36  ;;  %v7725_v8 = vunpack.i.l.bf16 %v10556_v36 }
 0x443   :  { %v7731_v25 = vunpack.i.h.bf16 %v7729_v3  ;;  %v7730_v15 = vunpack.i.l.bf16 %v7729_v3  ;;  %v3876_v19 = vsel %vm234_vm2, %v7720_v47, %v7721_v63  ;;  %v3847_v24 = vsel %vm3846_vm13, %v7715_v45, %v7705_v9 }
 0x444   :  { %4109 = vmatprep.subr.bf16.mxu1 %v4018_v10  ;;  %v3850_v10 = vsel %vm3846_vm13, %v7716_v49, %v7710_v35  ;;  %v3879_v35 = vsel %vm234_vm2, %v7725_v8, %v7726_v44 }
 0x445   :  { %4110 = vmatpush1.bf16.msra.mxu1 %v4017_v21  ;;  %v4027_v21 = vpack.c.bf16 %v3851_v11, %v3848_v12  ;;  %v3878_v33 = vsel %vm234_vm2, %v7731_v25, %v7725_v8  ;;  %v3875_v3 = vsel %vm234_vm2, %v7730_v15, %v7720_v47  ;;  %v7761_v11 = vunpack.i.h.bf16 %v10615_v61 }
 0x446   :  { %v10625_v38 = vpop.permute.xlu0 %7768  ;;  %v10627_v27 = vpop.permute.xlu1 %7738  ;;  %4111 = vmatprep.subr.bf16.mxu1 %v4021_v0  ;;  %v7760_v47 = vunpack.i.l.bf16 %v10615_v61  ;;  %v4029_v45 = vpack.c.bf16 %v3878_v33, %v3875_v3 }
 0x447   :  { %v7771_v56 = vunpack.i.h.bf16 %v10625_v38  ;;  %v7770_v30 = vunpack.i.l.bf16 %v10625_v38 }
 0x449   :  { %v3821_v50 = vsel %vm3789_vm15, %v7701_v46, %v7770_v30  ;;  %4112 = vmatpush1.bf16.msra.mxu1 %v4020_v41  ;;  %v3822_v16 = vsel %vm3789_vm15, %v7770_v30, %v7771_v56  ;;  %v4026_v46 = vpack.c.bf16 %v3850_v10, %v3847_v24  ;;  %v7741_v30 = vunpack.i.h.bf16 %v10627_v27 }
 0x44a   :  { %v10650_v60 = vpop.permute.xlu0 %7773  ;;  %v7744_v6 = vpop.permute.xlu1 %7743  ;;  %v4024_v13 = vpack.c.bf16 %v3822_v16, %v3819_v17  ;;  %v4023_v40 = vpack.c.bf16 %v3821_v50, %v3818_v18  ;;  %v7740_v41 = vunpack.i.l.bf16 %v10627_v27  ;;  %v4030_v18 = vpack.c.bf16 %v3879_v35, %v3876_v19 }
 0x44b   :  { %v7745_v9 = vunpack.i.l.bf16 %v7744_v6  ;;  %v7746_v50 = vunpack.i.h.bf16 %v7744_v6  ;;  %v7776_v15 = vunpack.i.h.bf16 %v10650_v60  ;;  %v7775_v10 = vunpack.i.l.bf16 %v10650_v60 }
 0x44c   :  { %4113 = vmatprep.subr.bf16.mxu1 %v4024_v13 }
 0x44d   :  { %4114 = vmatpush1.bf16.msra.mxu1 %v4023_v40  ;;  %v3903_v6 = vsel %vm234_vm2, %v7745_v9, %v7740_v41 }
 0x44e   :  { %v10659_v0 = vpop.permute.xlu0 %7788  ;;  %v10661_v52 = vpop.permute.xlu1 %7748  ;;  %4115 = vmatprep.subr.bf16.mxu1 %v4027_v21  ;;  %v3904_v21 = vsel %vm234_vm2, %v7740_v41, %v7741_v30  ;;  %v3935_v41 = vsel %vm12033_vm4, %v7760_v47, %v7761_v11 }
 0x44f   :  { %v12013_v17 = vunpack.i.h.bf16 %v10661_v52  ;;  %v7750_v12 = vunpack.i.l.bf16 %v10661_v52 }
 0x451   :  { %4116 = vmatpush1.bf16.msra.mxu1 %v4026_v46  ;;  %v3932_v33 = vsel %vm12032_vm8, %v7750_v12, %v12013_v17  ;;  %vm12041_vm8 = vmmov %vm12040_vm14 }
 0x452   :  { %v10674_v16 = vpop.permute.xlu0 %7798  ;;  %v7764_v49 = vpop.permute.xlu1 %7763  ;;  %4117 = vmatprep.subr.bf16.mxu1 %v4030_v18  ;;  %v4036_v17 = vpack.c.bf16 %v3935_v41, %v3932_v33  ;;  %vm12042_vm4 = vmmov %vm12041_vm8 }
 0x453   :  { %v7801_v13 = vunpack.i.h.bf16 %v10674_v16  ;;  %v7800_v40 = vunpack.i.l.bf16 %v10674_v16  ;;  %v7766_v8 = vunpack.i.h.bf16 %v7764_v49  ;;  %v7765_v25 = vunpack.i.l.bf16 %v7764_v49  ;;  %v8292_v16 = vld [vmem:[%s12001_s8 + $0xc0] ss:$24 sps:$4 sm:$0xff]  }
 0x455   :  { %v3906_v19 = vsel %vm234_vm2, %v7746_v50, %v7800_v40  ;;  %4118 = vmatpush1.bf16.msra.mxu1 %v4029_v45  ;;  %v3907_v24 = vsel %vm234_vm2, %v7800_v40, %v7801_v13  ;;  %v3934_v18 = vsel %vm12034_vm1, %v7766_v8, %v7760_v47  ;;  %v3931_v9 = vsel %vm12035_vm5, %v7765_v25, %v7750_v12  ;;  %vm12043_vm1 = vmmov %vm12042_vm4 }
 0x456   :  { %v7804_v3 = vpop.permute.xlu0 %7803  ;;  %v10691_v46 = vpop.permute.xlu1 %7778  ;;  %v4033_v60 = vpack.c.bf16 %v3907_v24, %v3904_v21  ;;  %v4032_v35 = vpack.c.bf16 %v3906_v19, %v3903_v6  ;;  %v3709_v21 = vsel %vm151_vm3, %v7656_v2, %v7776_v15  ;;  %v3706_v6 = vsel %vm151_vm3, %v7616_v42, %v7775_v10 }
 0x457   :  { %v7806_v50 = vunpack.i.h.bf16 %v7804_v3  ;;  %v7805_v49 = vunpack.i.l.bf16 %v7804_v3  ;;  %v7781_v45 = vunpack.i.h.bf16 %v10691_v46  ;;  %v7780_v40 = vunpack.i.l.bf16 %v10691_v46 }
 0x458   :  { %4119 = vmatprep.subr.bf16.mxu1 %v4033_v60  ;;  %v7791_v8 = vunpack.i.h.bf16 %v10659_v0  ;;  %v7790_v25 = vunpack.i.l.bf16 %v10659_v0  ;;  %v4035_v15 = vpack.c.bf16 %v3934_v18, %v3931_v9 }
 0x459   :  { %v3678_v12 = vsel %vm112_vm0, %v7671_v23, %v7805_v49  ;;  %v3681_v47 = vsel %vm112_vm0, %v7696_v48, %v7806_v50  ;;  %4120 = vmatpush1.bf16.msra.mxu1 %v4032_v35  ;;  %v3960_v31 = vsel %vm12036_vm10, %v7780_v40, %v7781_v45  ;;  %v4013_v48 = vpack.c.bf16 %v3709_v21, %v3706_v6  ;;  %vm12049_vm10 = vmmov %vm12043_vm1 }
 0x45a   :  { %v10714_v4 = vpop.permute.xlu0 %7808  ;;  %v7784_v2 = vpop.permute.xlu1 %7783  ;;  %4121 = vmatprep.subr.bf16.mxu1 %v4036_v17  ;;  %v4010_v58 = vpack.c.bf16 %v3681_v47, %v3678_v12  ;;  %v3738_v24 = vsel %vm3732_vm9, %v7661_v7, %v7791_v8  ;;  %v3735_v33 = vsel %vm3732_vm9, %v7621_v55, %v7790_v25 }
 0x45b   :  { %v7811_v42 = vunpack.i.h.bf16 %v10714_v4  ;;  %v7810_v57 = vunpack.i.l.bf16 %v10714_v4  ;;  %v7786_v23 = vunpack.i.h.bf16 %v7784_v2  ;;  %v7785_v10 = vunpack.i.l.bf16 %v7784_v2  ;;  %v8304_v4 = vld [vmem:[%s12001_s8 + $0x120] ss:$24 sps:$4 sm:$0xff]  }
 0x45c   :  { %4157 = vmatpush1.bf16.msra.mxu0 %v4010_v58  ;;  %v4016_v21 = vpack.c.bf16 %v3738_v24, %v3735_v33 }
 0x45d   :  { %v3962_v0 = vsel %vm12037_vm11, %v7786_v23, %v7810_v57  ;;  %v3959_v19 = vsel %vm12038_vm12, %v7785_v10, %v7780_v40  ;;  %4122 = vmatpush1.bf16.msra.mxu1 %v4035_v15  ;;  %4158 = vmatprep.subr.bf16.mxu0 %v8539_v32  ;;  %v3963_v17 = vsel %vm12039_vm6, %v7810_v57, %v7811_v42  ;;  %vm12050_vm11 = vmmov %vm12043_vm1 }
 0x45e   :  { %v10733_v3 = vpop.permute.xlu0 %7813  ;;  %v10735_v60 = vpop.permute.xlu1 %7793  ;;  %v4039_v35 = vpack.c.bf16 %v3963_v17, %v3960_v31  ;;  %v4038_v41 = vpack.c.bf16 %v3962_v0, %v3959_v19  ;;  %v10768_v19 = vld [vmem:[%s11998_s5 + $0x14] ss:$8 sps:$4 sm:$0xff]  }
 0x45f   :  { %v7816_v18 = vunpack.i.h.bf16 %v10733_v3  ;;  %v7815_v9 = vunpack.i.l.bf16 %v10733_v3  ;;  %v7796_v50 = vunpack.i.h.bf16 %v10735_v60  ;;  %v7795_v26 = vunpack.i.l.bf16 %v10735_v60  ;;  %v8310_v3 = vld [vmem:[%s12001_s8 + $0x150] ss:$24 sps:$4 sm:$0xff]   ;;  %v8318_v60 = vld [vmem:[%s12001_s8 + $0x184] ss:$24 sps:$4 sm:$0xff]  }
 0x460   :  { %4123 = vmatprep.subr.bf16.mxu1 %v4039_v35  ;;  %4159 = vmatpush1.bf16.msra.mxu0 %v4013_v48 }
 0x461   :  { %4124 = vmatpush1.bf16.msra.mxu1 %v4038_v41  ;;  %4160 = vmatprep.subr.bf16.mxu0 %v8539_v32  ;;  %v3988_v37 = vsel %vm12040_vm14, %v7795_v26, %v7796_v50  ;;  %v3991_v55 = vsel %vm12041_vm8, %v7815_v9, %v7816_v18  ;;  %v8268_v41 = vld [vmem:[%s12001_s8] ss:$24 sps:$4 sm:$0xff]  }
 0x462   :  { %v7824_v7 = vpop.permute.xlu0 %7823  ;;  %v7819_v49 = vpop.permute.xlu1 %7818  ;;  %v4042_v40 = vpack.c.bf16 %v3991_v55, %v3988_v37 }
 0x463   :  { %v7826_v6 = vunpack.i.h.bf16 %v7824_v7  ;;  %v7825_v12 = vunpack.i.l.bf16 %v7824_v7  ;;  %v7821_v47 = vunpack.i.h.bf16 %v7819_v49  ;;  %v7820_v8 = vunpack.i.l.bf16 %v7819_v49  ;;  %v10805_v7 = vld [vmem:[%s11998_s5 + $0x10] ss:$8 sps:$4 sm:$0xff]   ;;  %v8282_v49 = vld [vmem:[%s12001_s8 + $0x64] ss:$24 sps:$4 sm:$0xff]  }
 0x464   :  { %4125 = vmatprep.subr.bf16.mxu1 %v4042_v40  ;;  %4161 = vmatpush1.bf16.msra.mxu0 %v4016_v21 }
 0x465   :  { %v3763_v25 = vsel %vm3732_vm9, %v7676_v39, %v7825_v12  ;;  %v3766_v2 = vsel %vm3732_vm9, %v7756_v14, %v7826_v6  ;;  %v3990_v58 = vsel %vm12042_vm4, %v7821_v47, %v7815_v9  ;;  %v3987_v15 = vsel %vm12043_vm1, %v7820_v8, %v7795_v26  ;;  %4162 = vmatprep.subr.bf16.mxu0 %v8539_v32  ;;  %v10763_v14 = vld [vmem:[%s11998_s5] ss:$8 sps:$4 sm:$0xff]   ;;  %v8288_v12 = vld [vmem:[%s12001_s8 + $0x94] ss:$24 sps:$4 sm:$0xff]   ;;  %vm12045_vm9 = vmmov %vm12035_vm5 }
 0x466   :  { %v7834_v57 = vpop.permute.xlu0 %7833  ;;  %v7829_v23 = vpop.permute.xlu1 %7828  ;;  %v4041_v10 = vpack.c.bf16 %v3990_v58, %v3987_v15  ;;  %v4019_v31 = vpack.c.bf16 %v3766_v2, %v3763_v25  ;;  %v8294_v2 = vld [vmem:[%s12001_s8 + $0xc4] ss:$24 sps:$4 sm:$0xff]  }
 0x467   :  { %v7836_v48 = vunpack.i.h.bf16 %v7834_v57  ;;  %v7835_v39 = vunpack.i.l.bf16 %v7834_v57  ;;  %v7831_v0 = vunpack.i.h.bf16 %v7829_v23  ;;  %v7830_v53 = vunpack.i.l.bf16 %v7829_v23 }
 0x468   :  { %4126 = vmatpush1.bf16.msra.mxu1 %v4041_v10  ;;  %4163 = vmatpush1.bf16.msra.mxu0 %v4019_v31  ;;  %v8300_v10 = vld [vmem:[%s12001_s8 + $0xf4] ss:$24 sps:$4 sm:$0xff]  }
 0x469   :  { %v3795_v17 = vsel %vm3789_vm15, %v7666_v34, %v7831_v0  ;;  %v3792_v24 = vsel %vm3789_vm15, %v7626_v62, %v7830_v53  ;;  %4164 = vmatprep.subr.bf16.mxu0 %v8539_v32  ;;  %5129 = vmatprep.subr.bf16.mxu1 %v8270_v22  ;;  %v3820_v9 = vsel %vm3789_vm15, %v7681_v1, %v7835_v39  ;;  %v8276_v62 = vld [vmem:[%s12001_s8 + $0x34] ss:$24 sps:$4 sm:$0xff]   ;;  %v8274_v1 = vld [vmem:[%s12001_s8 + $0x30] ss:$24 sps:$4 sm:$0xff]   ;;  %v8306_v0 = vld [vmem:[%s12001_s8 + $0x124] ss:$24 sps:$4 sm:$0xff]  }
 0x46a   :  { %v7839_v33 = vpop.permute.xlu1 %7838  ;;  %v4022_v35 = vpack.c.bf16 %v3795_v17, %v3792_v24  ;;  %v3823_v51 = vsel %vm3789_vm15, %v7771_v56, %v7836_v48  ;;  %v7844_v26 = vpop.permute.xlu0 %7843  ;;  %v8273_v17 = vld [vmem:[%s12001_s8 + $0xc] ss:$24 sps:$4 sm:$0xff]  }
 0x46b   :  { %v7841_v5 = vunpack.i.h.bf16 %v7839_v33  ;;  %v7840_v34 = vunpack.i.l.bf16 %v7839_v33  ;;  %4130 = vmatmul.mubr.bf16.vlgmr.msra.gmra.mrb[12].mxu1 %v10763_v14  ;;  %v4025_v59 = vpack.c.bf16 %v3823_v51, %v3820_v9  ;;  %v7846_v38 = vunpack.i.h.bf16 %v7844_v26  ;;  %v8316_v33 = vld [vmem:[%s12001_s8 + $0x180] ss:$24 sps:$4 sm:$0xff]   ;;  %v8285_v9 = vld [vmem:[%s12001_s8 + $0x6c] ss:$24 sps:$4 sm:$0xff]  }
 0x46c   :  { %4165 = vmatpush1.bf16.msra.mxu0 %v4022_v35  ;;  %7060 = vmatprep.mubr.msk.bf16.mxu1 %vm4090_vm7, %v10768_v19  ;;  %v7845_v56 = vunpack.i.l.bf16 %v7844_v26  ;;  %v8324_v35 = vld [vmem:[%s12001_s8 + $0x1b4] ss:$24 sps:$4 sm:$0xff]   ;;  %v8283_v51 = vld [vmem:[%s12001_s8 + $0x68] ss:$24 sps:$4 sm:$0xff]   ;;  %v8289_v26 = vld [vmem:[%s12001_s8 + $0x98] ss:$24 sps:$4 sm:$0xff]  }
 0x46d   :  { %4166 = vmatprep.subr.bf16.mxu0 %v8539_v32  ;;  %5130 = vmatpush1.bf16.msra.mxu1 %v8268_v41  ;;  %v3849_v37 = vsel %vm3846_vm13, %v7706_v29, %v7840_v34  ;;  %v3852_v55 = vsel %vm3846_vm13, %v7711_v28, %v7841_v5  ;;  %v3880_v29 = vsel %vm234_vm2, %v7726_v44, %v7846_v38  ;;  %v8277_v41 = vld [vmem:[%s12001_s8 + $0x38] ss:$24 sps:$4 sm:$0xff]   ;;  %v8291_v5 = vld [vmem:[%s12001_s8 + $0x9c] ss:$24 sps:$4 sm:$0xff]  }
 0x46e   :  { %5131 = vmatprep.subr.bf16.mxu1 %v8276_v62  ;;  %v7849_v40 = vpop.permute.xlu1 %7848  ;;  %v4028_v43 = vpack.c.bf16 %v3852_v55, %v3849_v37  ;;  %v3877_v28 = vsel %vm234_vm2, %v7721_v63, %v7845_v56  ;;  %v7854_v47 = vpop.permute.xlu0 %7853  ;;  %v8328_v34 = vld [vmem:[%s12001_s8 + $0x1e0] ss:$24 sps:$4 sm:$0xff]   ;;  %v8336_v62 = vld [vmem:[%s12001_s8 + $0x214] ss:$24 sps:$4 sm:$0xff]   ;;  %v8342_v38 = vld [vmem:[%s12001_s8 + $0x244] ss:$24 sps:$4 sm:$0xff]  }
 0x46f   :  { %v7851_v21 = vunpack.i.h.bf16 %v7849_v40  ;;  %v7850_v6 = vunpack.i.l.bf16 %v7849_v40  ;;  %v4031_v36 = vpack.c.bf16 %v3880_v29, %v3877_v28  ;;  %v7856_v63 = vunpack.i.h.bf16 %v7854_v47  ;;  %v8295_v56 = vld [vmem:[%s12001_s8 + $0xc8] ss:$24 sps:$4 sm:$0xff]   ;;  %v8303_v37 = vld [vmem:[%s12001_s8 + $0xfc] ss:$24 sps:$4 sm:$0xff]   ;;  %v8309_v40 = vld [vmem:[%s12001_s8 + $0x12c] ss:$24 sps:$4 sm:$0xff]  }
 0x470   :  { %4167 = vmatpush1.bf16.msra.mxu0 %v4025_v59  ;;  %v7855_v44 = vunpack.i.l.bf16 %v7854_v47  ;;  %v8297_v59 = vld [vmem:[%s12001_s8 + $0xcc] ss:$24 sps:$4 sm:$0xff]   ;;  %v8340_v55 = vld [vmem:[%s12001_s8 + $0x240] ss:$24 sps:$4 sm:$0xff]   ;;  %v8315_v29 = vld [vmem:[%s12001_s8 + $0x15c] ss:$24 sps:$4 sm:$0xff]  }
 0x471   :  { %4168 = vmatprep.subr.bf16.mxu0 %v8539_v32  ;;  %5132 = vmatpush1.bf16.msra.mxu1 %v8274_v1  ;;  %v3908_v8 = vsel %vm234_vm2, %v7801_v13, %v7851_v21  ;;  %v3905_v25 = vsel %vm234_vm2, %v7741_v30, %v7850_v6  ;;  %v12044_v13 = vunpack.i.h.bf16 %v10661_v52  ;;  %vm12046_vm2 = vmmov %vm12035_vm5  ;;  %v8298_v52 = vld [vmem:[%s12001_s8 + $0xf0] ss:$24 sps:$4 sm:$0xff]   ;;  %v8321_v21 = vld [vmem:[%s12001_s8 + $0x18c] ss:$24 sps:$4 sm:$0xff]  }
 0x472   :  { %5133 = vmatprep.subr.bf16.mxu1 %v8282_v49  ;;  %v7859_v58 = vpop.permute.xlu1 %7858  ;;  %v4034_v15 = vpack.c.bf16 %v3908_v8, %v3905_v25  ;;  %v3936_v30 = vsel %vm12046_vm2, %v7761_v11, %v7856_v63  ;;  %v7864_v31 = vpop.permute.xlu0 %7863  ;;  %vm12047_vm15 = vmmov %vm12046_vm2  ;;  %v8334_v1 = vld [vmem:[%s12001_s8 + $0x210] ss:$24 sps:$4 sm:$0xff]   ;;  %v8339_v63 = vld [vmem:[%s12001_s8 + $0x21c] ss:$24 sps:$4 sm:$0xff]  }
 0x473   :  { %4140 = vmatmul.mubr.bf16.gmra.mrb[16].mxu1 %v10805_v7  ;;  %v3933_v27 = vsel %vm12045_vm9, %v12044_v13, %v7855_v44  ;;  %v7861_v57 = vunpack.i.h.bf16 %v7859_v58  ;;  %v7860_v23 = vunpack.i.l.bf16 %v7859_v58  ;;  %v7866_v61 = vunpack.i.h.bf16 %v7864_v31  ;;  %vm12048_vm5 = vmmov %vm12046_vm2  ;;  %v8301_v49 = vld [vmem:[%s12001_s8 + $0xf8] ss:$24 sps:$4 sm:$0xff]   ;;  %v8319_v6 = vld [vmem:[%s12001_s8 + $0x188] ss:$24 sps:$4 sm:$0xff]  }
 0x474   :  { %4169 = vmatpush1.bf16.msra.mxu0 %v4028_v43  ;;  %v4037_v22 = vpack.c.bf16 %v3936_v30, %v3933_v27  ;;  %v7865_v48 = vunpack.i.l.bf16 %v7864_v31  ;;  %v8346_v43 = vld [vmem:[%s12001_s8 + $0x270] ss:$24 sps:$4 sm:$0xff]   ;;  %v8345_v8 = vld [vmem:[%s12001_s8 + $0x24c] ss:$24 sps:$4 sm:$0xff]  }
 0x475   :  { %4170 = vmatprep.subr.bf16.mxu0 %v8539_v32  ;;  %5134 = vmatpush1.bf16.msra.mxu1 %v8280_v20  ;;  %v3964_v11 = vsel %vm12047_vm15, %v7811_v42, %v7861_v57  ;;  %v3961_v39 = vsel %vm12048_vm5, %v7781_v45, %v7860_v23  ;;  %v3992_v45 = vsel %vm12050_vm11, %v7816_v18, %v7866_v61  ;;  %v8312_v42 = vld [vmem:[%s12001_s8 + $0x154] ss:$24 sps:$4 sm:$0xff]   ;;  %v8271_v18 = vld [vmem:[%s12001_s8 + $0x8] ss:$24 sps:$4 sm:$0xff]   ;;  %v8313_v28 = vld [vmem:[%s12001_s8 + $0x158] ss:$24 sps:$4 sm:$0xff]  }
 0x476   :  { %5135 = vmatprep.subr.bf16.mxu1 %v8288_v12  ;;  %v4040_v53 = vpack.c.bf16 %v3964_v11, %v3961_v39  ;;  %v3989_v46 = vsel %vm12049_vm10, %v7796_v50, %v7865_v48  ;;  %v8279_v50 = vld [vmem:[%s12001_s8 + $0x3c] ss:$24 sps:$4 sm:$0xff]   ;;  %v8307_v20 = vld [vmem:[%s12001_s8 + $0x128] ss:$24 sps:$4 sm:$0xff]   ;;  %v8325_v47 = vld [vmem:[%s12001_s8 + $0x1b8] ss:$24 sps:$4 sm:$0xff]  }
 0x477   :  { %v4043_v24 = vpack.c.bf16 %v3992_v45, %v3989_v46  ;;  %v8327_v12 = vld [vmem:[%s12001_s8 + $0x1bc] ss:$24 sps:$4 sm:$0xff]   ;;  %v8337_v44 = vld [vmem:[%s12001_s8 + $0x218] ss:$24 sps:$4 sm:$0xff]   ;;  %v8343_v25 = vld [vmem:[%s12001_s8 + $0x248] ss:$24 sps:$4 sm:$0xff]  }
 0x478   :  { %4171 = vmatpush1.bf16.msra.mxu0 %v4031_v36  ;;  %v8333_v36 = vld [vmem:[%s12001_s8 + $0x1ec] ss:$24 sps:$4 sm:$0xff]   ;;  %v8349_v58 = vld [vmem:[%s12001_s8 + $0x278] ss:$24 sps:$4 sm:$0xff]   ;;  %v8355_v13 = vld [vmem:[%s12001_s8 + $0x2a8] ss:$24 sps:$4 sm:$0xff]  }
 0x479   :  { %4172 = vmatprep.subr.bf16.mxu0 %v8539_v32  ;;  %5136 = vmatpush1.bf16.msra.mxu1 %v8286_v54  ;;  %v8331_v54 = vld [vmem:[%s12001_s8 + $0x1e8] ss:$24 sps:$4 sm:$0xff]   ;;  %v8357_v27 = vld [vmem:[%s12001_s8 + $0x2ac] ss:$24 sps:$4 sm:$0xff]   ;;  %v8363_v57 = vld [vmem:[%s12001_s8 + $0x2dc] ss:$24 sps:$4 sm:$0xff]  }
 0x47a   :  { %5137 = vmatprep.subr.bf16.mxu1 %v8294_v2  ;;  %v8351_v2 = vld [vmem:[%s12001_s8 + $0x27c] ss:$24 sps:$4 sm:$0xff]   ;;  %v8358_v23 = vld [vmem:[%s12001_s8 + $0x2d0] ss:$24 sps:$4 sm:$0xff]   ;;  %vm5615_vm11 = vcmask 998400  }
 0x47b   :  { %v8360_v30 = vld [vmem:[%s12001_s8 + $0x2d4] ss:$24 sps:$4 sm:$0xff]   ;;  %v8366_v31 = vld [vmem:[%s12001_s8 + $0x304] ss:$24 sps:$4 sm:$0xff]  }
 0x47c   :  { %4173 = vmatpush1.bf16.msra.mxu0 %v4034_v15  ;;  %v8352_v15 = vld [vmem:[%s12001_s8 + $0x2a0] ss:$24 sps:$4 sm:$0xff]  }
 0x47d   :  { %4174 = vmatprep.subr.bf16.mxu0 %v8539_v32  ;;  %5138 = vmatpush1.bf16.msra.mxu1 %v8292_v16  ;;  %v8354_v16 = vld [vmem:[%s12001_s8 + $0x2a4] ss:$24 sps:$4 sm:$0xff]  }
 0x47e   :  { %5139 = vmatprep.subr.bf16.mxu1 %v8300_v10  ;;  %v8361_v10 = vld [vmem:[%s12001_s8 + $0x2d8] ss:$24 sps:$4 sm:$0xff]  }
 0x480   :  { %4175 = vmatpush1.bf16.msra.mxu0 %v4037_v22  ;;  %v8369_v22 = vld [vmem:[%s12001_s8 + $0x30c] ss:$24 sps:$4 sm:$0xff]  }
 0x481   :  { %4176 = vmatprep.subr.bf16.mxu0 %v8539_v32  ;;  %5140 = vmatpush1.bf16.msra.mxu1 %v8298_v52 }
 0x482   :  { %5141 = vmatprep.subr.bf16.mxu1 %v8306_v0 }
 0x483   :  { %v11034_v52 = vpop.permute.xlu1 %4054  ;;  %v11036_v61 = vpop.permute.xlu0 %4059 }
 0x484   :  { %4177 = vmatpush1.bf16.msra.mxu0 %v4040_v53 }
 0x485   :  { %4178 = vmatprep.subr.bf16.mxu0 %v8539_v32  ;;  %5142 = vmatpush1.bf16.msra.mxu1 %v8304_v4 }
 0x486   :  { %5143 = vmatprep.subr.bf16.mxu1 %v8312_v42 }
 0x487   :  { %v11038_v48 = vpop.permute.xlu1 %4217  ;;  %v11040_v11 = vpop.permute.xlu0 %4222 }
 0x488   :  { %4179 = vmatpush1.bf16.msra.mxu0 %v4043_v24 }
 0x489   :  { %5235 = vmatprep.subr.bf16.mxu0 %v8273_v17  ;;  %5144 = vmatpush1.bf16.msra.mxu1 %v8310_v3 }
 0x48a   :  { %5145 = vmatprep.subr.bf16.mxu1 %v8318_v60 }
 0x48b   :  { %4183 = vmatmul.mubr.bf16.vlgmr.msra.gmra.mrb[16].mxu0 %v10763_v14  ;;  %v8322_v14 = vld [vmem:[%s12001_s8 + $0x1b0] ss:$24 sps:$4 sm:$0xff]   ;;  %v11046_v24 = vpop.permute.xlu1 %4064 }
 0x48c   :  { %7062 = vmatprep.mubr.msk.bf16.mxu0 %vm4090_vm7, %v10768_v19  ;;  %5236 = vmatpush1.bf16.msra.mxu0 %v8271_v18  ;;  %v8330_v19 = vld [vmem:[%s12001_s8 + $0x1e4] ss:$24 sps:$4 sm:$0xff]  }
 0x48d   :  { %5237 = vmatprep.subr.bf16.mxu0 %v8279_v50  ;;  %5146 = vmatpush1.bf16.msra.mxu1 %v8316_v33  ;;  %v11051_v50 = vpop.permute.xlu0 %4069 }
 0x48e   :  { %5147 = vmatprep.subr.bf16.mxu1 %v8324_v35 }
 0x490   :  { %5238 = vmatpush1.bf16.msra.mxu0 %v8277_v41 }
 0x491   :  { %5239 = vmatprep.subr.bf16.mxu0 %v8285_v9  ;;  %5148 = vmatpush1.bf16.msra.mxu1 %v8322_v14 }
 0x492   :  { %5149 = vmatprep.subr.bf16.mxu1 %v8330_v19 }
 0x493   :  { %4191 = vmatmul.mubr.bf16.gmra.mrb[20].mxu0 %v10805_v7  ;;  %v8348_v7 = vld [vmem:[%s12001_s8 + $0x274] ss:$24 sps:$4 sm:$0xff]  }
 0x494   :  { %5240 = vmatpush1.bf16.msra.mxu0 %v8283_v51 }
 0x495   :  { %5241 = vmatprep.subr.bf16.mxu0 %v8291_v5  ;;  %5150 = vmatpush1.bf16.msra.mxu1 %v8328_v34 }
 0x496   :  { %5151 = vmatprep.subr.bf16.mxu1 %v8336_v62 }
 0x498   :  { %5242 = vmatpush1.bf16.msra.mxu0 %v8289_v26  ;;  %v8364_v26 = vld [vmem:[%s12001_s8 + $0x300] ss:$24 sps:$4 sm:$0xff]  }
 0x499   :  { %5243 = vmatprep.subr.bf16.mxu0 %v8297_v59  ;;  %5152 = vmatpush1.bf16.msra.mxu1 %v8334_v1  ;;  %v8367_v59 = vld [vmem:[%s12001_s8 + $0x308] ss:$24 sps:$4 sm:$0xff]   ;;  %v11065_v1 = vpop.permute.xlu1 %4227 }
 0x49a   :  { %5153 = vmatprep.subr.bf16.mxu1 %v8342_v38 }
 0x49c   :  { %5244 = vmatpush1.bf16.msra.mxu0 %v8295_v56 }
 0x49d   :  { %5245 = vmatprep.subr.bf16.mxu0 %v8303_v37  ;;  %5154 = vmatpush1.bf16.msra.mxu1 %v8340_v55  ;;  %v8372_v37 = vld [vmem:[%s12001_s8 + $0x334] ss:$24 sps:$4 sm:$0xff]  }
 0x49e   :  { %5155 = vmatprep.subr.bf16.mxu1 %v8348_v7  ;;  %v8375_v55 = vld [vmem:[%s12001_s8 + $0x33c] ss:$24 sps:$4 sm:$0xff]  }
 0x4a0   :  { %5246 = vmatpush1.bf16.msra.mxu0 %v8301_v49 }
 0x4a1   :  { %5247 = vmatprep.subr.bf16.mxu0 %v8309_v40  ;;  %5156 = vmatpush1.bf16.msra.mxu1 %v8346_v43  ;;  %v11078_v43 = vpop.permute.xlu0 %4232 }
 0x4a2   :  { %5157 = vmatprep.subr.bf16.mxu1 %v8354_v16  ;;  %v8384_v16 = vld [vmem:[%s12001_s8 + $0x394] ss:$24 sps:$4 sm:$0xff]  }
 0x4a4   :  { %5248 = vmatpush1.bf16.msra.mxu0 %v8307_v20 }
 0x4a5   :  { %5249 = vmatprep.subr.bf16.mxu0 %v8315_v29  ;;  %5158 = vmatpush1.bf16.msra.mxu1 %v8352_v15  ;;  %v8379_v15 = vld [vmem:[%s12001_s8 + $0x368] ss:$24 sps:$4 sm:$0xff]  }
 0x4a6   :  { %5159 = vmatprep.subr.bf16.mxu1 %v8360_v30  ;;  %v8385_v30 = vld [vmem:[%s12001_s8 + $0x398] ss:$24 sps:$4 sm:$0xff]  }
 0x4a8   :  { %5250 = vmatpush1.bf16.msra.mxu0 %v8313_v28 }
 0x4a9   :  { %5251 = vmatprep.subr.bf16.mxu0 %v8321_v21  ;;  %5160 = vmatpush1.bf16.msra.mxu1 %v8358_v23  ;;  %v8370_v21 = vld [vmem:[%s12001_s8 + $0x330] ss:$24 sps:$4 sm:$0xff]   ;;  %v8393_v23 = vld [vmem:[%s12001_s8 + $0x3cc] ss:$24 sps:$4 sm:$0xff]  }
 0x4aa   :  { %5182 = vmatprep.subr.bf16.mxu1 %v8366_v31  ;;  %v8391_v31 = vld [vmem:[%s12001_s8 + $0x3c8] ss:$24 sps:$4 sm:$0xff]  }
 0x4ac   :  { %5252 = vmatpush1.bf16.msra.mxu0 %v8319_v6  ;;  %v8373_v6 = vld [vmem:[%s12001_s8 + $0x338] ss:$24 sps:$4 sm:$0xff]  }
 0x4ad   :  { %5253 = vmatprep.subr.bf16.mxu0 %v8327_v12 }
 0x4b0   :  { %5254 = vmatpush1.bf16.msra.mxu0 %v8325_v47  ;;  %v8378_v47 = vld [vmem:[%s12001_s8 + $0x364] ss:$24 sps:$4 sm:$0xff]  }
 0x4b1   :  { %5255 = vmatprep.subr.bf16.mxu0 %v8333_v36  ;;  %v8381_v36 = vld [vmem:[%s12001_s8 + $0x36c] ss:$24 sps:$4 sm:$0xff]  }
 0x4b4   :  { %5256 = vmatpush1.bf16.msra.mxu0 %v8331_v54 }
 0x4b5   :  { %5257 = vmatprep.subr.bf16.mxu0 %v8339_v63 }
 0x4b8   :  { %5258 = vmatpush1.bf16.msra.mxu0 %v8337_v44 }
 0x4b9   :  { %5259 = vmatprep.subr.bf16.mxu0 %v8345_v8 }
 0x4bc   :  { %5260 = vmatpush1.bf16.msra.mxu0 %v8343_v25 }
 0x4bd   :  { %5261 = vmatprep.subr.bf16.mxu0 %v8351_v2 }
 0x4c0   :  { %5262 = vmatpush1.bf16.msra.mxu0 %v8349_v58  ;;  %v8376_v58 = vld [vmem:[%s12001_s8 + $0x360] ss:$24 sps:$4 sm:$0xff]  }
 0x4c1   :  { %5263 = vmatprep.subr.bf16.mxu0 %v8357_v27  ;;  %v8382_v27 = vld [vmem:[%s12001_s8 + $0x390] ss:$24 sps:$4 sm:$0xff]  }
 0x4c4   :  { %5264 = vmatpush1.bf16.msra.mxu0 %v8355_v13  ;;  %v8387_v13 = vld [vmem:[%s12001_s8 + $0x39c] ss:$24 sps:$4 sm:$0xff]  }
 0x4c5   :  { %5265 = vmatprep.subr.bf16.mxu0 %v8363_v57  ;;  %v8390_v57 = vld [vmem:[%s12001_s8 + $0x3c4] ss:$24 sps:$4 sm:$0xff]  }
 0x4c8   :  { %5266 = vmatpush1.bf16.msra.mxu0 %v8361_v10  ;;  %v8388_v10 = vld [vmem:[%s12001_s8 + $0x3c0] ss:$24 sps:$4 sm:$0xff]  }
 0x4c9   :  { %5288 = vmatprep.subr.bf16.mxu0 %v8369_v22  ;;  %v8396_v22 = vld [vmem:[%s12001_s8 + $0x3f4] ss:$24 sps:$4 sm:$0xff]  }
 0x53e   :  { %v4131_v39 = vpop.f32.mrb[12].mxu1 }
 0x53f   :  { %v4132_v0 = vadd.f32 %v4131_v39, %v11034_v52  ;;  %v4133_v53 = vpop.f32.mrb[13].mxu1  ;;  %v8399_v39 = vld [vmem:[%s12001_s8 + $0x3fc] ss:$24 sps:$4 sm:$0xff]  }
 0x540   :  { %v4134_v4 = vadd.f32 %v4133_v53, %v11034_v52  ;;  %v4135_v46 = vpop.f32.mrb[14].mxu1  ;;  %v8397_v53 = vld [vmem:[%s12001_s8 + $0x3f8] ss:$24 sps:$4 sm:$0xff]  }
 0x541   :  { %v4235_v45 = vmul.f32 %v11038_v48, %v4132_v0  ;;  %v4136_v42 = vadd.f32 %v4135_v46, %v11036_v61  ;;  %v4137_v17 = vpop.f32.mrb[15].mxu1  ;;  %vm4199_vm7 = vcmp.ge.f32.partialorder %v4132_v0, 0.0  ;;  %v8405_v46 = vld [vmem:[%s12001_s8 + $0x42c] ss:$24 sps:$4 sm:$0xff]  }
 0x542   :  { %v4236_v3 = vmul.f32 %v11038_v48, %v4134_v4  ;;  %v4138_v60 = vadd.f32 %v4137_v17, %v11036_v61  ;;  %vm4200_vm12 = vcmp.ge.f32.partialorder %v4134_v4, 0.0 }
 0x543   :  { %vm4202_vm6 = vcmp.ge.f32.partialorder %v4136_v42, 0.0  ;;  %v4238_v18 = vmul.f32 %v11040_v11, %v4136_v42  ;;  %v4247_v35 = vsel %vm4199_vm7, %v4132_v0, %v4235_v45  ;;  %v8394_v0 = vld [vmem:[%s12001_s8 + $0x3f0] ss:$24 sps:$4 sm:$0xff]   ;;  %vm5696_vm7 = vcmask 990208  }
 0x544   :  { %vm4203_vm14 = vcmp.ge.f32.partialorder %v4138_v60, 0.0  ;;  %v4239_v33 = vmul.f32 %v11040_v11, %v4138_v60  ;;  %v4248_v19 = vsel %vm4200_vm12, %v4134_v4, %v4236_v3  ;;  %v8402_v4 = vld [vmem:[%s12001_s8 + $0x424] ss:$24 sps:$4 sm:$0xff]   ;;  %v8400_v3 = vld [vmem:[%s12001_s8 + $0x420] ss:$24 sps:$4 sm:$0xff]   ;;  %vm6196_vm12 = vcmask 785408  }
 0x545   :  { %v4250_v41 = vsel %vm4202_vm6, %v4136_v42, %v4238_v18 }
 0x546   :  { %v11054_v9 = vpack.c.bf16 %v4250_v41, %v4247_v35  ;;  %v4141_v14 = vpop.f32.mrb[16].mxu1  ;;  %v4251_v51 = vsel %vm4203_vm14, %v4138_v60, %v4239_v33  ;;  %v8403_v60 = vld [vmem:[%s12001_s8 + $0x428] ss:$24 sps:$4 sm:$0xff]   ;;  %v8408_v33 = vld [vmem:[%s12001_s8 + $0x454] ss:$24 sps:$4 sm:$0xff]  }
 0x547   :  { %v4142_v5 = vadd.f32 %v4141_v14, %v11046_v24  ;;  %v4143_v34 = vpop.f32.mrb[17].mxu1  ;;  %v11057_v62 = vpack.c.bf16 %v4251_v51, %v4248_v19  ;;  %v8406_v51 = vld [vmem:[%s12001_s8 + $0x450] ss:$24 sps:$4 sm:$0xff]  }
 0x548   :  { %v4144_v38 = vadd.f32 %v4143_v34, %v11046_v24  ;;  %v4145_v56 = vpop.f32.mrb[18].mxu1 }
 0x549   :  { %v4241_v7 = vmul.f32 %v11065_v1, %v4142_v5  ;;  %v4146_v49 = vadd.f32 %v4145_v56, %v11051_v50  ;;  %v4147_v40 = vpop.f32.mrb[19].mxu1  ;;  %5161 = vmatprep.mubr.bf16.mxu1 %v11057_v62  ;;  %5267 = vmatprep.mubr.bf16.mxu0 %v11057_v62  ;;  %vm4205_vm8 = vcmp.ge.f32.partialorder %v4142_v5, 0.0  ;;  %v8412_v56 = vld [vmem:[%s12001_s8 + $0x10] ss:$24 sps:$4 sm:$0xff]  }
 0x54a   :  { %v4242_v20 = vmul.f32 %v11065_v1, %v4144_v38  ;;  %v4148_v29 = vadd.f32 %v4147_v40, %v11051_v50  ;;  %5162 = vmatmul.mubr.bf16.vlgmr.msra.gmra.mrb[20].mxu1 %v11054_v9  ;;  %5268 = vmatmul.mubr.bf16.vlgmr.msra.gmra.mrb[24].mxu0 %v11054_v9  ;;  %vm4206_vm4 = vcmp.ge.f32.partialorder %v4144_v38, 0.0 }
 0x54b   :  { %vm4208_vm1 = vcmp.ge.f32.partialorder %v4146_v49, 0.0  ;;  %v4244_v28 = vmul.f32 %v11078_v43, %v4146_v49  ;;  %5183 = vmatpush1.bf16.msra.mxu1 %v8364_v26  ;;  %5289 = vmatpush1.bf16.msra.mxu0 %v8367_v59  ;;  %v4253_v54 = vsel %vm4205_vm8, %v4142_v5, %v4241_v7  ;;  %v8409_v5 = vld [vmem:[%s12001_s8 + $0x458] ss:$24 sps:$4 sm:$0xff]  }
 0x54c   :  { %vm4209_vm9 = vcmp.ge.f32.partialorder %v4148_v29, 0.0  ;;  %v4245_v12 = vmul.f32 %v11078_v43, %v4148_v29  ;;  %5184 = vmatprep.subr.bf16.mxu1 %v8372_v37  ;;  %5290 = vmatprep.subr.bf16.mxu0 %v8375_v55  ;;  %v4254_v44 = vsel %vm4206_vm4, %v4144_v38, %v4242_v20  ;;  %v8417_v55 = vld [vmem:[%s12001_s8 + $0x44] ss:$24 sps:$4 sm:$0xff]   ;;  %v8415_v20 = vld [vmem:[%s12001_s8 + $0x40] ss:$24 sps:$4 sm:$0xff]  }
 0x54d   :  { %v4256_v63 = vsel %vm4208_vm1, %v4146_v49, %v4244_v28 }
 0x54e   :  { %v4257_v8 = vsel %vm4209_vm9, %v4148_v29, %v4245_v12  ;;  %v11099_v25 = vpack.c.bf16 %v4256_v63, %v4253_v54  ;;  %v8426_v12 = vld [vmem:[%s12001_s8 + $0xd4] ss:$24 sps:$4 sm:$0xff]   ;;  %v8430_v63 = vld [vmem:[%s12001_s8 + $0x130] ss:$24 sps:$4 sm:$0xff]  }
 0x54f   :  { %5185 = vmatpush1.bf16.msra.mxu1 %v8370_v21  ;;  %5291 = vmatpush1.bf16.msra.mxu0 %v8373_v6  ;;  %v11101_v2 = vpack.c.bf16 %v4257_v8, %v4254_v44  ;;  %v8423_v21 = vld [vmem:[%s12001_s8 + $0xa4] ss:$24 sps:$4 sm:$0xff]   ;;  %v8421_v6 = vld [vmem:[%s12001_s8 + $0xa0] ss:$24 sps:$4 sm:$0xff]   ;;  %v8432_v54 = vld [vmem:[%s12001_s8 + $0x134] ss:$24 sps:$4 sm:$0xff]  }
 0x550   :  { %5186 = vmatprep.subr.bf16.mxu1 %v8378_v47  ;;  %5292 = vmatprep.subr.bf16.mxu0 %v8381_v36  ;;  %v8424_v47 = vld [vmem:[%s12001_s8 + $0xd0] ss:$24 sps:$4 sm:$0xff]   ;;  %v8429_v36 = vld [vmem:[%s12001_s8 + $0x104] ss:$24 sps:$4 sm:$0xff]   ;;  %v8433_v8 = vld [vmem:[%s12001_s8 + $0x160] ss:$24 sps:$4 sm:$0xff]  }
 0x551   :  { %5171 = vmatprep.mubr.bf16.mxu1 %v11101_v2  ;;  %5277 = vmatprep.mubr.bf16.mxu0 %v11101_v2  ;;  %v8435_v44 = vld [vmem:[%s12001_s8 + $0x164] ss:$24 sps:$4 sm:$0xff]  }
 0x552   :  { %5172 = vmatmul.mubr.bf16.gmra.mrb[24].mxu1 %v11099_v25  ;;  %5278 = vmatmul.mubr.bf16.gmra.mrb[28].mxu0 %v11099_v25 }
 0x553   :  { %5187 = vmatpush1.bf16.msra.mxu1 %v8376_v58  ;;  %5293 = vmatpush1.bf16.msra.mxu0 %v8379_v15  ;;  %v8438_v58 = vld [vmem:[%s12001_s8 + $0x194] ss:$24 sps:$4 sm:$0xff]   ;;  %v8436_v15 = vld [vmem:[%s12001_s8 + $0x190] ss:$24 sps:$4 sm:$0xff]  }
 0x554   :  { %5188 = vmatprep.subr.bf16.mxu1 %v8384_v16  ;;  %5294 = vmatprep.subr.bf16.mxu0 %v8387_v13  ;;  %v8441_v16 = vld [vmem:[%s12001_s8 + $0x1c4] ss:$24 sps:$4 sm:$0xff]   ;;  %v8439_v13 = vld [vmem:[%s12001_s8 + $0x1c0] ss:$24 sps:$4 sm:$0xff]  }
 0x555   :  { %5214 = vmatprep.mubr.bf16.mxu1 %v8539_v32  ;;  %5320 = vmatprep.mubr.bf16.mxu0 %v8539_v32 }
 0x557   :  { %5189 = vmatpush1.bf16.msra.mxu1 %v8382_v27  ;;  %5295 = vmatpush1.bf16.msra.mxu0 %v8385_v30  ;;  %v8444_v27 = vld [vmem:[%s12001_s8 + $0x1f4] ss:$24 sps:$4 sm:$0xff]   ;;  %v8442_v30 = vld [vmem:[%s12001_s8 + $0x1f0] ss:$24 sps:$4 sm:$0xff]  }
 0x558   :  { %5190 = vmatprep.subr.bf16.mxu1 %v8390_v57  ;;  %5296 = vmatprep.subr.bf16.mxu0 %v8393_v23  ;;  %v8447_v57 = vld [vmem:[%s12001_s8 + $0x224] ss:$24 sps:$4 sm:$0xff]   ;;  %v8445_v23 = vld [vmem:[%s12001_s8 + $0x220] ss:$24 sps:$4 sm:$0xff]  }
 0x55b   :  { %5191 = vmatpush1.bf16.msra.mxu1 %v8388_v10  ;;  %5297 = vmatpush1.bf16.msra.mxu0 %v8391_v31  ;;  %v8450_v10 = vld [vmem:[%s12001_s8 + $0x254] ss:$24 sps:$4 sm:$0xff]   ;;  %v8448_v31 = vld [vmem:[%s12001_s8 + $0x250] ss:$24 sps:$4 sm:$0xff]  }
 0x55c   :  { %5192 = vmatprep.subr.bf16.mxu1 %v8396_v22  ;;  %5298 = vmatprep.subr.bf16.mxu0 %v8399_v39  ;;  %v8453_v22 = vld [vmem:[%s12001_s8 + $0x284] ss:$24 sps:$4 sm:$0xff]   ;;  %v8451_v39 = vld [vmem:[%s12001_s8 + $0x280] ss:$24 sps:$4 sm:$0xff]  }
 0x55e   :  { %v4184_v45 = vpop.f32.mrb[16].mxu0 }
 0x55f   :  { %v4185_v42 = vadd.f32 %v4184_v45, %v11034_v52  ;;  %5193 = vmatpush1.bf16.msra.mxu1 %v8394_v0  ;;  %5299 = vmatpush1.bf16.msra.mxu0 %v8397_v53  ;;  %v4186_v17 = vpop.f32.mrb[17].mxu0  ;;  %v8411_v52 = vld [vmem:[%s12001_s8 + $0x45c] ss:$24 sps:$4 sm:$0xff]   ;;  %v8454_v53 = vld [vmem:[%s12001_s8 + $0x2b0] ss:$24 sps:$4 sm:$0xff]  }
 0x560   :  { %v4187_v18 = vpop.f32.mrb[18].mxu0  ;;  %5194 = vmatprep.subr.bf16.mxu1 %v8402_v4  ;;  %5300 = vmatprep.subr.bf16.mxu0 %v8405_v46  ;;  %v8456_v0 = vld [vmem:[%s12001_s8 + $0x2b4] ss:$24 sps:$4 sm:$0xff]   ;;  %v8459_v4 = vld [vmem:[%s12001_s8 + $0x2e4] ss:$24 sps:$4 sm:$0xff]  }
 0x561   :  { %v4237_v35 = vmul.f32 %v11038_v48, %v4185_v42  ;;  %v4188_v41 = vadd.f32 %v4187_v18, %v11036_v61  ;;  %v4189_v14 = vpop.f32.mrb[19].mxu0  ;;  %vm4201_vm2 = vcmp.ge.f32.partialorder %v4185_v42, 0.0  ;;  %v8414_v61 = vld [vmem:[%s12001_s8 + $0x14] ss:$24 sps:$4 sm:$0xff]   ;;  %v8457_v46 = vld [vmem:[%s12001_s8 + $0x2e0] ss:$24 sps:$4 sm:$0xff]  }
 0x562   :  { %v8462_v45 = vld [vmem:[%s12001_s8 + $0x314] ss:$24 sps:$4 sm:$0xff]   ;;  %v8465_v17 = vld [vmem:[%s12001_s8 + $0x344] ss:$24 sps:$4 sm:$0xff]   ;;  %v8466_v18 = vld [vmem:[%s12001_s8 + $0x370] ss:$24 sps:$4 sm:$0xff]  }
 0x563   :  { %vm4204_vm15 = vcmp.ge.f32.partialorder %v4188_v41, 0.0  ;;  %v4240_v19 = vmul.f32 %v11040_v11, %v4188_v41  ;;  %5195 = vmatpush1.bf16.msra.mxu1 %v8400_v3  ;;  %5301 = vmatpush1.bf16.msra.mxu0 %v8403_v60  ;;  %v4249_v48 = vsel %vm4201_vm2, %v4185_v42, %v4237_v35  ;;  %v8460_v42 = vld [vmem:[%s12001_s8 + $0x310] ss:$24 sps:$4 sm:$0xff]   ;;  %v8463_v3 = vld [vmem:[%s12001_s8 + $0x340] ss:$24 sps:$4 sm:$0xff]  }
 0x564   :  { %5196 = vmatprep.subr.bf16.mxu1 %v8408_v33  ;;  %5302 = vmatprep.subr.bf16.mxu0 %v8411_v52  ;;  %v8468_v60 = vld [vmem:[%s12001_s8 + $0x374] ss:$24 sps:$4 sm:$0xff]   ;;  %v8472_v52 = vld [vmem:[%s12001_s8 + $0x3d0] ss:$24 sps:$4 sm:$0xff]   ;;  %v8475_v35 = vld [vmem:[%s12001_s8 + $0x400] ss:$24 sps:$4 sm:$0xff]  }
 0x565   :  { %v4252_v34 = vsel %vm4204_vm15, %v4188_v41, %v4240_v19  ;;  %v8474_v33 = vld [vmem:[%s12001_s8 + $0x3d4] ss:$24 sps:$4 sm:$0xff]   ;;  %v8478_v14 = vld [vmem:[%s12001_s8 + $0x430] ss:$24 sps:$4 sm:$0xff]   ;;  %v8483_v19 = vld [vmem:[%s12001_s8 + $0x464] ss:$24 sps:$4 sm:$0xff]  }
 0x566   :  { %v11182_v26 = vpack.c.bf16 %v4252_v34, %v4249_v48  ;;  %v4192_v11 = vpop.f32.mrb[20].mxu0  ;;  %v8480_v41 = vld [vmem:[%s12001_s8 + $0x434] ss:$24 sps:$4 sm:$0xff]  }
 0x567   :  { %v4193_v59 = vadd.f32 %v4192_v11, %v11046_v24  ;;  %5197 = vmatpush1.bf16.msra.mxu1 %v8406_v51  ;;  %5303 = vmatpush1.bf16.msra.mxu0 %v8409_v5  ;;  %v4194_v38 = vpop.f32.mrb[21].mxu0  ;;  %v8481_v51 = vld [vmem:[%s12001_s8 + $0x460] ss:$24 sps:$4 sm:$0xff]  }
 0x568   :  { %v4195_v37 = vpop.f32.mrb[22].mxu0  ;;  %5341 = vmatprep.subr.bf16.mxu1 %v8414_v61 }
 0x569   :  { %v4243_v7 = vmul.f32 %v11065_v1, %v4193_v59  ;;  %v4196_v49 = vadd.f32 %v4195_v37, %v11051_v50  ;;  %v4197_v40 = vpop.f32.mrb[23].mxu0  ;;  %vm4207_vm5 = vcmp.ge.f32.partialorder %v4193_v59, 0.0  ;;  %v8420_v50 = vld [vmem:[%s12001_s8 + $0x74] ss:$24 sps:$4 sm:$0xff]  }
 0x56a   :  { %5215 = vmatmul.mubr.bf16.vlgmr.msra.gmra.mrb[20].mxu1 %v11182_v26  ;;  %5321 = vmatmul.mubr.bf16.vlgmr.msra.gmra.mrb[24].mxu0 %v11182_v26 }
 0x56b   :  { %vm4210_vm10 = vcmp.ge.f32.partialorder %v4196_v49, 0.0  ;;  %v4246_v24 = vmul.f32 %v11078_v43, %v4196_v49  ;;  %5342 = vmatpush1.bf16.msra.mxu1 %v8412_v56  ;;  %5224 = vmatprep.mubr.bf16.mxu1 %v8539_v32  ;;  %v4255_v1 = vsel %vm4207_vm5, %v4193_v59, %v4243_v7  ;;  %v8418_v43 = vld [vmem:[%s12001_s8 + $0x70] ss:$24 sps:$4 sm:$0xff]  }
 0x56c   :  { %5343 = vmatprep.subr.bf16.mxu1 %v8417_v55  ;;  %5330 = vmatprep.mubr.bf16.mxu0 %v8539_v32 }
 0x56d   :  { %v4258_v29 = vsel %vm4210_vm10, %v4196_v49, %v4246_v24 }
 0x56e   :  { %v11204_v28 = vpack.c.bf16 %v4258_v29, %v4255_v1 }
 0x56f   :  { %5344 = vmatpush1.bf16.msra.mxu1 %v8415_v20 }
 0x570   :  { %5345 = vmatprep.subr.bf16.mxu1 %v8420_v50 }
 0x572   :  { %5225 = vmatmul.mubr.bf16.gmra.mrb[24].mxu1 %v11204_v28  ;;  %5331 = vmatmul.mubr.bf16.gmra.mrb[28].mxu0 %v11204_v28 }
 0x573   :  { %5346 = vmatpush1.bf16.msra.mxu1 %v8418_v43  ;;  %5373 = vmatprep.mubr.bf16.mxu1 %v11057_v62  ;;  %v8427_v62 = vld [vmem:[%s12001_s8 + $0x100] ss:$24 sps:$4 sm:$0xff]  }
 0x574   :  { %5347 = vmatprep.subr.bf16.mxu1 %v8423_v21 }
 0x577   :  { %5348 = vmatpush1.bf16.msra.mxu1 %v8421_v6 }
 0x578   :  { %5349 = vmatprep.subr.bf16.mxu1 %v8426_v12 }
 0x57b   :  { %5350 = vmatpush1.bf16.msra.mxu1 %v8424_v47 }
 0x57c   :  { %5351 = vmatprep.subr.bf16.mxu1 %v8429_v36 }
 0x57f   :  { %5352 = vmatpush1.bf16.msra.mxu1 %v8427_v62 }
 0x580   :  { %5353 = vmatprep.subr.bf16.mxu1 %v8432_v54 }
 0x583   :  { %5354 = vmatpush1.bf16.msra.mxu1 %v8430_v63 }
 0x584   :  { %5355 = vmatprep.subr.bf16.mxu1 %v8435_v44 }
 0x587   :  { %5356 = vmatpush1.bf16.msra.mxu1 %v8433_v8 }
 0x588   :  { %5357 = vmatprep.subr.bf16.mxu1 %v8438_v58 }
 0x58b   :  { %5358 = vmatpush1.bf16.msra.mxu1 %v8436_v15 }
 0x58c   :  { %5359 = vmatprep.subr.bf16.mxu1 %v8441_v16 }
 0x58f   :  { %5360 = vmatpush1.bf16.msra.mxu1 %v8439_v13 }
 0x590   :  { %5361 = vmatprep.subr.bf16.mxu1 %v8444_v27 }
 0x593   :  { %5362 = vmatpush1.bf16.msra.mxu1 %v8442_v30 }
 0x594   :  { %5363 = vmatprep.subr.bf16.mxu1 %v8447_v57 }
 0x597   :  { %5364 = vmatpush1.bf16.msra.mxu1 %v8445_v23 }
 0x598   :  { %5365 = vmatprep.subr.bf16.mxu1 %v8450_v10 }
 0x59b   :  { %5366 = vmatpush1.bf16.msra.mxu1 %v8448_v31 }
 0x59c   :  { %5367 = vmatprep.subr.bf16.mxu1 %v8453_v22 }
 0x59f   :  { %5368 = vmatpush1.bf16.msra.mxu1 %v8451_v39 }
 0x5a0   :  { %5369 = vmatprep.subr.bf16.mxu1 %v8456_v0 }
 0x5a3   :  { %5370 = vmatpush1.bf16.msra.mxu1 %v8454_v53 }
 0x5a4   :  { %5371 = vmatprep.subr.bf16.mxu1 %v8459_v4 }
 0x5a7   :  { %5372 = vmatpush1.bf16.msra.mxu1 %v8457_v46 }
 0x5a8   :  { %5394 = vmatprep.subr.bf16.mxu1 %v8462_v45 }
 0x5aa   :  { %5374 = vmatmul.mubr.bf16.vlgmr.msra.gmra.mrb[28].mxu1 %v11054_v9  ;;  %v8471_v9 = vld [vmem:[%s12001_s8 + $0x3a4] ss:$24 sps:$4 sm:$0xff]  }
 0x5ab   :  { %5383 = vmatprep.mubr.bf16.mxu1 %v11101_v2  ;;  %5395 = vmatpush1.bf16.msra.mxu1 %v8460_v42  ;;  %v8469_v2 = vld [vmem:[%s12001_s8 + $0x3a0] ss:$24 sps:$4 sm:$0xff]  }
 0x5ac   :  { %5396 = vmatprep.subr.bf16.mxu1 %v8465_v17 }
 0x5af   :  { %5397 = vmatpush1.bf16.msra.mxu1 %v8463_v3 }
 0x5b0   :  { %5398 = vmatprep.subr.bf16.mxu1 %v8468_v60 }
 0x5b2   :  { %5384 = vmatmul.mubr.bf16.gmra.mrb[32].mxu1 %v11099_v25  ;;  %v8477_v25 = vld [vmem:[%s12001_s8 + $0x404] ss:$24 sps:$4 sm:$0xff]   ;;  %s8543_s8 = smov 122  }
 0x5b3   :  { %5399 = vmatpush1.bf16.msra.mxu1 %v8466_v18  ;;  %5426 = vmatprep.mubr.bf16.mxu1 %v8539_v32 }
 0x5b4   :  { %5400 = vmatprep.subr.bf16.mxu1 %v8471_v9 }
 0x5b7   :  { %5401 = vmatpush1.bf16.msra.mxu1 %v8469_v2 }
 0x5b8   :  { %5402 = vmatprep.subr.bf16.mxu1 %v8474_v33 }
 0x5bb   :  { %5403 = vmatpush1.bf16.msra.mxu1 %v8472_v52 }
 0x5bc   :  { %5404 = vmatprep.subr.bf16.mxu1 %v8477_v25 }
 0x5bf   :  { %5405 = vmatpush1.bf16.msra.mxu1 %v8475_v35 }
 0x5c0   :  { %5406 = vmatprep.subr.bf16.mxu1 %v8480_v41 }
 0x5c3   :  { %5407 = vmatpush1.bf16.msra.mxu1 %v8478_v14 }
 0x5c4   :  { %5408 = vmatprep.subr.bf16.mxu1 %v8483_v19 }
 0x5c7   :  { %5409 = vmatpush1.bf16.msra.mxu1 %v8481_v51 }
 0x5ca   :  { %5427 = vmatmul.mubr.bf16.vlgmr.msra.gmra.mrb[28].mxu1 %v11182_v26 }
 0x5cb   :  { %5436 = vmatprep.mubr.bf16.mxu1 %v8539_v32 }
 0x5d2   :  { %5437 = vmatmul.mubr.bf16.gmra.mrb[32].mxu1 %v11204_v28 }
 0x63d   :  { %v5216_v5 = vpop.f32.mrb[20].mxu1  ;;  %v5322_v61 = vpop.f32.mrb[24].mxu0 }
 0x63e   :  { %v5218_v48 = vpop.f32.mrb[21].mxu1  ;;  %v11345_v34 = vpop.f32.mrb[25].mxu0 }
 0x63f   :  { %v5220_v11 = vpop.f32.mrb[22].mxu1  ;;  %v5326_v59 = vpop.f32.mrb[26].mxu0  ;;  %v11347_v38 = vpack.i.bf16 %v5322_v61, %v5218_v48 }
 0x640   :  { %v5222_v56 = vpop.f32.mrb[23].mxu1  ;;  %v11349_v37 = vpop.f32.mrb[27].mxu0  ;;  %v5996_v55 = vpack.c.bf16 %v5220_v11, %v5216_v5  ;;  %v11351_v7 = vpack.i.bf16 %v5220_v11, %v5216_v5 }
 0x641   :  { %7868 = vrot.lane.b32.xlu1 %v11347_v38, %s8525_s27  ;;  %v11355_v32 = vpack.i.bf16 %v5326_v59, %v5222_v56  ;;  %v5997_v26 = vpack.c.bf16 %v5222_v56, %v5218_v48  ;;  %v11359_v49 = vpack.i.bf16 %v11349_v37, %v11345_v34  ;;  %v6000_v40 = vpack.c.bf16 %v11349_v37, %v11345_v34 }
 0x643   :  { %7908 = vrot.lane.b32.xlu0 %v11355_v32, %s8525_s27  ;;  %6209 = vmatprep.subr.bf16.mxu0 %v5997_v26 }
 0x644   :  { %6210 = vmatpush1.bf16.msra.mxu0 %v5996_v55 }
 0x645   :  { %v5332_v24 = vpop.f32.mrb[28].mxu0  ;;  %7873 = vrot.lane.b32.xlu1 %v11347_v38, %s8529_s14  ;;  %v5226_v20 = vpop.f32.mrb[24].mxu1 }
 0x646   :  { %v5228_v50 = vpop.f32.mrb[25].mxu1  ;;  %v5334_v1 = vpop.f32.mrb[29].mxu0 }
 0x647   :  { %v5336_v29 = vpop.f32.mrb[30].mxu0  ;;  %7918 = vrot.lane.b32.xlu0 %v11355_v32, %s8529_s14  ;;  %v5230_v28 = vpop.f32.mrb[26].mxu1  ;;  %v11369_v43 = vpack.i.bf16 %v5332_v24, %v5228_v50 }
 0x648   :  { %v5232_v21 = vpop.f32.mrb[27].mxu1  ;;  %v5338_v6 = vpop.f32.mrb[31].mxu0  ;;  %v5998_v12 = vpack.c.bf16 %v5230_v28, %v5226_v20  ;;  %v11371_v47 = vpack.i.bf16 %v5230_v28, %v5226_v20 }
 0x649   :  { %7878 = vrot.lane.b32.xlu1 %v11347_v38, %s8543_s8  ;;  %v5999_v36 = vpack.c.bf16 %v5232_v21, %v5228_v50  ;;  %v11375_v62 = vpack.i.bf16 %v5336_v29, %v5232_v21  ;;  %v11377_v54 = vpack.i.bf16 %v5338_v6, %v5334_v1  ;;  %v6002_v63 = vpack.c.bf16 %v5338_v6, %v5334_v1 }
 0x64b   :  { %7923 = vrot.lane.b32.xlu0 %v11355_v32, %s8543_s8  ;;  %6211 = vmatprep.subr.bf16.mxu0 %v5999_v36 }
 0x64c   :  { %6212 = vmatpush1.bf16.msra.mxu0 %v5998_v12 }
 0x64d   :  { %7883 = vrot.lane.b32.xlu1 %v11347_v38, %s8544_s26 }
 0x64f   :  { %7933 = vrot.lane.b32.xlu0 %v11355_v32, %s8544_s26 }
 0x651   :  { %7888 = vrot.lane.b32.xlu1 %v11351_v7, %s8525_s27 }
 0x653   :  { %7938 = vrot.lane.b32.xlu0 %v11369_v43, %s8525_s27 }
 0x655   :  { %7893 = vrot.lane.b32.xlu1 %v11351_v7, %s8529_s14 }
 0x657   :  { %7943 = vrot.lane.b32.xlu0 %v11369_v43, %s8529_s14 }
 0x659   :  { %7898 = vrot.lane.b32.xlu1 %v11351_v7, %s8543_s8 }
 0x65b   :  { %7948 = vrot.lane.b32.xlu0 %v11369_v43, %s8543_s8 }
 0x65d   :  { %7903 = vrot.lane.b32.xlu1 %v11351_v7, %s8544_s26 }
 0x65f   :  { %7953 = vrot.lane.b32.xlu0 %v11369_v43, %s8544_s26 }
 0x661   :  { %7913 = vrot.lane.b32.xlu1 %v11359_v49, %s8525_s27 }
 0x663   :  { %7958 = vrot.lane.b32.xlu0 %v11371_v47, %s8525_s27 }
 0x665   :  { %7928 = vrot.lane.b32.xlu1 %v11359_v49, %s8543_s8 }
 0x667   :  { %7963 = vrot.lane.b32.xlu0 %v11371_v47, %s8529_s14 }
 0x669   :  { %7973 = vrot.lane.b32.xlu1 %v11375_v62, %s8525_s27 }
 0x66b   :  { %7968 = vrot.lane.b32.xlu0 %v11371_v47, %s8543_s8 }
 0x66d   :  { %7983 = vrot.lane.b32.xlu1 %v11375_v62, %s8529_s14 }
 0x66f   :  { %7978 = vrot.lane.b32.xlu0 %v11377_v54, %s8525_s27 }
 0x671   :  { %7988 = vrot.lane.b32.xlu1 %v11375_v62, %s8543_s8 }
 0x673   :  { %7993 = vrot.lane.b32.xlu0 %v11377_v54, %s8543_s8 }
 0x675   :  { %7998 = vrot.lane.b32.xlu1 %v11375_v62, %s8544_s26 }
 0x69d   :  { %v5428_v44 = vpop.f32.mrb[28].mxu1 }
 0x69e   :  { %v5430_v8 = vpop.f32.mrb[29].mxu1 }
 0x69f   :  { %v5432_v58 = vpop.f32.mrb[30].mxu1  ;;  %v11423_v15 = vpack.i.bf16 %v5430_v8, %v5428_v44 }
 0x6a0   :  { %v5434_v16 = vpop.f32.mrb[31].mxu1  ;;  %v6001_v13 = vpack.c.bf16 %v5432_v58, %v5428_v44 }
 0x6a1   :  { %8003 = vrot.lane.b32.xlu1 %v11423_v15, %s8525_s27  ;;  %v11427_v27 = vpack.i.bf16 %v5434_v16, %v5432_v58 }
 0x6a2   :  { %6213 = vmatprep.subr.bf16.mxu0 %v6001_v13 }
 0x6a3   :  { %6214 = vmatpush1.bf16.msra.mxu0 %v6000_v40  ;;  %8013 = vrot.lane.b32.xlu0 %v11427_v27, %s8525_s27 }
 0x6a5   :  { %8008 = vrot.lane.b32.xlu1 %v11423_v15, %s8543_s8  ;;  %v5438_v30 = vpop.f32.mrb[32].mxu1 }
 0x6a6   :  { %v5440_v57 = vpop.f32.mrb[33].mxu1 }
 0x6a7   :  { %8018 = vrot.lane.b32.xlu0 %v11427_v27, %s8543_s8  ;;  %v5442_v23 = vpop.f32.mrb[34].mxu1  ;;  %v11435_v10 = vpack.i.bf16 %v5440_v57, %v5438_v30 }
 0x6a8   :  { %v5444_v31 = vpop.f32.mrb[35].mxu1  ;;  %v6003_v22 = vpack.c.bf16 %v5442_v23, %v5438_v30 }
 0x6a9   :  { %v11437_v39 = vpack.i.bf16 %v5444_v31, %v5442_v23 }
 0x6aa   :  { %6215 = vmatprep.subr.bf16.mxu0 %v6003_v22 }
 0x6ab   :  { %8023 = vrot.lane.b32.xlu0 %v11435_v10, %s8525_s27  ;;  %6216 = vmatpush1.bf16.msra.mxu0 %v6002_v63 }
 0x6ac   :  { %8038 = vrot.lane.b32.xlu1 %v11437_v39, %s8525_s27  ;;  %s8545_s27 = smov 120  }
 0x6af   :  { %8028 = vrot.lane.b32.xlu0 %v11371_v47, %s8544_s26 }
 0x6b0   :  { %8043 = vrot.lane.b32.xlu1 %v11423_v15, %s8544_s26 }
 0x6b3   :  { %v7869_v0 = vpop.permute.xlu1 %7868  ;;  %8033 = vrot.lane.b32.xlu0 %v11435_v10, %s8543_s8 }
 0x6b4   :  { %v7871_v53 = vunpack.i.h.bf16 %v7869_v0  ;;  %v7870_v4 = vunpack.i.l.bf16 %v7869_v0  ;;  %8053 = vrot.lane.b32.xlu1 %v11359_v49, %s8544_s26 }
 0x6b5   :  { %v7909_v46 = vpop.permute.xlu0 %7908 }
 0x6b6   :  { %v7911_v45 = vunpack.i.h.bf16 %v7909_v46  ;;  %v7910_v42 = vunpack.i.l.bf16 %v7909_v46  ;;  %v5484_v18 = vsel %vm112_vm0, %v7870_v4, %v7871_v53  ;;  %v8486_v53 = vld [vmem:[%s12002_s9 + $0x4] ss:$16 sps:$4 sm:$0xff]  }
 0x6b7   :  { %v7874_v17 = vpop.permute.xlu1 %7873  ;;  %8048 = vrot.lane.b32.xlu0 %v11427_v27, %s8544_s26  ;;  %6241 = vmatprep.mubr.bf16.mxu0 %v8486_v53 }
 0x6b8   :  { %v7876_v3 = vunpack.i.h.bf16 %v7874_v17  ;;  %v7875_v60 = vunpack.i.l.bf16 %v7874_v17  ;;  %8068 = vrot.lane.b32.xlu1 %v11347_v38, %s8545_s27  ;;  %v5486_v9 = vsel %vm112_vm0, %v7910_v42, %v7911_v45 }
 0x6b9   :  { %v7919_v2 = vpop.permute.xlu0 %7918  ;;  %v6005_v33 = vpack.c.bf16 %v5486_v9, %v5484_v18 }
 0x6ba   :  { %v7921_v52 = vunpack.i.h.bf16 %v7919_v2  ;;  %v7920_v25 = vunpack.i.l.bf16 %v7919_v2  ;;  %v11462_v19 = vsel %vm151_vm3, %v7875_v60, %v7876_v3 }
 0x6bb   :  { %v7879_v35 = vpop.permute.xlu1 %7878  ;;  %8058 = vrot.lane.b32.xlu0 %v11435_v10, %s8544_s26  ;;  %6217 = vmatprep.subr.bf16.mxu0 %v6005_v33 }
 0x6bc   :  { %v7881_v41 = vunpack.i.h.bf16 %v7879_v35  ;;  %v7880_v14 = vunpack.i.l.bf16 %v7879_v35  ;;  %8078 = vrot.lane.b32.xlu1 %v11351_v7, %s8545_s27  ;;  %v11465_v51 = vsel %vm151_vm3, %v7920_v25, %v7921_v52 }
 0x6bd   :  { %v7924_v5 = vpop.permute.xlu0 %7923  ;;  %v6013_v61 = vpack.c.bf16 %v11465_v51, %v11462_v19  ;;  %v8510_v51 = vld [vmem:[%s12005_s12 + $0x48] sm:$0xff]  }
 0x6be   :  { %v7926_v48 = vunpack.i.h.bf16 %v7924_v5  ;;  %v7925_v34 = vunpack.i.l.bf16 %v7924_v5  ;;  %v11474_v37 = vsel %vm5615_vm11, %v7880_v14, %v7881_v41 }
 0x6bf   :  { %v7884_v11 = vpop.permute.xlu1 %7883  ;;  %8063 = vrot.lane.b32.xlu0 %v11377_v54, %s8544_s26 }
 0x6c0   :  { %v7886_v59 = vunpack.i.h.bf16 %v7884_v11  ;;  %v7885_v56 = vunpack.i.l.bf16 %v7884_v11  ;;  %8088 = vrot.lane.b32.xlu1 %v11375_v62, %s8545_s27  ;;  %v11477_v55 = vsel %vm5615_vm11, %v7925_v34, %v7926_v48 }
 0x6c1   :  { %v7934_v26 = vpop.permute.xlu0 %7933  ;;  %v6017_v40 = vpack.c.bf16 %v11477_v55, %v11474_v37  ;;  %v8515_v55 = vld [vmem:[%s12005_s12 + $0x18] sm:$0xff]  }
 0x6c2   :  { %v7936_v24 = vunpack.i.h.bf16 %v7934_v26  ;;  %v7935_v20 = vunpack.i.l.bf16 %v7934_v26  ;;  %v11486_v28 = vsel %vm5696_vm7, %v7885_v56, %v7886_v59 }
 0x6c3   :  { %v7889_v50 = vpop.permute.xlu1 %7888  ;;  %8073 = vrot.lane.b32.xlu0 %v11355_v32, %s8545_s27 }
 0x6c4   :  { %v7891_v1 = vunpack.i.h.bf16 %v7889_v50  ;;  %v7890_v29 = vunpack.i.l.bf16 %v7889_v50  ;;  %8098 = vrot.lane.b32.xlu1 %v11437_v39, %s8543_s8  ;;  %v11489_v21 = vsel %vm5696_vm7, %v7935_v20, %v7936_v24 }
 0x6c5   :  { %v7939_v6 = vpop.permute.xlu0 %7938  ;;  %v6025_v12 = vpack.c.bf16 %v11489_v21, %v11486_v28 }
 0x6c6   :  { %v5483_v36 = vsel %vm112_vm0, %v7890_v29, %v7870_v4  ;;  %v5485_v63 = vsel %vm112_vm0, %v7891_v1, %v7910_v42  ;;  %v7941_v41 = vunpack.i.h.bf16 %v7939_v6 }
 0x6c7   :  { %v6004_v44 = vpack.c.bf16 %v5485_v63, %v5483_v36  ;;  %v7894_v8 = vpop.permute.xlu1 %7893  ;;  %8083 = vrot.lane.b32.xlu0 %v11369_v43, %s8545_s27 }
 0x6c8   :  { %v7896_v58 = vunpack.i.h.bf16 %v7894_v8  ;;  %v7895_v16 = vunpack.i.l.bf16 %v7894_v8  ;;  %8103 = vrot.lane.b32.xlu1 %v11347_v38, %s8542_s21  ;;  %v6374_v8 = vld [vmem:[%s12004_s11 + $0x18] sm:$0xff] }
 0x6c9   :  { %v11499_v13 = vpop.permute.xlu0 %7943  ;;  %6218 = vmatpush1.bf16.msra.mxu0 %v6004_v44 }
 0x6ca   :  { %v11502_v30 = vsel %vm151_vm3, %v7895_v16, %v7875_v60  ;;  %v11505_v57 = vsel %vm151_vm3, %v7896_v58, %v7920_v25  ;;  %v6076_v16 = vld [vmem:[%s12003_s10 + $0x20] sm:$0xff] }
 0x6cb   :  { %v6012_v23 = vpack.c.bf16 %v11505_v57, %v11502_v30  ;;  %v7899_v31 = vpop.permute.xlu1 %7898  ;;  %8093 = vrot.lane.b32.xlu0 %v11371_v47, %s8545_s27 }
 0x6cc   :  { %v7901_v22 = vunpack.i.h.bf16 %v7899_v31  ;;  %v7900_v0 = vunpack.i.l.bf16 %v7899_v31  ;;  %8113 = vrot.lane.b32.xlu1 %v11351_v7, %s8542_s21 }
 0x6cd   :  { %v11516_v4 = vpop.permute.xlu0 %7948 }
 0x6ce   :  { %v11519_v46 = vsel %vm5615_vm11, %v7900_v0, %v7880_v14  ;;  %v11522_v45 = vsel %vm5615_vm11, %v7901_v22, %v7925_v34  ;;  %v7940_v14 = vunpack.i.l.bf16 %v7939_v6  ;;  %v6373_v6 = vld [vmem:[%s12004_s11 + $0x10] sm:$0xff]  ;;  %v7951_v30 = vunpack.i.h.bf16 %v11516_v4 }
 0x6cf   :  { %v6016_v42 = vpack.c.bf16 %v11522_v45, %v11519_v46  ;;  %v7904_v17 = vpop.permute.xlu1 %7903  ;;  %8108 = vrot.lane.b32.xlu0 %v11355_v32, %s8542_s21  ;;  %v7950_v57 = vunpack.i.l.bf16 %v11516_v4 }
 0x6d0   :  { %v7906_v3 = vunpack.i.h.bf16 %v7904_v17  ;;  %v7905_v60 = vunpack.i.l.bf16 %v7904_v17  ;;  %8123 = vrot.lane.b32.xlu1 %v11375_v62, %s8542_s21  ;;  %v5488_v24 = vsel %vm112_vm0, %v7940_v14, %v7941_v41 }
 0x6d1   :  { %v11530_v18 = vpop.permute.xlu0 %7953 }
 0x6d2   :  { %v11533_v9 = vsel %vm5696_vm7, %v7905_v60, %v7885_v56  ;;  %v11536_v2 = vsel %vm5696_vm7, %v7906_v3, %v7935_v20  ;;  %v6077_v60 = vld [vmem:[%s12003_s10 + $0x28] sm:$0xff] }
 0x6d3   :  { %v6024_v33 = vpack.c.bf16 %v11536_v2, %v11533_v9  ;;  %v11540_v52 = vpop.permute.xlu1 %7913  ;;  %8118 = vrot.lane.b32.xlu0 %v11369_v43, %s8542_s21 }
 0x6d4   :  { %8133 = vrot.lane.b32.xlu1 %v11437_v39, %s8544_s26  ;;  %v7916_v31 = vunpack.i.h.bf16 %v11540_v52  ;;  %v7915_v22 = vunpack.i.l.bf16 %v11540_v52 }
 0x6d5   :  { %v7959_v25 = vpop.permute.xlu0 %7958 }
 0x6d6   :  { %v7960_v5 = vunpack.i.l.bf16 %v7959_v25  ;;  %v7961_v34 = vunpack.i.h.bf16 %v7959_v25 }
 0x6d7   :  { %v11546_v35 = vpop.permute.xlu1 %7928  ;;  %8128 = vrot.lane.b32.xlu0 %v11371_v47, %s8542_s21 }
 0x6d8   :  { %8138 = vrot.lane.b32.xlu1 %v11423_v15, %s8542_s21  ;;  %v5487_v56 = vsel %vm112_vm0, %v7960_v5, %v7940_v14  ;;  %v7930_v45 = vunpack.i.l.bf16 %v11546_v35 }
 0x6d9   :  { %v11579_v29 = vpop.permute.xlu0 %7963 }
 0x6db   :  { %v7974_v48 = vpop.permute.xlu1 %7973  ;;  %8143 = vrot.lane.b32.xlu0 %v11427_v27, %s8542_s21 }
 0x6dc   :  { %v7976_v11 = vunpack.i.h.bf16 %v7974_v48  ;;  %v7975_v59 = vunpack.i.l.bf16 %v7974_v48  ;;  %8148 = vrot.lane.b32.xlu1 %v11359_v49, %s8542_s21  ;;  %v6375_v48 = vld [vmem:[%s12004_s11 + $0x20] sm:$0xff] }
 0x6de   :  { %v5489_v26 = vsel %vm112_vm0, %v7961_v34, %v7975_v59  ;;  %v5490_v20 = vsel %vm112_vm0, %v7975_v59, %v7976_v11  ;;  %v6376_v11 = vld [vmem:[%s12004_s11 + $0x28] sm:$0xff] }
 0x6df   :  { %v6006_v50 = vpack.c.bf16 %v5489_v26, %v5487_v56  ;;  %8153 = vrot.lane.b32.xlu0 %v11435_v10, %s8542_s21  ;;  %v6007_v1 = vpack.c.bf16 %v5490_v20, %v5488_v24  ;;  %v6078_v56 = vld [vmem:[%s12003_s10 + $0x30] sm:$0xff] }
 0x6e0   :  { %8163 = vrot.lane.b32.xlu1 %v11347_v38, %s8546_s15 }
 0x6e1   :  { %6219 = vmatprep.subr.bf16.mxu0 %v6007_v1 }
 0x6e2   :  { %6220 = vmatpush1.bf16.msra.mxu0 %v6006_v50 }
 0x6e3   :  { %8158 = vrot.lane.b32.xlu0 %v11377_v54, %s8542_s21 }
 0x6e4   :  { %8173 = vrot.lane.b32.xlu1 %v11351_v7, %s8546_s15 }
 0x6e7   :  { %8168 = vrot.lane.b32.xlu0 %v11355_v32, %s8546_s15 }
 0x6e8   :  { %8183 = vrot.lane.b32.xlu1 %v11375_v62, %s8546_s15 }
 0x6eb   :  { %8178 = vrot.lane.b32.xlu0 %v11369_v43, %s8546_s15 }
 0x6ec   :  { %8193 = vrot.lane.b32.xlu1 %v11437_v39, %s8542_s21 }
 0x6ef   :  { %8188 = vrot.lane.b32.xlu0 %v11371_v47, %s8546_s15 }
 0x6f0   :  { %8198 = vrot.lane.b32.xlu1 %v11423_v15, %s8546_s15  ;;  %v11583_v15 = vpop.permute.xlu1 %7983 }
 0x6f3   :  { %8203 = vrot.lane.b32.xlu0 %v11427_v27, %s8546_s15 }
 0x6f4   :  { %8208 = vrot.lane.b32.xlu1 %v11359_v49, %s8546_s15  ;;  %v11587_v49 = vpop.permute.xlu0 %7968 }
 0x6f7   :  { %8213 = vrot.lane.b32.xlu0 %v11435_v10, %s8546_s15  ;;  %v6075_v10 = vld [vmem:[%s12003_s10 + $0x18] sm:$0xff] }
 0x6f8   :  { %8223 = vrot.lane.b32.xlu1 %v11347_v38, %s8547_s29  ;;  %v6072_v38 = vld [vmem:[%s12003_s10] sm:$0xff] }
 0x6fb   :  { %8218 = vrot.lane.b32.xlu0 %v11377_v54, %s8546_s15  ;;  %v6372_v54 = vld [vmem:[%s12004_s11 + $0x8] sm:$0xff] }
 0x6fc   :  { %8233 = vrot.lane.b32.xlu1 %v11437_v39, %s8546_s15 }
 0x6ff   :  { %8228 = vrot.lane.b32.xlu0 %v11355_v32, %s8547_s29  ;;  %v6073_v32 = vld [vmem:[%s12003_s10 + $0x8] sm:$0xff] }
 0x700   :  { %8238 = vrot.lane.b32.xlu1 %v11351_v7, %s8547_s29  ;;  %v11596_v7 = vpop.permute.xlu1 %7988 }
 0x703   :  { %8243 = vrot.lane.b32.xlu0 %v11369_v43, %s8547_s29  ;;  %v6371_v43 = vld [vmem:[%s12004_s11] sm:$0xff] }
 0x704   :  { %8248 = vrot.lane.b32.xlu1 %v11375_v62, %s8547_s29  ;;  %v7979_v62 = vpop.permute.xlu0 %7978  ;;  %v11607_v27 = vpop.permute.xlu1 %7998 }
 0x705   :  { %v7980_v26 = vunpack.i.l.bf16 %v7979_v62  ;;  %v7981_v1 = vunpack.i.h.bf16 %v7979_v62  ;;  %v6377_v62 = vld [vmem:[%s12004_s11 + $0x30] sm:$0xff] }
 0x707   :  { %8253 = vrot.lane.b32.xlu0 %v11371_v47, %s8547_s29  ;;  %v6074_v47 = vld [vmem:[%s12003_s10 + $0x10] sm:$0xff] }
 0x708   :  { %6082 = vperm.xlu1 %7606, %v6072_v38   ;;  %v11612_v39 = vpop.permute.xlu0 %7993 }
 0x70b   :  { %6087 = vperm.xlu0 %7605, %v6073_v32  }
 0x70c   :  { %6381 = vperm.xlu1 %7606, %v6371_v43  }
 0x70f   :  { %6386 = vperm.xlu0 %7605, %v6372_v54   ;;  %v6079_v54 = vld [vmem:[%s12003_s10 + $0x38] sm:$0xff] }
 0x710   :  { %6092 = vperm.xlu1 %7606, %v6074_v47  }
 0x713   :  { %v8004_v36 = vpop.permute.xlu1 %8003  ;;  %6097 = vperm.xlu0 %7605, %v6075_v10   ;;  %v7986_v10 = vunpack.i.h.bf16 %v11583_v15 }
 0x714   :  { %v8006_v63 = vunpack.i.h.bf16 %v8004_v36  ;;  %v8005_v44 = vunpack.i.l.bf16 %v8004_v36  ;;  %6391 = vperm.xlu1 %7606, %v6373_v6   ;;  %v7985_v6 = vunpack.i.l.bf16 %v11583_v15  ;;  %v6378_v15 = vld [vmem:[%s12004_s11 + $0x38] sm:$0xff] }
 0x715   :  { %v8014_v58 = vpop.permute.xlu0 %8013 }
 0x716   :  { %v8016_v0 = vunpack.i.h.bf16 %v8014_v58  ;;  %v8015_v53 = vunpack.i.l.bf16 %v8014_v58  ;;  %v5535_v17 = vsel %vm112_vm0, %v7915_v22, %v8005_v44  ;;  %v5536_v25 = vsel %vm112_vm0, %v8005_v44, %v8006_v63 }
 0x717   :  { %6396 = vperm.xlu0 %7605, %v6374_v8   ;;  %v11637_v34 = vpop.permute.xlu1 %8008  ;;  %v7945_v22 = vunpack.i.l.bf16 %v11499_v13 }
 0x718   :  { %v5537_v3 = vsel %vm112_vm0, %v7916_v31, %v8015_v53  ;;  %6102 = vperm.xlu1 %7606, %v6076_v16   ;;  %v5538_v41 = vsel %vm112_vm0, %v8015_v53, %v8016_v0  ;;  %v7946_v31 = vunpack.i.h.bf16 %v11499_v13  ;;  %v5582_v53 = vsel %vm151_vm3, %v7985_v6, %v7986_v10 }
 0x719   :  { %v6008_v14 = vpack.c.bf16 %v5537_v3, %v5535_v17  ;;  %v11632_v5 = vpop.permute.xlu0 %8018  ;;  %v6009_v52 = vpack.c.bf16 %v5538_v41, %v5536_v25  ;;  %v7966_v17 = vunpack.i.h.bf16 %v11579_v29  ;;  %v7965_v3 = vunpack.i.l.bf16 %v11579_v29  ;;  %v8508_v25 = vld [vmem:[%s12005_s12 + $0x40] sm:$0xff]  }
 0x71a   :  { %v5580_v13 = vsel %vm151_vm3, %v7945_v22, %v7946_v31  ;;  %v8509_v29 = vld [vmem:[%s12005_s12] sm:$0xff]   ;;  %7243 = vmatprep.subr.bf16.mxu1 %v8508_v25  ;;  %v7931_v10 = vunpack.i.h.bf16 %v11546_v35 }
 0x71b   :  { %6107 = vperm.xlu0 %7605, %v6077_v60   ;;  %6221 = vmatprep.subr.bf16.mxu0 %v6009_v52  ;;  %v5581_v41 = vsel %vm151_vm3, %v7966_v17, %v7985_v6  ;;  %v7991_v52 = vunpack.i.h.bf16 %v11596_v7  ;;  %v8517_v35 = vld [vmem:[%s12005_s12 + $0x20] sm:$0xff]   ;;  %v7995_v17 = vunpack.i.l.bf16 %v11612_v39 }
 0x71c   :  { %6401 = vperm.xlu1 %7606, %v6375_v48   ;;  %6222 = vmatpush1.bf16.msra.mxu0 %v6008_v14  ;;  %v6015_v14 = vpack.c.bf16 %v5582_v53, %v5580_v13  ;;  %v7990_v48 = vunpack.i.l.bf16 %v11596_v7  ;;  %v8511_v7 = vld [vmem:[%s12005_s12 + $0x8] sm:$0xff]  }
 0x71d   :  { %v8024_v59 = vpop.permute.xlu0 %8023  ;;  %7244 = vmatpush3.bf16.msra.mxu1 %v8509_v29 }
 0x71e   :  { %v8026_v24 = vunpack.i.h.bf16 %v8024_v59  ;;  %v8025_v20 = vunpack.i.l.bf16 %v8024_v59  ;;  %v8039_v50 = vpop.permute.xlu1 %8038  ;;  %7245 = vmatprep.subr.bf16.mxu1 %v8510_v51  ;;  %v8512_v59 = vld [vmem:[%s12005_s12 + $0x50] sm:$0xff]  }
 0x71f   :  { %v8041_v38 = vunpack.i.h.bf16 %v8039_v50  ;;  %v8040_v32 = vunpack.i.l.bf16 %v8039_v50  ;;  %6406 = vperm.xlu0 %7605, %v6376_v11   ;;  %v7971_v50 = vunpack.i.h.bf16 %v11587_v49 }
 0x720   :  { %v5539_v43 = vsel %vm112_vm0, %v7980_v26, %v8025_v20  ;;  %6112 = vperm.xlu1 %7606, %v6078_v56   ;;  %v5540_v47 = vsel %vm112_vm0, %v8025_v20, %v8026_v24  ;;  %v8021_v56 = vunpack.i.h.bf16 %v11632_v5  ;;  %v8020_v26 = vunpack.i.l.bf16 %v11632_v5  ;;  %v8513_v5 = vld [vmem:[%s12005_s12 + $0x10] sm:$0xff]  }
 0x721   :  { %v5541_v36 = vsel %vm112_vm0, %v7981_v1, %v8040_v32  ;;  %v11653_v63 = vpop.permute.xlu0 %8028  ;;  %v5542_v44 = vsel %vm112_vm0, %v8040_v32, %v8041_v38  ;;  %v5623_v20 = vsel %vm5615_vm11, %v7990_v48, %v7991_v52  ;;  %v7970_v1 = vunpack.i.l.bf16 %v11587_v49  ;;  %7246 = vmatpush3.bf16.msra.mxu1 %v8511_v7  ;;  %v8514_v49 = vld [vmem:[%s12005_s12 + $0x58] sm:$0xff]  }
 0x722   :  { %v6010_v8 = vpack.c.bf16 %v5541_v36, %v5539_v43  ;;  %v11659_v58 = vpop.permute.xlu1 %8043  ;;  %v6011_v16 = vpack.c.bf16 %v5542_v44, %v5540_v47  ;;  %v8011_v38 = vunpack.i.h.bf16 %v11637_v34  ;;  %v8010_v32 = vunpack.i.l.bf16 %v11637_v34  ;;  %7247 = vmatprep.subr.bf16.mxu1 %v8512_v59  ;;  %v8516_v47 = vld [vmem:[%s12005_s12 + $0x60] sm:$0xff]  }
 0x723   :  { %6117 = vperm.xlu0 %7605, %v6079_v54   ;;  %v5621_v43 = vsel %vm5615_vm11, %v7950_v57, %v7951_v30  ;;  %v5622_v54 = vsel %vm5615_vm11, %v7971_v50, %v7990_v48  ;;  %v5659_v34 = vsel %vm5615_vm11, %v8020_v26, %v8021_v56  ;;  %v5620_v6 = vsel %vm5615_vm11, %v7970_v1, %v7950_v57 }
 0x724   :  { %6411 = vperm.xlu1 %7606, %v6377_v62   ;;  %6223 = vmatprep.subr.bf16.mxu0 %v6011_v16  ;;  %v6019_v37 = vpack.c.bf16 %v5623_v20, %v5621_v43  ;;  %v6018_v62 = vpack.c.bf16 %v5622_v54, %v5620_v6  ;;  %v5657_v46 = vsel %vm5615_vm11, %v8010_v32, %v8011_v38  ;;  %v7956_v30 = vunpack.i.h.bf16 %v11530_v18 }
 0x725   :  { %6224 = vmatpush1.bf16.msra.mxu0 %v6010_v8  ;;  %v11666_v0 = vpop.permute.xlu0 %8033  ;;  %7248 = vmatpush3.bf16.msra.mxu1 %v8513_v5  ;;  %v6021_v44 = vpack.c.bf16 %v5659_v34, %v5657_v46  ;;  %v8031_v57 = vunpack.i.h.bf16 %v11653_v63  ;;  %v8046_v50 = vunpack.i.h.bf16 %v11659_v58  ;;  %v8045_v1 = vunpack.i.l.bf16 %v11659_v58 }
 0x726   :  { %v11671_v60 = vpop.permute.xlu1 %8053  ;;  %6225 = vmatprep.subr.bf16.mxu0 %v6013_v61  ;;  %v5579_v61 = vsel %vm151_vm3, %v7965_v3, %v7945_v22  ;;  %7249 = vmatprep.subr.bf16.mxu1 %v8514_v49  ;;  %v8036_v8 = vunpack.i.h.bf16 %v11666_v0  ;;  %v8035_v16 = vunpack.i.l.bf16 %v11666_v0  ;;  %v7996_v22 = vunpack.i.h.bf16 %v11612_v39 }
 0x727   :  { %6416 = vperm.xlu0 %7605, %v6378_v15   ;;  %v5656_v15 = vsel %vm5615_vm11, %v7930_v45, %v8010_v32  ;;  %v8001_v0 = vunpack.i.h.bf16 %v11607_v27  ;;  %v8056_v43 = vunpack.i.h.bf16 %v11671_v60  ;;  %v8055_v28 = vunpack.i.l.bf16 %v11671_v60  ;;  %v8484_v60 = vld [vmem:[%s12002_s9] ss:$16 sps:$4 sm:$0xff]  }
 0x728   :  { %v5661_v48 = vsel %vm5615_vm11, %v8035_v16, %v8036_v8  ;;  %vm5777_vm0 = vcmask 982016   ;;  %vm5898_vm3 = vcmask 941056  }
 0x729   :  { %6226 = vmatpush1.bf16.msra.mxu0 %v6012_v23  ;;  %v11689_v19 = vpop.permute.xlu0 %8048  ;;  %v6014_v23 = vpack.c.bf16 %v5581_v41, %v5579_v61  ;;  %7250 = vmatpush3.bf16.msra.mxu1 %v8515_v55  ;;  %v8000_v41 = vunpack.i.l.bf16 %v11607_v27  ;;  %v7955_v27 = vunpack.i.l.bf16 %v11530_v18  ;;  %v5737_v6 = vsel %vm5696_vm7, %v8055_v28, %v8045_v1 }
 0x72a   :  { %v11695_v11 = vpop.permute.xlu1 %8068  ;;  %6227 = vmatprep.subr.bf16.mxu0 %v6015_v14  ;;  %7251 = vmatprep.subr.bf16.mxu1 %v8516_v47  ;;  %v5660_v14 = vsel %vm5615_vm11, %v7995_v17, %v8035_v16  ;;  %v8051_v59 = vunpack.i.h.bf16 %v11689_v19  ;;  %v8050_v56 = vunpack.i.l.bf16 %v11689_v19 }
 0x72b   :  { %v5704_v20 = vsel %vm5696_vm7, %v8000_v41, %v8001_v0  ;;  %v5702_v18 = vsel %vm5696_vm7, %v7955_v27, %v7956_v30 }
 0x72c   :  { %v6027_v38 = vpack.c.bf16 %v5704_v20, %v5702_v18  ;;  %v5740_v32 = vsel %vm5696_vm7, %v8050_v56, %v8051_v59  ;;  %v5739_v54 = vsel %vm5696_vm7, %v8056_v43, %v8050_v56 }
 0x72d   :  { %6228 = vmatpush1.bf16.msra.mxu0 %v6014_v23  ;;  %v11707_v24 = vpop.permute.xlu0 %8058  ;;  %7252 = vmatpush3.bf16.msra.mxu1 %v8517_v35  ;;  %v8030_v23 = vunpack.i.l.bf16 %v11653_v63  ;;  %v5703_v63 = vsel %vm5696_vm7, %v8031_v57, %v8000_v41  ;;  %v6028_v45 = vpack.c.bf16 %v5739_v54, %v5737_v6  ;;  %v8490_v57 = vld [vmem:[%s12002_s9 + $0x44] ss:$16 sps:$4 sm:$0xff]  }
 0x72e   :  { %v11712_v4 = vpop.permute.xlu1 %8078  ;;  %6229 = vmatprep.subr.bf16.mxu0 %v6017_v40  ;;  %v8060_v34 = vunpack.i.l.bf16 %v11707_v24  ;;  %v8493_v6 = vld [vmem:[%s12002_s9 + $0x64] ss:$16 sps:$4 sm:$0xff]  }
 0x72f   :  { %v5701_v19 = vsel %vm5696_vm7, %v8030_v23, %v7955_v27  ;;  %v8081_v17 = vunpack.i.h.bf16 %v11712_v4 }
 0x730   :  { %v6026_v49 = vpack.c.bf16 %v5703_v63, %v5701_v19 }
 0x731   :  { %6230 = vmatpush1.bf16.msra.mxu0 %v6016_v42  ;;  %v11733_v40 = vpop.permute.xlu0 %8063  ;;  %v5658_v42 = vsel %vm5615_vm11, %v7931_v10, %v8020_v26  ;;  %v8487_v10 = vld [vmem:[%s12002_s9 + $0x24] ss:$16 sps:$4 sm:$0xff]  }
 0x732   :  { %v11741_v36 = vpop.permute.xlu1 %8088  ;;  %6231 = vmatprep.subr.bf16.mxu0 %v6019_v37  ;;  %v6020_v3 = vpack.c.bf16 %v5658_v42, %v5656_v15  ;;  %v8061_v37 = vunpack.i.h.bf16 %v11707_v24  ;;  %v8065_v9 = vunpack.i.l.bf16 %v11733_v40  ;;  %v8071_v24 = vunpack.i.h.bf16 %v11695_v11 }
 0x733   :  { %v8066_v42 = vunpack.i.h.bf16 %v11733_v40  ;;  %v8091_v41 = vunpack.i.h.bf16 %v11741_v36 }
 0x734   :  { %v5741_v16 = vsel %vm5696_vm7, %v8065_v9, %v8060_v34 }
 0x735   :  { %6232 = vmatpush1.bf16.msra.mxu0 %v6018_v62  ;;  %v11748_v31 = vpop.permute.xlu0 %8073  ;;  %v8070_v62 = vunpack.i.l.bf16 %v11695_v11 }
 0x736   :  { %v8099_v53 = vpop.permute.xlu1 %8098  ;;  %6233 = vmatprep.subr.bf16.mxu0 %v6021_v44  ;;  %v8076_v2 = vunpack.i.h.bf16 %v11748_v31 }
 0x737   :  { %v8101_v13 = vunpack.i.h.bf16 %v8099_v53  ;;  %v8100_v25 = vunpack.i.l.bf16 %v8099_v53 }
 0x739   :  { %v5662_v29 = vsel %vm5615_vm11, %v7996_v22, %v8100_v25  ;;  %6234 = vmatpush1.bf16.msra.mxu0 %v6020_v3  ;;  %v11760_v52 = vpop.permute.xlu0 %8083  ;;  %v5663_v51 = vsel %vm5615_vm11, %v8100_v25, %v8101_v13  ;;  %v8080_v3 = vunpack.i.l.bf16 %v11712_v4  ;;  %v8489_v4 = vld [vmem:[%s12002_s9 + $0x20] ss:$16 sps:$4 sm:$0xff]  }
 0x73a   :  { %v6022_v39 = vpack.c.bf16 %v5662_v29, %v5660_v14  ;;  %v11764_v61 = vpop.permute.xlu1 %8103  ;;  %v6023_v7 = vpack.c.bf16 %v5663_v51, %v5661_v48  ;;  %v8086_v15 = vunpack.i.h.bf16 %v11760_v52  ;;  %v8085_v53 = vunpack.i.l.bf16 %v11760_v52 }
 0x73b   :  { %v8090_v14 = vunpack.i.l.bf16 %v11741_v36  ;;  %v5779_v29 = vsel %vm5777_vm0, %v8070_v62, %v8071_v24  ;;  %v5778_v23 = vsel %vm5777_vm0, %v8080_v3, %v8070_v62  ;;  %v8106_v59 = vunpack.i.h.bf16 %v11764_v61 }
 0x73c   :  { %6235 = vmatprep.subr.bf16.mxu0 %v6023_v7  ;;  %v5783_v27 = vsel %vm5777_vm0, %v8085_v53, %v8086_v15  ;;  %v8105_v56 = vunpack.i.l.bf16 %v11764_v61 }
 0x73d   :  { %6236 = vmatpush1.bf16.msra.mxu0 %v6022_v39  ;;  %v11772_v26 = vpop.permute.xlu0 %8093 }
 0x73e   :  { %v11777_v5 = vpop.permute.xlu1 %8113  ;;  %6237 = vmatprep.subr.bf16.mxu0 %v6025_v12  ;;  %v5738_v12 = vsel %vm5696_vm7, %v8045_v1, %v8046_v50  ;;  %v8096_v48 = vunpack.i.h.bf16 %v11772_v26  ;;  %v8095_v51 = vunpack.i.l.bf16 %v11772_v26  ;;  %v5785_v50 = vsel %vm5777_vm0, %v8090_v14, %v8091_v41 }
 0x73f   :  { %v6029_v55 = vpack.c.bf16 %v5740_v32, %v5738_v12  ;;  %v8116_v63 = vunpack.i.h.bf16 %v11777_v5  ;;  %v6035_v19 = vpack.c.bf16 %v5785_v50, %v5783_v27  ;;  %v5819_v54 = vsel %vm3846_vm13, %v8105_v56, %v8106_v59 }
 0x740   :  { %v5782_v1 = vsel %vm5777_vm0, %v8095_v51, %v8085_v53  ;;  %v5784_v18 = vsel %vm5777_vm0, %v8096_v48, %v8090_v14  ;;  %v8495_v14 = vld [vmem:[%s12002_s9 + $0x60] ss:$16 sps:$4 sm:$0xff]   ;;  %v8498_v51 = vld [vmem:[%s12002_s9 + $0xc] ss:$16 sps:$4 sm:$0xff]  }
 0x741   :  { %6238 = vmatpush1.bf16.msra.mxu0 %v6024_v33  ;;  %v11790_v58 = vpop.permute.xlu0 %8108  ;;  %v8075_v33 = vunpack.i.l.bf16 %v11748_v31  ;;  %v5742_v31 = vsel %vm5696_vm7, %v8060_v34, %v8061_v37 }
 0x742   :  { %v11793_v21 = vpop.permute.xlu1 %8123  ;;  %6239 = vmatprep.subr.bf16.mxu0 %v6027_v38  ;;  %v8111_v7 = vunpack.i.h.bf16 %v11790_v58  ;;  %v8110_v30 = vunpack.i.l.bf16 %v11790_v58  ;;  %v8115_v38 = vunpack.i.l.bf16 %v11777_v5  ;;  %v6034_v5 = vpack.c.bf16 %v5784_v18, %v5782_v1 }
 0x743   :  { %v5781_v22 = vsel %vm5777_vm0, %v8075_v33, %v8076_v2  ;;  %v5780_v52 = vsel %vm5777_vm0, %v8081_v17, %v8075_v33  ;;  %v8126_v28 = vunpack.i.h.bf16 %v11793_v21  ;;  %v8125_v12 = vunpack.i.l.bf16 %v11793_v21  ;;  %v8492_v2 = vld [vmem:[%s12002_s9 + $0x40] ss:$16 sps:$4 sm:$0xff]  }
 0x744   :  { %v6033_v39 = vpack.c.bf16 %v5781_v22, %v5779_v29  ;;  %v6032_v20 = vpack.c.bf16 %v5780_v52, %v5778_v23  ;;  %v5821_v58 = vsel %vm3846_vm13, %v8110_v30, %v8111_v7  ;;  %v5820_v37 = vsel %vm3846_vm13, %v8116_v63, %v8110_v30 }
 0x745   :  { %6240 = vmatpush1.bf16.msra.mxu0 %v6026_v49  ;;  %v11805_v47 = vpop.permute.xlu0 %8118  ;;  %v6037_v9 = vpack.c.bf16 %v5821_v58, %v5819_v54  ;;  %v5818_v33 = vsel %vm3846_vm13, %v8115_v38, %v8105_v56 }
 0x746   :  { %v8134_v46 = vpop.permute.xlu1 %8133  ;;  %6282 = vmatprep.subr.bf16.mxu0 %v6029_v55  ;;  %v8121_v32 = vunpack.i.h.bf16 %v11805_v47  ;;  %v8120_v43 = vunpack.i.l.bf16 %v11805_v47  ;;  %v6036_v24 = vpack.c.bf16 %v5820_v37, %v5818_v33 }
 0x747   :  { %v8136_v44 = vunpack.i.h.bf16 %v8134_v46  ;;  %v8135_v8 = vunpack.i.l.bf16 %v8134_v46 }
 0x748   :  { %6242 = vmatmul.mubr.bf16.vlgmr.msra.gmra.mrb[32].mxu0 %v8484_v60 }
 0x749   :  { %v5743_v11 = vsel %vm5696_vm7, %v8066_v42, %v8135_v8  ;;  %6283 = vmatpush1.bf16.msra.mxu0 %v6028_v45  ;;  %v11820_v35 = vpop.permute.xlu0 %8128  ;;  %v5744_v40 = vsel %vm5696_vm7, %v8135_v8, %v8136_v44  ;;  %6251 = vmatprep.mubr.bf16.mxu0 %v8487_v10  ;;  %v5823_v10 = vsel %vm3846_vm13, %v8120_v43, %v8121_v32 }
 0x74a   :  { %v6030_v13 = vpack.c.bf16 %v5743_v11, %v5741_v16  ;;  %v11825_v25 = vpop.permute.xlu1 %8138  ;;  %v6031_v0 = vpack.c.bf16 %v5744_v40, %v5742_v31  ;;  %v8131_v55 = vunpack.i.h.bf16 %v11820_v35  ;;  %v8130_v34 = vunpack.i.l.bf16 %v11820_v35 }
 0x74b   :  { %v8141_v62 = vunpack.i.h.bf16 %v11825_v25  ;;  %v8140_v46 = vunpack.i.l.bf16 %v11825_v25  ;;  %v5825_v42 = vsel %vm3846_vm13, %v8125_v12, %v8126_v28 }
 0x74c   :  { %6284 = vmatprep.subr.bf16.mxu0 %v6031_v0  ;;  %v5822_v44 = vsel %vm3846_vm13, %v8130_v34, %v8120_v43  ;;  %v5824_v8 = vsel %vm3846_vm13, %v8131_v55, %v8125_v12  ;;  %v6039_v22 = vpack.c.bf16 %v5825_v42, %v5823_v10 }
 0x74d   :  { %6285 = vmatpush1.bf16.msra.mxu0 %v6030_v13  ;;  %v8144_v36 = vpop.permute.xlu0 %8143  ;;  %v6038_v11 = vpack.c.bf16 %v5824_v8, %v5822_v44  ;;  %v5859_v40 = vsel %vm3846_vm13, %v8140_v46, %v8141_v62 }
 0x74e   :  { %v8149_v26 = vpop.permute.xlu1 %8148  ;;  %6286 = vmatprep.subr.bf16.mxu0 %v6033_v39  ;;  %v8146_v21 = vunpack.i.h.bf16 %v8144_v36  ;;  %v8145_v60 = vunpack.i.l.bf16 %v8144_v36 }
 0x74f   :  { %v8151_v16 = vunpack.i.h.bf16 %v8149_v26  ;;  %v8150_v31 = vunpack.i.l.bf16 %v8149_v26 }
 0x750   :  { %6252 = vmatmul.mubr.bf16.gmra.mrb[36].mxu0 %v8489_v4  ;;  %v5861_v53 = vsel %vm3846_vm13, %v8145_v60, %v8146_v21 }
 0x751   :  { %6287 = vmatpush1.bf16.msra.mxu0 %v6032_v20  ;;  %v11852_v61 = vpop.permute.xlu0 %8153  ;;  %6261 = vmatprep.mubr.bf16.mxu0 %v8490_v57  ;;  %v5860_v17 = vsel %vm3846_vm13, %v8151_v16, %v8145_v60  ;;  %v5858_v3 = vsel %vm3846_vm13, %v8150_v31, %v8140_v46  ;;  %v6041_v41 = vpack.c.bf16 %v5861_v53, %v5859_v40 }
 0x752   :  { %v11857_v49 = vpop.permute.xlu1 %8163  ;;  %6288 = vmatprep.subr.bf16.mxu0 %v6035_v19  ;;  %v8156_v13 = vunpack.i.h.bf16 %v11852_v61  ;;  %v8155_v25 = vunpack.i.l.bf16 %v11852_v61  ;;  %v6040_v39 = vpack.c.bf16 %v5860_v17, %v5858_v3 }
 0x753   :  { %v8166_v4 = vunpack.i.h.bf16 %v11857_v49  ;;  %v8165_v7 = vunpack.i.l.bf16 %v11857_v49 }
 0x754   :  { %v5863_v23 = vsel %vm3846_vm13, %v8155_v25, %v8156_v13 }
 0x755   :  { %6289 = vmatpush1.bf16.msra.mxu0 %v6034_v5  ;;  %v8159_v47 = vpop.permute.xlu0 %8158  ;;  %v5900_v12 = vsel %vm5898_vm3, %v8165_v7, %v8166_v4 }
 0x756   :  { %v11873_v45 = vpop.permute.xlu1 %8173  ;;  %6290 = vmatprep.subr.bf16.mxu0 %v6037_v9  ;;  %v8160_v0 = vunpack.i.l.bf16 %v8159_v47  ;;  %v8161_v36 = vunpack.i.h.bf16 %v8159_v47 }
 0x757   :  { %v8176_v56 = vunpack.i.h.bf16 %v11873_v45  ;;  %v8175_v50 = vunpack.i.l.bf16 %v11873_v45 }
 0x758   :  { %6262 = vmatmul.mubr.bf16.gmra.mrb[40].mxu0 %v8492_v2  ;;  %v5862_v59 = vsel %vm3846_vm13, %v8160_v0, %v8155_v25 }
 0x759   :  { %6291 = vmatpush1.bf16.msra.mxu0 %v6036_v24  ;;  %v8169_v15 = vpop.permute.xlu0 %8168  ;;  %6271 = vmatprep.mubr.bf16.mxu0 %v8493_v6  ;;  %v5899_v34 = vsel %vm5898_vm3, %v8175_v50, %v8165_v7 }
 0x75a   :  { %v11879_v35 = vpop.permute.xlu1 %8183  ;;  %6292 = vmatprep.subr.bf16.mxu0 %v6039_v22  ;;  %v8171_v29 = vunpack.i.h.bf16 %v8169_v15  ;;  %v8170_v52 = vunpack.i.l.bf16 %v8169_v15 }
 0x75b   :  { %v8186_v38 = vunpack.i.h.bf16 %v11879_v35  ;;  %v8185_v32 = vunpack.i.l.bf16 %v11879_v35 }
 0x75c   :  { %v5902_v19 = vsel %vm5898_vm3, %v8170_v52, %v8171_v29  ;;  %v5901_v28 = vsel %vm5898_vm3, %v8176_v56, %v8170_v52 }
 0x75d   :  { %6293 = vmatpush1.bf16.msra.mxu0 %v6038_v11  ;;  %v8179_v48 = vpop.permute.xlu0 %8178  ;;  %v6045_v5 = vpack.c.bf16 %v5902_v19, %v5900_v12  ;;  %v5906_v21 = vsel %vm5898_vm3, %v8185_v32, %v8186_v38  ;;  %v6044_v60 = vpack.c.bf16 %v5901_v28, %v5899_v34 }
 0x75e   :  { %v8194_v30 = vpop.permute.xlu1 %8193  ;;  %6294 = vmatprep.subr.bf16.mxu0 %v6041_v41  ;;  %v8181_v26 = vunpack.i.h.bf16 %v8179_v48  ;;  %v8180_v20 = vunpack.i.l.bf16 %v8179_v48 }
 0x75f   :  { %v8196_v27 = vunpack.i.h.bf16 %v8194_v30  ;;  %v8195_v57 = vunpack.i.l.bf16 %v8194_v30 }
 0x760   :  { %6272 = vmatmul.mubr.bf16.gmra.mrb[44].mxu0 %v8495_v14  ;;  %v5904_v37 = vsel %vm5898_vm3, %v8180_v20, %v8181_v26 }
 0x761   :  { %v5864_v1 = vsel %vm3846_vm13, %v8161_v36, %v8195_v57  ;;  %6295 = vmatpush1.bf16.msra.mxu0 %v6040_v39  ;;  %v8189_v18 = vpop.permute.xlu0 %8188  ;;  %v5865_v63 = vsel %vm3846_vm13, %v8195_v57, %v8196_v27  ;;  %7223 = vmatprep.mubr.msk.bf16.mxu0 %vm6196_vm12, %v8498_v51  ;;  %v6047_v6 = vpack.c.bf16 %v5906_v21, %v5904_v37  ;;  %vm5979_vm13 = vcmask 932864   ;;  %v8502_v21 = vld [vmem:[%s12002_s9 + $0x4c] ss:$16 sps:$4 sm:$0xff]  }
 0x762   :  { %v6042_v43 = vpack.c.bf16 %v5864_v1, %v5862_v59  ;;  %v8199_v61 = vpop.permute.xlu1 %8198  ;;  %v6043_v58 = vpack.c.bf16 %v5865_v63, %v5863_v23  ;;  %v8191_v49 = vunpack.i.h.bf16 %v8189_v18  ;;  %v8190_v54 = vunpack.i.l.bf16 %v8189_v18 }
 0x763   :  { %v8201_v47 = vunpack.i.h.bf16 %v8199_v61  ;;  %v8200_v10 = vunpack.i.l.bf16 %v8199_v61 }
 0x764   :  { %6296 = vmatprep.subr.bf16.mxu0 %v6043_v58  ;;  %v5903_v24 = vsel %vm5898_vm3, %v8190_v54, %v8180_v20  ;;  %v5905_v62 = vsel %vm5898_vm3, %v8191_v49, %v8185_v32 }
 0x765   :  { %6297 = vmatpush1.bf16.msra.mxu0 %v6042_v43  ;;  %v8204_v55 = vpop.permute.xlu0 %8203  ;;  %v6046_v16 = vpack.c.bf16 %v5905_v62, %v5903_v24  ;;  %v5940_v31 = vsel %vm5898_vm3, %v8200_v10, %v8201_v47  ;;  %v8505_v47 = vld [vmem:[%s12002_s9 + $0x6c] ss:$16 sps:$4 sm:$0xff]   ;;  %v8520_v62 = vld [vmem:[%s12005_s12 + $0x70] sm:$0xff]  }
 0x766   :  { %v8206_v9 = vunpack.i.h.bf16 %v8204_v55  ;;  %v8205_v2 = vunpack.i.l.bf16 %v8204_v55  ;;  %v8209_v33 = vpop.permute.xlu1 %8208  ;;  %6298 = vmatprep.subr.bf16.mxu0 %v6045_v5  ;;  %v8519_v24 = vld [vmem:[%s12005_s12 + $0x28] sm:$0xff]  }
 0x767   :  { %v8211_v46 = vunpack.i.h.bf16 %v8209_v33  ;;  %v8210_v45 = vunpack.i.l.bf16 %v8209_v33  ;;  %v8501_v33 = vld [vmem:[%s12002_s9 + $0x28] ss:$16 sps:$4 sm:$0xff]  }
 0x768   :  { %v5942_v44 = vsel %vm5898_vm3, %v8205_v2, %v8206_v9  ;;  %v8496_v9 = vld [vmem:[%s12002_s9 + $0x8] ss:$16 sps:$4 sm:$0xff]  }
 0x769   :  { %6299 = vmatpush1.bf16.msra.mxu0 %v6044_v60  ;;  %v8214_v42 = vpop.permute.xlu0 %8213  ;;  %v5941_v22 = vsel %vm5898_vm3, %v8211_v46, %v8205_v2  ;;  %v5939_v15 = vsel %vm5898_vm3, %v8210_v45, %v8200_v10  ;;  %v6049_v53 = vpack.c.bf16 %v5942_v44, %v5940_v31  ;;  %v8499_v2 = vld [vmem:[%s12002_s9 + $0x2c] ss:$16 sps:$4 sm:$0xff]   ;;  %v8504_v60 = vld [vmem:[%s12002_s9 + $0x48] ss:$16 sps:$4 sm:$0xff]   ;;  %v8521_v46 = vld [vmem:[%s12005_s12 + $0x30] sm:$0xff]  }
 0x76a   :  { %v8224_v8 = vpop.permute.xlu1 %8223  ;;  %6300 = vmatprep.subr.bf16.mxu0 %v6047_v6  ;;  %v8216_v11 = vunpack.i.h.bf16 %v8214_v42  ;;  %v8215_v35 = vunpack.i.l.bf16 %v8214_v42  ;;  %v6048_v25 = vpack.c.bf16 %v5941_v22, %v5939_v15  ;;  %v8507_v10 = vld [vmem:[%s12002_s9 + $0x68] ss:$16 sps:$4 sm:$0xff]  }
 0x76b   :  { %v8226_v14 = vunpack.i.h.bf16 %v8224_v8  ;;  %v8225_v29 = vunpack.i.l.bf16 %v8224_v8  ;;  %v8518_v6 = vld [vmem:[%s12005_s12 + $0x68] sm:$0xff]   ;;  %v8522_v45 = vld [vmem:[%s12005_s12 + $0x78] sm:$0xff]  }
 0x76c   :  { %v5944_v39 = vsel %vm5898_vm3, %v8215_v35, %v8216_v11  ;;  %7253 = vmatprep.subr.bf16.mxu1 %v8518_v6  ;;  %v8523_v42 = vld [vmem:[%s12005_s12 + $0x38] sm:$0xff]  }
 0x76d   :  { %6301 = vmatpush1.bf16.msra.mxu0 %v6046_v16  ;;  %v8219_v40 = vpop.permute.xlu0 %8218  ;;  %v5981_v56 = vsel %vm5979_vm13, %v8225_v29, %v8226_v14  ;;  %7254 = vmatpush3.bf16.msra.mxu1 %v8519_v24 }
 0x76e   :  { %v8221_v17 = vunpack.i.h.bf16 %v8219_v40  ;;  %v8220_v3 = vunpack.i.l.bf16 %v8219_v40  ;;  %v8234_v13 = vpop.permute.xlu1 %8233  ;;  %6302 = vmatprep.subr.bf16.mxu0 %v6049_v53  ;;  %7255 = vmatprep.subr.bf16.mxu1 %v8520_v62 }
 0x76f   :  { %v8236_v0 = vunpack.i.h.bf16 %v8234_v13  ;;  %v8235_v41 = vunpack.i.l.bf16 %v8234_v13 }
 0x770   :  { %v5943_v52 = vsel %vm5898_vm3, %v8220_v3, %v8215_v35 }
 0x771   :  { %v5945_v48 = vsel %vm5898_vm3, %v8221_v17, %v8235_v41  ;;  %6303 = vmatpush1.bf16.msra.mxu0 %v6048_v25  ;;  %v8229_v51 = vpop.permute.xlu0 %8228  ;;  %v5946_v4 = vsel %vm5898_vm3, %v8235_v41, %v8236_v0  ;;  %7256 = vmatpush3.bf16.msra.mxu1 %v8521_v46 }
 0x772   :  { %v6050_v7 = vpack.c.bf16 %v5945_v48, %v5943_v52  ;;  %v8231_v30 = vunpack.i.h.bf16 %v8229_v51  ;;  %v8230_v36 = vunpack.i.l.bf16 %v8229_v51  ;;  %v8239_v27 = vpop.permute.xlu1 %8238  ;;  %v6051_v57 = vpack.c.bf16 %v5946_v4, %v5944_v39  ;;  %7257 = vmatprep.subr.bf16.mxu1 %v8522_v45 }
 0x773   :  { %v8241_v23 = vunpack.i.h.bf16 %v8239_v27  ;;  %v8240_v59 = vunpack.i.l.bf16 %v8239_v27 }
 0x774   :  { %6304 = vmatprep.subr.bf16.mxu0 %v6051_v57  ;;  %v5983_v26 = vsel %vm5979_vm13, %v8230_v36, %v8231_v30 }
 0x775   :  { %v5982_v20 = vsel %vm5979_vm13, %v8241_v23, %v8230_v36  ;;  %v5980_v50 = vsel %vm5979_vm13, %v8240_v59, %v8225_v29  ;;  %6305 = vmatpush1.bf16.msra.mxu0 %v6050_v7  ;;  %v8244_v1 = vpop.permute.xlu0 %8243  ;;  %v6053_v18 = vpack.c.bf16 %v5983_v26, %v5981_v56  ;;  %7258 = vmatpush3.bf16.msra.mxu1 %v8523_v42 }
 0x776   :  { %v6052_v63 = vpack.c.bf16 %v5982_v20, %v5980_v50  ;;  %v8246_v19 = vunpack.i.h.bf16 %v8244_v1  ;;  %v8245_v38 = vunpack.i.l.bf16 %v8244_v1  ;;  %v8249_v32 = vpop.permute.xlu1 %8248 }
 0x777   :  { %v8251_v43 = vunpack.i.h.bf16 %v8249_v32  ;;  %v8250_v61 = vunpack.i.l.bf16 %v8249_v32  ;;  %6306 = vmatprep.subr.bf16.mxu0 %v6053_v18 }
 0x778   :  { %v5985_v58 = vsel %vm5979_vm13, %v8245_v38, %v8246_v19 }
 0x779   :  { %6307 = vmatpush1.bf16.msra.mxu0 %v6052_v63  ;;  %v8254_v28 = vpop.permute.xlu0 %8253  ;;  %v5987_v12 = vsel %vm5979_vm13, %v8250_v61, %v8251_v43 }
 0x77a   :  { %v8256_v49 = vunpack.i.h.bf16 %v8254_v28  ;;  %v8255_v54 = vunpack.i.l.bf16 %v8254_v28  ;;  %v6055_v5 = vpack.c.bf16 %v5987_v12, %v5985_v58 }
 0x77c   :  { %v5984_v37 = vsel %vm5979_vm13, %v8255_v54, %v8245_v38  ;;  %v5986_v55 = vsel %vm5979_vm13, %v8256_v49, %v8250_v61  ;;  %6308 = vmatprep.subr.bf16.mxu0 %v6055_v5 }
 0x77d   :  { %v6054_v34 = vpack.c.bf16 %v5986_v55, %v5984_v37 }
 0x77f   :  { %6309 = vmatpush1.bf16.msra.mxu0 %v6054_v34 }
 0x782   :  { %6315 = vmatmul.mubr.bf16.vlgmr.msra.gmra.mrb[32].mxu0 %v8496_v9 }
 0x783   :  { %7224 = vmatprep.mubr.msk.bf16.mxu0 %vm6196_vm12, %v8499_v2 }
 0x787   :  { %v6083_v44 = vpop.permute.xlu1 %6082 }
 0x78a   :  { %6325 = vmatmul.mubr.bf16.gmra.mrb[36].mxu0 %v8501_v33  ;;  %v6088_v8 = vpop.permute.xlu0 %6087 }
 0x78b   :  { %7225 = vmatprep.mubr.msk.bf16.mxu0 %vm6196_vm12, %v8502_v21  ;;  %v6382_v16 = vpop.permute.xlu1 %6381 }
 0x78e   :  { %v6387_v31 = vpop.permute.xlu0 %6386 }
 0x78f   :  { %v6093_v22 = vpop.permute.xlu1 %6092 }
 0x792   :  { %6335 = vmatmul.mubr.bf16.gmra.mrb[40].mxu0 %v8504_v60  ;;  %v6098_v15 = vpop.permute.xlu0 %6097 }
 0x793   :  { %7226 = vmatprep.mubr.msk.bf16.mxu0 %vm6196_vm12, %v8505_v47  ;;  %v6392_v40 = vpop.permute.xlu1 %6391 }
 0x796   :  { %v6397_v41 = vpop.permute.xlu0 %6396 }
 0x797   :  { %v6103_v4 = vpop.permute.xlu1 %6102 }
 0x79a   :  { %6345 = vmatmul.mubr.bf16.gmra.mrb[44].mxu0 %v8507_v10  ;;  %v6108_v56 = vpop.permute.xlu0 %6107 }
 0x79b   :  { %v6402_v32 = vpop.permute.xlu1 %6401 }
 0x79e   :  { %v6407_v28 = vpop.permute.xlu0 %6406 }
 0x79f   :  { %v6113_v47 = vpop.permute.xlu1 %6112 }
 0x7a2   :  { %v6118_v62 = vpop.permute.xlu0 %6117 }
 0x855   :  { %v6316_v53 = vpop.f32.mrb[32].mxu0 }
 0x856   :  { %v7283_v11 = vadd.f32 %v6316_v53, %v6083_v44  ;;  %v6318_v35 = vpop.f32.mrb[33].mxu0 }
 0x857   :  { %v7284_v17 = vadd.f32 %v6318_v35, %v6083_v44  ;;  %v6320_v3 = vpop.f32.mrb[34].mxu0 }
 0x858   :  { %v6419_v13 = vmul.f32 %v7283_v11, %v6382_v16  ;;  %v7285_v25 = vadd.f32 %v6320_v3, %v6088_v8  ;;  %v6322_v0 = vpop.f32.mrb[35].mxu0  ;;  %vm6355_vm6 = vcmp.ge.f32.partialorder %v7283_v11, 0.0 }
 0x859   :  { %v6420_v14 = vmul.f32 %v7284_v17, %v6382_v16  ;;  %v7286_v29 = vadd.f32 %v6322_v0, %v6088_v8  ;;  %vm6356_vm14 = vcmp.ge.f32.partialorder %v7284_v17, 0.0 }
 0x85a   :  { %vm6357_vm8 = vcmp.ge.f32.partialorder %v7285_v25, 0.0  ;;  %v6421_v52 = vmul.f32 %v7285_v25, %v6387_v31  ;;  %v6435_v51 = vsel %vm6355_vm6, %v7283_v11, %v6419_v13  ;;  %v6412_v11 = vpop.permute.xlu1 %6411 }
 0x85b   :  { %vm6358_vm4 = vcmp.ge.f32.partialorder %v7286_v29, 0.0  ;;  %v6422_v48 = vmul.f32 %v7286_v29, %v6387_v31  ;;  %v6436_v36 = vsel %vm6356_vm14, %v7284_v17, %v6420_v14 }
 0x85c   :  { %v6437_v39 = vsel %vm6357_vm8, %v7285_v25, %v6421_v52  ;;  %v6417_v25 = vpop.permute.xlu0 %6416 }
 0x85d   :  { %v6451_v7 = vpack.c.bf16 %v6437_v39, %v6435_v51  ;;  %v6326_v30 = vpop.f32.mrb[36].mxu0  ;;  %v6438_v27 = vsel %vm6358_vm4, %v7286_v29, %v6422_v48 }
 0x85e   :  { %v7287_v57 = vadd.f32 %v6326_v30, %v6093_v22  ;;  %v6328_v23 = vpop.f32.mrb[37].mxu0  ;;  %v6452_v59 = vpack.c.bf16 %v6438_v27, %v6436_v36 }
 0x85f   :  { %v7288_v26 = vadd.f32 %v6328_v23, %v6093_v22  ;;  %v6330_v20 = vpop.f32.mrb[38].mxu0 }
 0x860   :  { %v6423_v50 = vmul.f32 %v7287_v57, %v6392_v40  ;;  %v7289_v1 = vadd.f32 %v6330_v20, %v6098_v15  ;;  %v6332_v18 = vpop.f32.mrb[39].mxu0  ;;  %6619 = vmatprep.mubr.bf16.mxu1 %v6452_v59  ;;  %vm6359_vm1 = vcmp.ge.f32.partialorder %v7287_v57, 0.0 }
 0x861   :  { %v6424_v63 = vmul.f32 %v7288_v26, %v6392_v40  ;;  %v7290_v19 = vadd.f32 %v6332_v18, %v6098_v15  ;;  %6620 = vmatmul.mubr.bf16.vlgmr.msra.gmra.mrb[36].mxu1 %v6451_v7  ;;  %vm6360_vm9 = vcmp.ge.f32.partialorder %v7288_v26, 0.0 }
 0x862   :  { %vm6361_vm2 = vcmp.ge.f32.partialorder %v7289_v1, 0.0  ;;  %v6425_v38 = vmul.f32 %v7289_v1, %v6397_v41  ;;  %v6439_v61 = vsel %vm6359_vm1, %v7287_v57, %v6423_v50 }
 0x863   :  { %vm6362_vm15 = vcmp.ge.f32.partialorder %v7290_v19, 0.0  ;;  %v6426_v43 = vmul.f32 %v7290_v19, %v6397_v41  ;;  %v6440_v49 = vsel %vm6360_vm9, %v7288_v26, %v6424_v63 }
 0x864   :  { %v6441_v58 = vsel %vm6361_vm2, %v7289_v1, %v6425_v38 }
 0x865   :  { %v6336_v12 = vpop.f32.mrb[40].mxu0  ;;  %v6442_v54 = vsel %vm6362_vm15, %v7290_v19, %v6426_v43  ;;  %v6453_v5 = vpack.c.bf16 %v6441_v58, %v6439_v61 }
 0x866   :  { %v7291_v37 = vadd.f32 %v6336_v12, %v6103_v4  ;;  %v6338_v55 = vpop.f32.mrb[41].mxu0  ;;  %v6454_v34 = vpack.c.bf16 %v6442_v54, %v6440_v49 }
 0x867   :  { %v7292_v9 = vadd.f32 %v6338_v55, %v6103_v4  ;;  %v6340_v2 = vpop.f32.mrb[42].mxu0 }
 0x868   :  { %v6427_v33 = vmul.f32 %v7291_v37, %v6402_v32  ;;  %v7293_v21 = vadd.f32 %v6340_v2, %v6108_v56  ;;  %v6342_v60 = vpop.f32.mrb[43].mxu0  ;;  %6627 = vmatprep.mubr.bf16.mxu1 %v6454_v34  ;;  %vm6363_vm5 = vcmp.ge.f32.partialorder %v7291_v37, 0.0 }
 0x869   :  { %v6428_v10 = vmul.f32 %v7292_v9, %v6402_v32  ;;  %v7294_v6 = vadd.f32 %v6342_v60, %v6108_v56  ;;  %6628 = vmatmul.mubr.bf16.gmra.mrb[40].mxu1 %v6453_v5  ;;  %vm6364_vm10 = vcmp.ge.f32.partialorder %v7292_v9, 0.0 }
 0x86a   :  { %vm6365_vm11 = vcmp.ge.f32.partialorder %v7293_v21, 0.0  ;;  %v6429_v24 = vmul.f32 %v7293_v21, %v6407_v28  ;;  %v6443_v45 = vsel %vm6363_vm5, %v7291_v37, %v6427_v33 }
 0x86b   :  { %vm6366_vm7 = vcmp.ge.f32.partialorder %v7294_v6, 0.0  ;;  %v6430_v46 = vmul.f32 %v7294_v6, %v6407_v28  ;;  %v6444_v8 = vsel %vm6364_vm10, %v7292_v9, %v6428_v10 }
 0x86c   :  { %v6445_v42 = vsel %vm6365_vm11, %v7293_v21, %v6429_v24 }
 0x86d   :  { %v6346_v44 = vpop.f32.mrb[44].mxu0  ;;  %v6446_v16 = vsel %vm6366_vm7, %v7294_v6, %v6430_v46  ;;  %v6455_v31 = vpack.c.bf16 %v6445_v42, %v6443_v45 }
 0x86e   :  { %v7295_v22 = vadd.f32 %v6346_v44, %v6113_v47  ;;  %v6348_v15 = vpop.f32.mrb[45].mxu0  ;;  %v6456_v53 = vpack.c.bf16 %v6446_v16, %v6444_v8 }
 0x86f   :  { %v7296_v35 = vadd.f32 %v6348_v15, %v6113_v47  ;;  %v6350_v40 = vpop.f32.mrb[46].mxu0 }
 0x870   :  { %v6431_v17 = vmul.f32 %v7295_v22, %v6412_v11  ;;  %v7297_v3 = vadd.f32 %v6350_v40, %v6118_v62  ;;  %v6352_v13 = vpop.f32.mrb[47].mxu0  ;;  %6635 = vmatprep.mubr.bf16.mxu1 %v6456_v53  ;;  %vm6367_vm0 = vcmp.ge.f32.partialorder %v7295_v22, 0.0 }
 0x871   :  { %v6432_v0 = vmul.f32 %v7296_v35, %v6412_v11  ;;  %v7298_v41 = vadd.f32 %v6352_v13, %v6118_v62  ;;  %6636 = vmatmul.mubr.bf16.gmra.mrb[44].mxu1 %v6455_v31  ;;  %vm6368_vm3 = vcmp.ge.f32.partialorder %v7296_v35, 0.0 }
 0x872   :  { %vm6369_vm12 = vcmp.ge.f32.partialorder %v7297_v3, 0.0  ;;  %v6433_v14 = vmul.f32 %v7297_v3, %v6417_v25  ;;  %v6447_v52 = vsel %vm6367_vm0, %v7295_v22, %v6431_v17 }
 0x873   :  { %vm6370_vm13 = vcmp.ge.f32.partialorder %v7298_v41, 0.0  ;;  %v6434_v29 = vmul.f32 %v7298_v41, %v6417_v25  ;;  %v6448_v51 = vsel %vm6368_vm3, %v7296_v35, %v6432_v0 }
 0x874   :  { %v6449_v48 = vsel %vm6369_vm12, %v7297_v3, %v6433_v14 }
 0x875   :  { %v6450_v39 = vsel %vm6370_vm13, %v7298_v41, %v6434_v29  ;;  %v6457_v4 = vpack.c.bf16 %v6449_v48, %v6447_v52 }
 0x876   :  { %v6458_v7 = vpack.c.bf16 %v6450_v39, %v6448_v51 }
 0x878   :  { %6643 = vmatprep.mubr.bf16.mxu1 %v6458_v7 }
 0x879   :  { %6644 = vmatmul.mubr.bf16.gmra.mrb[48].mxu1 %v6457_v4 }
 0x934   :  { %v7259_v30 = vpop.f32.mrb[36].mxu1 }
 0x935   :  { %v7260_v36 = vpop.f32.mrb[37].mxu1 }
 0x936   :  { %v7261_v27 = vadd.f32 %v7260_v36, %v7259_v30  ;;  %v7262_v57 = vpop.f32.mrb[38].mxu1 }
 0x937   :  { %v7263_v23 = vpop.f32.mrb[39].mxu1 }
 0x938   :  { %6652 = vst [vmem:[%s12006_s13] sm:$0xff] %v7261_v27  ;;  %v7264_v59 = vadd.f32 %v7263_v23, %v7262_v57 }
 0x93a   :  { %6653 = vst [vmem:[%s12006_s13 + $0x8] sm:$0xff] %v7264_v59 }
 0x93c   :  { %v7265_v56 = vpop.f32.mrb[40].mxu1 }
 0x93d   :  { %v7266_v26 = vpop.f32.mrb[41].mxu1 }
 0x93e   :  { %v7267_v20 = vadd.f32 %v7266_v26, %v7265_v56  ;;  %v7268_v50 = vpop.f32.mrb[42].mxu1 }
 0x93f   :  { %v7269_v1 = vpop.f32.mrb[43].mxu1 }
 0x940   :  { %6654 = vst [vmem:[%s12006_s13 + $0x10] sm:$0xff] %v7267_v20  ;;  %v7270_v18 = vadd.f32 %v7269_v1, %v7268_v50 }
 0x942   :  { %6655 = vst [vmem:[%s12006_s13 + $0x18] sm:$0xff] %v7270_v18 }
 0x944   :  { %v7271_v63 = vpop.f32.mrb[44].mxu1 }
 0x945   :  { %v7272_v19 = vpop.f32.mrb[45].mxu1 }
 0x946   :  { %v7273_v38 = vadd.f32 %v7272_v19, %v7271_v63  ;;  %v7274_v32 = vpop.f32.mrb[46].mxu1 }
 0x947   :  { %v7275_v43 = vpop.f32.mrb[47].mxu1 }
 0x948   :  { %6656 = vst [vmem:[%s12006_s13 + $0x20] sm:$0xff] %v7273_v38  ;;  %v7276_v61 = vadd.f32 %v7275_v43, %v7274_v32 }
 0x94a   :  { %6657 = vst [vmem:[%s12006_s13 + $0x28] sm:$0xff] %v7276_v61 }
 0x94c   :  { %v7277_v58 = vpop.f32.mrb[48].mxu1 }
 0x94d   :  { %v7278_v28 = vpop.f32.mrb[49].mxu1 }
 0x94e   :  { %v7279_v12 = vadd.f32 %v7278_v28, %v7277_v58  ;;  %v7280_v49 = vpop.f32.mrb[50].mxu1 }
 0x94f   :  { %v7281_v54 = vpop.f32.mrb[51].mxu1 }
 0x950   :  { %6658 = vst [vmem:[%s12006_s13 + $0x30] sm:$0xff] %v7279_v12  ;;  %v7282_v5 = vadd.f32 %v7281_v54, %v7280_v49 }
 0x952   :  { %6659 = vst [vmem:[%s12006_s13 + $0x38] sm:$0xff] %v7282_v5 }

</bundles_post_ra>
